<compile_context>
chip_gen: v6e
topology: v6e:2x2x1
jax: 0.10.0
libtpu: 0.0.40
codegen_flags: <defaults>
</compile_context>

<pallas_src>
import functools

import jax
import jax.numpy as jnp
from jax.experimental import pallas as pl
from jax.experimental.pallas import tpu as pltpu


VMEM_LIMIT = 32 * 1024 * 1024  # safe on v5e/v6e/v7x; raise for very large tiles.


# ----------------------------- tile helpers -------------------------------- #

def _row_tile(dim, target=256):
    """Row (sublane) tile: up to `target`, must divide dim."""
    if dim <= target:
        return dim
    t = target
    while dim % t:
        t //= 2
    return max(t, 1)


def _lane_tile(dim, target=512):
    """Lane (last-dim) tile: multiple of 128 dividing dim, or the full extent."""
    if dim <= target or dim % 128 != 0:
        return dim
    t = (min(target, dim) // 128) * 128
    while dim % t:
        t -= 128
    return t


# ----------------------------- Pallas kernels ------------------------------ #

def _rmsnorm_matmul_kernel(x_ref, g_ref, w_ref, o_ref):
    """out = RMSNorm(x) @ w  (norm in f32, matmul bf16 operands, f32 acc)."""
    x = x_ref[...].astype(jnp.float32)
    ms = jnp.mean(x * x, axis=-1, keepdims=True)
    xn = (x * jax.lax.rsqrt(ms + 1e-5) * g_ref[...]).astype(x_ref.dtype)
    o_ref[...] = jnp.dot(
        xn, w_ref[...], preferred_element_type=jnp.float32
    ).astype(o_ref.dtype)


def rmsnorm_matmul(x, g, w, *, tm_target=256, tn_target=512):
    """x: [M, K] bf16, g: [1, K] f32, w: [K, N] bf16 -> [M, N] bf16."""
    M, K = x.shape
    K2, N = w.shape
    assert K == K2
    tm = _row_tile(M, tm_target)
    tn = _lane_tile(N, tn_target)
    return pl.pallas_call(
        _rmsnorm_matmul_kernel,
        grid=(M // tm, N // tn),
        in_specs=[
            pl.BlockSpec((tm, K), lambda i, j: (i, 0)),
            pl.BlockSpec((1, K), lambda i, j: (0, 0)),
            pl.BlockSpec((K, tn), lambda i, j: (0, j)),
        ],
        out_specs=pl.BlockSpec((tm, tn), lambda i, j: (i, j)),
        out_shape=jax.ShapeDtypeStruct((M, N), x.dtype),
        compiler_params=pltpu.CompilerParams(
            dimension_semantics=("parallel", "parallel"),
            vmem_limit_bytes=VMEM_LIMIT),
    )(x, g, w)


def _matmul_residual_kernel(x_ref, w_ref, r_ref, o_ref):
    """out = x @ w + residual (f32 accumulation)."""
    y = jnp.dot(x_ref[...], w_ref[...], preferred_element_type=jnp.float32)
    o_ref[...] = (y + r_ref[...].astype(jnp.float32)).astype(o_ref.dtype)


def matmul_residual(x, w, res, *, tm_target=256, tn_target=512):
    """x: [M, K], w: [K, N], res: [M, N] -> [M, N] (all bf16)."""
    M, K = x.shape
    K2, N = w.shape
    assert K == K2 and res.shape == (M, N)
    tm = _row_tile(M, tm_target)
    tn = _lane_tile(N, tn_target)
    return pl.pallas_call(
        _matmul_residual_kernel,
        grid=(M // tm, N // tn),
        in_specs=[
            pl.BlockSpec((tm, K), lambda i, j: (i, 0)),
            pl.BlockSpec((K, tn), lambda i, j: (0, j)),
            pl.BlockSpec((tm, tn), lambda i, j: (i, j)),
        ],
        out_specs=pl.BlockSpec((tm, tn), lambda i, j: (i, j)),
        out_shape=jax.ShapeDtypeStruct((M, N), x.dtype),
        compiler_params=pltpu.CompilerParams(
            dimension_semantics=("parallel", "parallel"),
            vmem_limit_bytes=VMEM_LIMIT),
    )(x, w, res)


def _ffn_kernel(x_ref, g_ref, w1_ref, w2_ref, w3_ref, o_ref, xn_ref, acc_ref):
    """Fused RMSNorm + SwiGLU FFN + residual, hidden dim tiled (f32 accumulator)."""
    h_idx = pl.program_id(1)

    @pl.when(h_idx == 0)
    def _():
        x = x_ref[...].astype(jnp.float32)
        ms = jnp.mean(x * x, axis=-1, keepdims=True)
        xn_ref[...] = (x * jax.lax.rsqrt(ms + 1e-5) * g_ref[...]).astype(xn_ref.dtype)
        acc_ref[...] = jnp.zeros_like(acc_ref)

    xn = xn_ref[...]
    h1 = jnp.dot(xn, w1_ref[...], preferred_element_type=jnp.float32)
    h2 = jnp.dot(xn, w2_ref[...], preferred_element_type=jnp.float32)
    gate = (h1 * jax.nn.sigmoid(h1)) * h2                     # SiLU(fc1) * fc2
    acc_ref[...] += jnp.dot(
        gate.astype(xn.dtype), w3_ref[...], preferred_element_type=jnp.float32)

    @pl.when(h_idx == pl.num_programs(1) - 1)
    def _():
        o_ref[...] = (acc_ref[...] + x_ref[...].astype(jnp.float32)).astype(o_ref.dtype)


def feed_forward(x, g, w1, w2, w3, *, tm_target=256, th_target=512):
    """x: [M, D], w1/w2: [D, H], w3: [H, D] -> [M, D] = FFN(RMSNorm(x)) + x."""
    M, D = x.shape
    D2, H = w1.shape
    assert D == D2 and w3.shape == (H, D)
    tm = _row_tile(M, tm_target)
    th = _lane_tile(H, th_target)
    return pl.pallas_call(
        _ffn_kernel,
        grid=(M // tm, H // th),
        in_specs=[
            pl.BlockSpec((tm, D), lambda i, h: (i, 0)),
            pl.BlockSpec((1, D), lambda i, h: (0, 0)),
            pl.BlockSpec((D, th), lambda i, h: (0, h)),
            pl.BlockSpec((D, th), lambda i, h: (0, h)),
            pl.BlockSpec((th, D), lambda i, h: (h, 0)),
        ],
        out_specs=pl.BlockSpec((tm, D), lambda i, h: (i, 0)),
        out_shape=jax.ShapeDtypeStruct((M, D), x.dtype),
        scratch_shapes=[
            pltpu.VMEM((tm, D), x.dtype),       # cached normalized activation
            pltpu.VMEM((tm, D), jnp.float32),   # f32 accumulator
        ],
        compiler_params=pltpu.CompilerParams(
            dimension_semantics=("parallel", "arbitrary"),
            vmem_limit_bytes=VMEM_LIMIT),
    )(x, g, w1, w2, w3)


def _attention_kernel(q_ref, k_ref, v_ref, cos_ref, sin_ref, o_ref, *, scale):
    """Causal attention for a block of heads; RoPE applied in-kernel.

    q/k/v blocks: [1, hpb, T, Dh] bf16; cos/sin: [T, Dh] f32.
    """
    _, hpb, T, Dh = q_ref.shape
    cos = cos_ref[...][None]                     # [1, T, Dh] f32
    sin = sin_ref[...][None]

    def rope(x):                                 # x: [hpb, T, Dh] f32
        x1 = x[..., : Dh // 2]
        x2 = x[..., Dh // 2:]
        rot = jnp.concatenate([-x2, x1], axis=-1)
        return x * cos + rot * sin

    # RoPE in f32, then bf16 operands into the MXU (f32 accumulation).
    q = (rope(q_ref[0].astype(jnp.float32)) * scale).astype(o_ref.dtype)
    k = rope(k_ref[0].astype(jnp.float32)).astype(o_ref.dtype)

    s = jnp.einsum("hqd,hkd->hqk", q, k, preferred_element_type=jnp.float32)
    row = jax.lax.broadcasted_iota(jnp.int32, (hpb, T, T), 1)
    col = jax.lax.broadcasted_iota(jnp.int32, (hpb, T, T), 2)
    s = jnp.where(col > row, -1e30, s)           # causal mask (diag never masked)

    m = jnp.max(s, axis=-1, keepdims=True)
    p = jnp.exp(s - m)
    p = p * pl.reciprocal(jnp.sum(p, axis=-1, keepdims=True), approx=True)

    out = jnp.einsum("hqk,hkd->hqd", p.astype(v_ref.dtype), v_ref[0],
                     preferred_element_type=jnp.float32)
    o_ref[0] = out.astype(o_ref.dtype)


def attention(q, k, v, cos, sin, *, heads_per_block=8):
    """q/k/v: [B, H, T, Dh] bf16 (pre-RoPE); cos/sin: [T, Dh] f32 -> [B, H, T, Dh]."""
    # TODO(synk): flash-style KV tiling for long contexts; full [T,T] scores assume short T.
    B, H, T, Dh = q.shape
    hpb = min(H, heads_per_block)
    while H % hpb:
        hpb -= 1
    scale = 1.0 / float(Dh) ** 0.5
    kern = functools.partial(_attention_kernel, scale=scale)
    blk = pl.BlockSpec((1, hpb, T, Dh), lambda b, h: (b, h, 0, 0))
    return pl.pallas_call(
        kern,
        grid=(B, H // hpb),
        in_specs=[blk, blk, blk,
                  pl.BlockSpec((T, Dh), lambda b, h: (0, 0)),
                  pl.BlockSpec((T, Dh), lambda b, h: (0, 0))],
        out_specs=blk,
        out_shape=jax.ShapeDtypeStruct((B, H, T, Dh), q.dtype),
        compiler_params=pltpu.CompilerParams(
            dimension_semantics=("parallel", "parallel"),
            vmem_limit_bytes=VMEM_LIMIT),
    )(q, k, v, cos, sin)


# ------------------------------ JAX glue ----------------------------------- #

def precompute_rope_params(head_dim, theta_base=10000.0, context_length=4096):
    inv_freq = 1.0 / theta_base ** (
        jnp.arange(0, head_dim, 2, dtype=jnp.float32)[: head_dim // 2] / head_dim
    )
    positions = jnp.arange(context_length, dtype=jnp.float32)
    angles = positions[:, None] * inv_freq[None, :]
    angles = jnp.concatenate([angles, angles], axis=1)
    return jnp.cos(angles), jnp.sin(angles)


def transformer_block(p, x2d, cos_t, sin_t, B, T, n_heads):
    M, D = x2d.shape
    head_dim = D // n_heads

    # --- attention sub-block: fused RMSNorm + QKV projection (1 launch) ---
    qkv = rmsnorm_matmul(x2d, p["rms1_w"], p["wqkv"])                 # [M, 3D]
    qkv = qkv.reshape(B, T, 3, n_heads, head_dim).transpose(2, 0, 3, 1, 4)
    q, k, v = qkv[0], qkv[1], qkv[2]                                  # [B, H, T, Dh]

    att = attention(q, k, v, cos_t, sin_t)                            # [B, H, T, Dh]
    att2d = att.transpose(0, 2, 1, 3).reshape(M, D)
    x2d = matmul_residual(att2d, p["wo"], x2d)                        # wo proj + residual

    # --- feed-forward sub-block: fused norm + SwiGLU + down-proj + residual ---
    return feed_forward(x2d, p["rms2_w"], p["w1"], p["w2"], p["w3"])


def llama2_forward(params, tokens, n_heads):
    B, T = tokens.shape
    # TODO(synk): token-embedding gather stays in XLA (jnp.take).
    x = jnp.take(params["tok_embed"], tokens, axis=0)                 # [B, T, D] bf16
    D = x.shape[-1]
    x2d = x.reshape(B * T, D)
    cos_t = params["cos"][:T]
    sin_t = params["sin"][:T]
    for layer in params["layers"]:
        x2d = transformer_block(layer, x2d, cos_t, sin_t, B, T, n_heads)
    # final RMSNorm fused into the lm-head matmul (vocab tiled along N).
    logits = rmsnorm_matmul(x2d, params["norm_w"], params["out_w"])   # [M, vocab]
    return logits.reshape(B, T, -1)


# ----------------------------- init & main ---------------------------------- #

def init_params(key, *, vocab, emb_dim, hidden_dim, n_layers, n_heads, context_len):
    head_dim = emb_dim // n_heads
    dt = jnp.bfloat16

    def lin(k, fan_in, fan_out):
        return (0.02 * jax.random.normal(k, (fan_in, fan_out), jnp.float32)).astype(dt)

    keys = jax.random.split(key, 2 + n_layers)
    cos, sin = precompute_rope_params(head_dim, context_length=context_len)
    params = {
        "tok_embed": (0.02 * jax.random.normal(keys[0], (vocab, emb_dim), jnp.float32)).astype(dt),
        "out_w": lin(keys[1], emb_dim, vocab),
        "norm_w": jnp.ones((1, emb_dim), jnp.float32),
        "cos": cos, "sin": sin,
        "layers": [],
    }
    for li in range(n_layers):
        lk = jax.random.split(keys[2 + li], 5)
        params["layers"].append({
            "wqkv": lin(lk[0], emb_dim, 3 * emb_dim),   # [wq | wk | wv]
            "wo": lin(lk[1], emb_dim, emb_dim),
            "w1": lin(lk[2], emb_dim, hidden_dim),
            "w2": lin(lk[3], emb_dim, hidden_dim),
            "w3": lin(lk[4], hidden_dim, emb_dim),
            "rms1_w": jnp.ones((1, emb_dim), jnp.float32),
            "rms2_w": jnp.ones((1, emb_dim), jnp.float32),
        })
    return params


if __name__ == "__main__":
    # Small, shape-consistent config (LLama2 structure, shrunk for the test).
    # head_dim = 128 matches real Llama proportions and keeps lanes dense.
    VOCAB, CONTEXT, EMB, N_HEADS, N_LAYERS, HIDDEN = 512, 128, 256, 2, 2, 768
    B, T = 2, 16

    key = jax.random.PRNGKey(0)
    pkey, tkey = jax.random.split(key)
    params = init_params(
        pkey, vocab=VOCAB, emb_dim=EMB, hidden_dim=HIDDEN,
        n_layers=N_LAYERS, n_heads=N_HEADS, context_len=CONTEXT,
    )
    tokens = jax.random.randint(tkey, (B, T), 0, VOCAB, dtype=jnp.int32)

    fwd = jax.jit(llama2_forward, static_argnames=("n_heads",))
    logits = fwd(params, tokens, n_heads=N_HEADS)
    jax.block_until_ready(logits)
    assert logits.shape == (B, T, VOCAB) and logits.dtype == jnp.bfloat16
    print("KERNEL_OK")
</pallas_src>

<mosaic_0001>
module attributes {stable_mosaic.version = 11 : i64} {
  func.func @_rmsnorm_matmul_kernel(%arg0: i32, %arg1: i32, %arg2: memref<32x256xbf16, #tpu.memory_space<vmem>>, %arg3: memref<1x256xf32, #tpu.memory_space<vmem>>, %arg4: memref<256x384xbf16, #tpu.memory_space<vmem>>, %arg5: memref<32x384xbf16, #tpu.memory_space<vmem>>) attributes {dimension_semantics = [#tpu.dimension_semantics<parallel>, #tpu.dimension_semantics<parallel>], iteration_bounds = array<i64: 1, 2>, scalar_prefetch = 0 : i64, scratch_operands = 0 : i64, tpu.core_type = #tpu.core_type<tc>, window_params = [{transform_indices = @transform_0, window_bounds = array<i64: 32, 256>}, {pipeline_mode = #tpu.pipeline_mode<synchronous>, transform_indices = @transform_1, window_bounds = array<i64: 1, 256>}, {transform_indices = @transform_2, window_bounds = array<i64: 256, 384>}, {transform_indices = @transform_3, window_bounds = array<i64: 32, 384>}]} {
    %c0 = arith.constant 0 : index
    %c0_0 = arith.constant 0 : index
    %0 = vector.load %arg2[%c0, %c0_0] : memref<32x256xbf16, #tpu.memory_space<vmem>>, vector<32x256xbf16>
    %1 = arith.extf %0 : vector<32x256xbf16> to vector<32x256xf32>
    %2 = arith.mulf %1, %1 : vector<32x256xf32>
    %cst = arith.constant dense<0.000000e+00> : vector<32xf32>
    %3 = vector.multi_reduction <add>, %2, %cst [1] : vector<32x256xf32> to vector<32xf32>
    %4 = vector.shape_cast %3 : vector<32xf32> to vector<32x1xf32>
    %cst_1 = arith.constant 2.560000e+02 : f32
    %5 = vector.broadcast %cst_1 : f32 to vector<32x1xf32>
    %6 = arith.divf %4, %5 : vector<32x1xf32>
    %cst_2 = arith.constant 9.99999974E-6 : f32
    %7 = vector.broadcast %cst_2 : f32 to vector<32x1xf32>
    %8 = arith.addf %6, %7 : vector<32x1xf32>
    %9 = math.rsqrt %8 : vector<32x1xf32>
    %10 = vector.broadcast %9 : vector<32x1xf32> to vector<32x256xf32>
    %11 = arith.mulf %1, %10 : vector<32x256xf32>
    %c0_3 = arith.constant 0 : index
    %c0_4 = arith.constant 0 : index
    %12 = vector.load %arg3[%c0_3, %c0_4] : memref<1x256xf32, #tpu.memory_space<vmem>>, vector<1x256xf32>
    %13 = vector.broadcast %12 : vector<1x256xf32> to vector<32x256xf32>
    %14 = arith.mulf %11, %13 : vector<32x256xf32>
    %15 = arith.truncf %14 : vector<32x256xf32> to vector<32x256xbf16>
    %c0_5 = arith.constant 0 : index
    %c0_6 = arith.constant 0 : index
    %16 = vector.load %arg4[%c0_5, %c0_6] : memref<256x384xbf16, #tpu.memory_space<vmem>>, vector<256x384xbf16>
    %cst_7 = arith.constant dense<0.000000e+00> : vector<32x384xf32>
    %17 = tpu.matmul %15, %16, %cst_7 {dimension_numbers = #tpu.dot_dimension_numbers<[1], [0], [0], [1], [0, 0, 1, 1], [], []>} : vector<32x256xbf16>, vector<256x384xbf16>, vector<32x384xf32> -> vector<32x384xf32>
    %18 = arith.truncf %17 : vector<32x384xf32> to vector<32x384xbf16>
    %c0_8 = arith.constant 0 : index
    %c0_9 = arith.constant 0 : index
    %19 = vector.load %arg5[%c0_8, %c0_9] : memref<32x384xbf16, #tpu.memory_space<vmem>>, vector<32x384xbf16>
    tpu.vector_store %arg5[%c0_8, %c0_9], %18 {strides = array<i32>} : memref<32x384xbf16, #tpu.memory_space<vmem>>, vector<32x384xbf16>,
    return
  }
  func.func @transform_0(%arg0: i32, %arg1: i32) -> (i32, i32) {
    %c0_i32 = arith.constant 0 : i32
    %c0_i32_0 = arith.constant 0 : i32
    return %arg0, %c0_i32 : i32, i32
  }
  func.func @transform_1(%arg0: i32, %arg1: i32) -> (i32, i32) {
    %c0_i32 = arith.constant 0 : i32
    %c0_i32_0 = arith.constant 0 : i32
    %c0_i32_1 = arith.constant 0 : i32
    return %c0_i32, %c0_i32_0 : i32, i32
  }
  func.func @transform_2(%arg0: i32, %arg1: i32) -> (i32, i32) {
    %c0_i32 = arith.constant 0 : i32
    %c0_i32_0 = arith.constant 0 : i32
    return %c0_i32, %arg1 : i32, i32
  }
  func.func @transform_3(%arg0: i32, %arg1: i32) -> (i32, i32) {
    %c0_i32 = arith.constant 0 : i32
    return %arg0, %arg1 : i32, i32
  }
}

module attributes {stable_mosaic.version = 11 : i64} {
  func.func @_attention_kernel(%arg0: i32, %arg1: i32, %arg2: memref<1x2x16x128xbf16, #tpu.memory_space<vmem>>, %arg3: memref<1x2x16x128xbf16, #tpu.memory_space<vmem>>, %arg4: memref<1x2x16x128xbf16, #tpu.memory_space<vmem>>, %arg5: memref<16x128xf32, #tpu.memory_space<vmem>>, %arg6: memref<16x128xf32, #tpu.memory_space<vmem>>, %arg7: memref<1x2x16x128xbf16, #tpu.memory_space<vmem>>) attributes {dimension_semantics = [#tpu.dimension_semantics<parallel>, #tpu.dimension_semantics<parallel>], iteration_bounds = array<i64: 2, 1>, scalar_prefetch = 0 : i64, scratch_operands = 0 : i64, tpu.core_type = #tpu.core_type<tc>, window_params = [{transform_indices = @transform_0, window_bounds = array<i64: 1, 2, 16, 128>}, {transform_indices = @transform_1, window_bounds = array<i64: 1, 2, 16, 128>}, {transform_indices = @transform_2, window_bounds = array<i64: 1, 2, 16, 128>}, {pipeline_mode = #tpu.pipeline_mode<synchronous>, transform_indices = @transform_3, window_bounds = array<i64: 16, 128>}, {pipeline_mode = #tpu.pipeline_mode<synchronous>, transform_indices = @transform_4, window_bounds = array<i64: 16, 128>}, {transform_indices = @transform_5, window_bounds = array<i64: 1, 2, 16, 128>}]} {
    %c0 = arith.constant 0 : index
    %c0_0 = arith.constant 0 : index
    %0 = vector.load %arg5[%c0, %c0_0] : memref<16x128xf32, #tpu.memory_space<vmem>>, vector<16x128xf32>
    %1 = vector.shape_cast %0 : vector<16x128xf32> to vector<1x16x128xf32>
    %c0_1 = arith.constant 0 : index
    %c0_2 = arith.constant 0 : index
    %2 = vector.load %arg6[%c0_1, %c0_2] : memref<16x128xf32, #tpu.memory_space<vmem>>, vector<16x128xf32>
    %3 = vector.shape_cast %2 : vector<16x128xf32> to vector<1x16x128xf32>
    %c0_3 = arith.constant 0 : index
    %c0_4 = arith.constant 0 : index
    %c0_5 = arith.constant 0 : index
    %c0_6 = arith.constant 0 : index
    %4 = vector.load %arg2[%c0_3, %c0_4, %c0_5, %c0_6] : memref<1x2x16x128xbf16, #tpu.memory_space<vmem>>, vector<1x2x16x128xbf16>
    %5 = vector.shape_cast %4 : vector<1x2x16x128xbf16> to vector<2x16x128xbf16>
    %6 = arith.extf %5 : vector<2x16x128xbf16> to vector<2x16x128xf32>
    %7 = vector.extract_strided_slice %6 {offsets = [0, 0, 0], sizes = [2, 16, 64], strides = [1, 1, 1]} : vector<2x16x128xf32> to vector<2x16x64xf32>
    %8 = vector.extract_strided_slice %6 {offsets = [0, 0, 64], sizes = [2, 16, 64], strides = [1, 1, 1]} : vector<2x16x128xf32> to vector<2x16x64xf32>
    %cst = arith.constant 0.000000e+00 : f32
    %9 = vector.broadcast %cst : f32 to vector<2x16x64xf32>
    %10 = arith.subf %9, %8 : vector<2x16x64xf32>
    %11 = tpu.concatenate %10, %7 in 2 : vector<2x16x64xf32>, vector<2x16x64xf32> -> vector<2x16x128xf32>
    %12 = vector.broadcast %1 : vector<1x16x128xf32> to vector<2x16x128xf32>
    %13 = arith.mulf %6, %12 : vector<2x16x128xf32>
    %14 = vector.broadcast %3 : vector<1x16x128xf32> to vector<2x16x128xf32>
    %15 = arith.mulf %11, %14 : vector<2x16x128xf32>
    %16 = arith.addf %13, %15 : vector<2x16x128xf32>
    %cst_7 = arith.constant 0.0883883461 : f32
    %17 = vector.broadcast %cst_7 : f32 to vector<2x16x128xf32>
    %18 = arith.mulf %16, %17 : vector<2x16x128xf32>
    %19 = arith.truncf %18 : vector<2x16x128xf32> to vector<2x16x128xbf16>
    %c0_8 = arith.constant 0 : index
    %c0_9 = arith.constant 0 : index
    %c0_10 = arith.constant 0 : index
    %c0_11 = arith.constant 0 : index
    %20 = vector.load %arg3[%c0_8, %c0_9, %c0_10, %c0_11] : memref<1x2x16x128xbf16, #tpu.memory_space<vmem>>, vector<1x2x16x128xbf16>
    %21 = vector.shape_cast %20 : vector<1x2x16x128xbf16> to vector<2x16x128xbf16>
    %22 = arith.extf %21 : vector<2x16x128xbf16> to vector<2x16x128xf32>
    %23 = vector.extract_strided_slice %22 {offsets = [0, 0, 0], sizes = [2, 16, 64], strides = [1, 1, 1]} : vector<2x16x128xf32> to vector<2x16x64xf32>
    %24 = vector.extract_strided_slice %22 {offsets = [0, 0, 64], sizes = [2, 16, 64], strides = [1, 1, 1]} : vector<2x16x128xf32> to vector<2x16x64xf32>
    %cst_12 = arith.constant 0.000000e+00 : f32
    %25 = vector.broadcast %cst_12 : f32 to vector<2x16x64xf32>
    %26 = arith.subf %25, %24 : vector<2x16x64xf32>
    %27 = tpu.concatenate %26, %23 in 2 : vector<2x16x64xf32>, vector<2x16x64xf32> -> vector<2x16x128xf32>
    %28 = vector.broadcast %1 : vector<1x16x128xf32> to vector<2x16x128xf32>
    %29 = arith.mulf %22, %28 : vector<2x16x128xf32>
    %30 = vector.broadcast %3 : vector<1x16x128xf32> to vector<2x16x128xf32>
    %31 = arith.mulf %27, %30 : vector<2x16x128xf32>
    %32 = arith.addf %29, %31 : vector<2x16x128xf32>
    %33 = arith.truncf %32 : vector<2x16x128xf32> to vector<2x16x128xbf16>
    "tpu.trace_start"() <{level = 10 : i32, message = "hqd,hkd->hqk"}> : () -> ()
    %cst_13 = arith.constant dense<0.000000e+00> : vector<2x16x16xf32>
    %34 = tpu.matmul %19, %33, %cst_13 {dimension_numbers = #tpu.dot_dimension_numbers<[2], [2], [1], [1], [0, 0, 0, 1, 1, 1], [0], [0]>} : vector<2x16x128xbf16>, vector<2x16x128xbf16>, vector<2x16x16xf32> -> vector<2x16x16xf32>
    "tpu.trace_stop"() : () -> ()
    %35 = tpu.iota {dimensions = array<i32: 1>} : vector<2x16x16xi32>
    %36 = tpu.iota {dimensions = array<i32: 2>} : vector<2x16x16xi32>
    %37 = arith.cmpi sgt, %36, %35 : vector<2x16x16xi32>
    %cst_14 = arith.constant -1.000000e+30 : f32
    %38 = vector.broadcast %cst_14 : f32 to vector<2x16x16xf32>
    %39 = arith.select %37, %38, %34 : vector<2x16x16xi1>, vector<2x16x16xf32>
    %cst_15 = arith.constant dense<0xFF800000> : vector<2x16xf32>
    %40 = vector.multi_reduction <maximumf>, %39, %cst_15 [2] : vector<2x16x16xf32> to vector<2x16xf32>
    %41 = vector.shape_cast %40 : vector<2x16xf32> to vector<2x16x1xf32>
    %42 = vector.broadcast %41 : vector<2x16x1xf32> to vector<2x16x16xf32>
    %43 = arith.subf %39, %42 : vector<2x16x16xf32>
    %44 = math.exp %43 : vector<2x16x16xf32>
    %cst_16 = arith.constant dense<0.000000e+00> : vector<2x16xf32>
    %45 = vector.multi_reduction <add>, %44, %cst_16 [2] : vector<2x16x16xf32> to vector<2x16xf32>
    %46 = vector.shape_cast %45 : vector<2x16xf32> to vector<2x16x1xf32>
    %47 = tpu.reciprocal %46 {approx = true} : vector<2x16x1xf32> -> vector<2x16x1xf32>
    %48 = vector.broadcast %47 : vector<2x16x1xf32> to vector<2x16x16xf32>
    %49 = arith.mulf %44, %48 : vector<2x16x16xf32>
    %50 = arith.truncf %49 : vector<2x16x16xf32> to vector<2x16x16xbf16>
    %c0_17 = arith.constant 0 : index
    %c0_18 = arith.constant 0 : index
    %c0_19 = arith.constant 0 : index
    %c0_20 = arith.constant 0 : index
    %51 = vector.load %arg4[%c0_17, %c0_18, %c0_19, %c0_20] : memref<1x2x16x128xbf16, #tpu.memory_space<vmem>>, vector<1x2x16x128xbf16>
    %52 = vector.shape_cast %51 : vector<1x2x16x128xbf16> to vector<2x16x128xbf16>
    "tpu.trace_start"() <{level = 10 : i32, message = "hqk,hkd->hqd"}> : () -> ()
    %cst_21 = arith.constant dense<0.000000e+00> : vector<2x16x128xf32>
    %53 = tpu.matmul %50, %52, %cst_21 {dimension_numbers = #tpu.dot_dimension_numbers<[2], [1], [1], [2], [0, 0, 0, 1, 1, 2], [0], [0]>} : vector<2x16x16xbf16>, vector<2x16x128xbf16>, vector<2x16x128xf32> -> vector<2x16x128xf32>
    "tpu.trace_stop"() : () -> ()
    %54 = arith.truncf %53 : vector<2x16x128xf32> to vector<2x16x128xbf16>
    %c0_22 = arith.constant 0 : index
    %c0_23 = arith.constant 0 : index
    %c0_24 = arith.constant 0 : index
    %c0_25 = arith.constant 0 : index
    %55 = vector.load %arg7[%c0_22, %c0_23, %c0_24, %c0_25] : memref<1x2x16x128xbf16, #tpu.memory_space<vmem>>, vector<1x2x16x128xbf16>
    %56 = vector.shape_cast %55 : vector<1x2x16x128xbf16> to vector<2x16x128xbf16>
    %57 = vector.shape_cast %54 : vector<2x16x128xbf16> to vector<1x2x16x128xbf16>
    tpu.vector_store %arg7[%c0_22, %c0_23, %c0_24, %c0_25], %57 {strides = array<i32>} : memref<1x2x16x128xbf16, #tpu.memory_space<vmem>>, vector<1x2x16x128xbf16>,
    return
  }
  func.func @transform_0(%arg0: i32, %arg1: i32) -> (i32, i32, i32, i32) {
    %c0_i32 = arith.constant 0 : i32
    %c0_i32_0 = arith.constant 0 : i32
    %c0_i32_1 = arith.constant 0 : i32
    return %arg0, %arg1, %c0_i32, %c0_i32_0 : i32, i32, i32, i32
  }
  func.func @transform_1(%arg0: i32, %arg1: i32) -> (i32, i32, i32, i32) {
    %c0_i32 = arith.constant 0 : i32
    %c0_i32_0 = arith.constant 0 : i32
    %c0_i32_1 = arith.constant 0 : i32
    return %arg0, %arg1, %c0_i32, %c0_i32_0 : i32, i32, i32, i32
  }
  func.func @transform_2(%arg0: i32, %arg1: i32) -> (i32, i32, i32, i32) {
    %c0_i32 = arith.constant 0 : i32
    %c0_i32_0 = arith.constant 0 : i32
    %c0_i32_1 = arith.constant 0 : i32
    return %arg0, %arg1, %c0_i32, %c0_i32_0 : i32, i32, i32, i32
  }
  func.func @transform_3(%arg0: i32, %arg1: i32) -> (i32, i32) {
    %c0_i32 = arith.constant 0 : i32
    %c0_i32_0 = arith.constant 0 : i32
    %c0_i32_1 = arith.constant 0 : i32
    return %c0_i32, %c0_i32_0 : i32, i32
  }
  func.func @transform_4(%arg0: i32, %arg1: i32) -> (i32, i32) {
    %c0_i32 = arith.constant 0 : i32
    %c0_i32_0 = arith.constant 0 : i32
    %c0_i32_1 = arith.constant 0 : i32
    return %c0_i32, %c0_i32_0 : i32, i32
  }
  func.func @transform_5(%arg0: i32, %arg1: i32) -> (i32, i32, i32, i32) {
    %c0_i32 = arith.constant 0 : i32
    %c0_i32_0 = arith.constant 0 : i32
    %c0_i32_1 = arith.constant 0 : i32
    return %arg0, %arg1, %c0_i32, %c0_i32_0 : i32, i32, i32, i32
  }
}

module attributes {stable_mosaic.version = 11 : i64} {
  func.func @_matmul_residual_kernel(%arg0: i32, %arg1: i32, %arg2: memref<32x256xbf16, #tpu.memory_space<vmem>>, %arg3: memref<256x256xbf16, #tpu.memory_space<vmem>>, %arg4: memref<32x256xbf16, #tpu.memory_space<vmem>>, %arg5: memref<32x256xbf16, #tpu.memory_space<vmem>>) attributes {dimension_semantics = [#tpu.dimension_semantics<parallel>, #tpu.dimension_semantics<parallel>], iteration_bounds = array<i64: 1, 1>, scalar_prefetch = 0 : i64, scratch_operands = 0 : i64, tpu.core_type = #tpu.core_type<tc>, window_params = [{transform_indices = @transform_0, window_bounds = array<i64: 32, 256>}, {transform_indices = @transform_1, window_bounds = array<i64: 256, 256>}, {transform_indices = @transform_2, window_bounds = array<i64: 32, 256>}, {transform_indices = @transform_3, window_bounds = array<i64: 32, 256>}]} {
    %c0 = arith.constant 0 : index
    %c0_0 = arith.constant 0 : index
    %0 = vector.load %arg2[%c0, %c0_0] : memref<32x256xbf16, #tpu.memory_space<vmem>>, vector<32x256xbf16>
    %c0_1 = arith.constant 0 : index
    %c0_2 = arith.constant 0 : index
    %1 = vector.load %arg3[%c0_1, %c0_2] : memref<256x256xbf16, #tpu.memory_space<vmem>>, vector<256x256xbf16>
    %cst = arith.constant dense<0.000000e+00> : vector<32x256xf32>
    %2 = tpu.matmul %0, %1, %cst {dimension_numbers = #tpu.dot_dimension_numbers<[1], [0], [0], [1], [0, 0, 1, 1], [], []>} : vector<32x256xbf16>, vector<256x256xbf16>, vector<32x256xf32> -> vector<32x256xf32>
    %c0_3 = arith.constant 0 : index
    %c0_4 = arith.constant 0 : index
    %3 = vector.load %arg4[%c0_3, %c0_4] : memref<32x256xbf16, #tpu.memory_space<vmem>>, vector<32x256xbf16>
    %4 = arith.extf %3 : vector<32x256xbf16> to vector<32x256xf32>
    %5 = arith.addf %2, %4 : vector<32x256xf32>
    %6 = arith.truncf %5 : vector<32x256xf32> to vector<32x256xbf16>
    %c0_5 = arith.constant 0 : index
    %c0_6 = arith.constant 0 : index
    %7 = vector.load %arg5[%c0_5, %c0_6] : memref<32x256xbf16, #tpu.memory_space<vmem>>, vector<32x256xbf16>
    tpu.vector_store %arg5[%c0_5, %c0_6], %6 {strides = array<i32>} : memref<32x256xbf16, #tpu.memory_space<vmem>>, vector<32x256xbf16>,
    return
  }
  func.func @transform_0(%arg0: i32, %arg1: i32) -> (i32, i32) {
    %c0_i32 = arith.constant 0 : i32
    %c0_i32_0 = arith.constant 0 : i32
    return %arg0, %c0_i32 : i32, i32
  }
  func.func @transform_1(%arg0: i32, %arg1: i32) -> (i32, i32) {
    %c0_i32 = arith.constant 0 : i32
    %c0_i32_0 = arith.constant 0 : i32
    return %c0_i32, %arg1 : i32, i32
  }
  func.func @transform_2(%arg0: i32, %arg1: i32) -> (i32, i32) {
    %c0_i32 = arith.constant 0 : i32
    return %arg0, %arg1 : i32, i32
  }
  func.func @transform_3(%arg0: i32, %arg1: i32) -> (i32, i32) {
    %c0_i32 = arith.constant 0 : i32
    return %arg0, %arg1 : i32, i32
  }
}

module attributes {stable_mosaic.version = 11 : i64} {
  func.func @_ffn_kernel(%arg0: i32, %arg1: i32, %arg2: memref<32x256xbf16, #tpu.memory_space<vmem>>, %arg3: memref<1x256xf32, #tpu.memory_space<vmem>>, %arg4: memref<256x384xbf16, #tpu.memory_space<vmem>>, %arg5: memref<256x384xbf16, #tpu.memory_space<vmem>>, %arg6: memref<384x256xbf16, #tpu.memory_space<vmem>>, %arg7: memref<32x256xbf16, #tpu.memory_space<vmem>>, %arg8: memref<32x256xbf16, #tpu.memory_space<vmem>>, %arg9: memref<32x256xf32, #tpu.memory_space<vmem>>) attributes {dimension_semantics = [#tpu.dimension_semantics<parallel>, #tpu.dimension_semantics<arbitrary>], iteration_bounds = array<i64: 1, 2>, scalar_prefetch = 0 : i64, scratch_operands = 2 : i64, tpu.core_type = #tpu.core_type<tc>, window_params = [{transform_indices = @transform_0, window_bounds = array<i64: 32, 256>}, {pipeline_mode = #tpu.pipeline_mode<synchronous>, transform_indices = @transform_1, window_bounds = array<i64: 1, 256>}, {transform_indices = @transform_2, window_bounds = array<i64: 256, 384>}, {transform_indices = @transform_3, window_bounds = array<i64: 256, 384>}, {transform_indices = @transform_4, window_bounds = array<i64: 384, 256>}, {transform_indices = @transform_5, window_bounds = array<i64: 32, 256>}]} {
    %c0_i32 = arith.constant 0 : i32
    %0 = arith.cmpi eq, %arg1, %c0_i32 : i32
    %1 = arith.extui %0 : i1 to i32
    %c0_i32_0 = arith.constant 0 : i32
    %2 = arith.cmpi ne, %1, %c0_i32_0 : i32
    scf.if %2 {
      %c0_16 = arith.constant 0 : index
      %c0_17 = arith.constant 0 : index
      %24 = vector.load %arg2[%c0_16, %c0_17] : memref<32x256xbf16, #tpu.memory_space<vmem>>, vector<32x256xbf16>
      %25 = arith.extf %24 : vector<32x256xbf16> to vector<32x256xf32>
      %26 = arith.mulf %25, %25 : vector<32x256xf32>
      %cst_18 = arith.constant dense<0.000000e+00> : vector<32xf32>
      %27 = vector.multi_reduction <add>, %26, %cst_18 [1] : vector<32x256xf32> to vector<32xf32>
      %28 = vector.shape_cast %27 : vector<32xf32> to vector<32x1xf32>
      %cst_19 = arith.constant 2.560000e+02 : f32
      %29 = vector.broadcast %cst_19 : f32 to vector<32x1xf32>
      %30 = arith.divf %28, %29 : vector<32x1xf32>
      %cst_20 = arith.constant 9.99999974E-6 : f32
      %31 = vector.broadcast %cst_20 : f32 to vector<32x1xf32>
      %32 = arith.addf %30, %31 : vector<32x1xf32>
      %33 = math.rsqrt %32 : vector<32x1xf32>
      %34 = vector.broadcast %33 : vector<32x1xf32> to vector<32x256xf32>
      %35 = arith.mulf %25, %34 : vector<32x256xf32>
      %c0_21 = arith.constant 0 : index
      %c0_22 = arith.constant 0 : index
      %36 = vector.load %arg3[%c0_21, %c0_22] : memref<1x256xf32, #tpu.memory_space<vmem>>, vector<1x256xf32>
      %37 = vector.broadcast %36 : vector<1x256xf32> to vector<32x256xf32>
      %38 = arith.mulf %35, %37 : vector<32x256xf32>
      %39 = arith.truncf %38 : vector<32x256xf32> to vector<32x256xbf16>
      %c0_23 = arith.constant 0 : index
      %c0_24 = arith.constant 0 : index
      %40 = vector.load %arg8[%c0_23, %c0_24] : memref<32x256xbf16, #tpu.memory_space<vmem>>, vector<32x256xbf16>
      tpu.vector_store %arg8[%c0_23, %c0_24], %39 {strides = array<i32>} : memref<32x256xbf16, #tpu.memory_space<vmem>>, vector<32x256xbf16>,
      %cst_25 = arith.constant 0.000000e+00 : f32
      %41 = vector.broadcast %cst_25 : f32 to vector<32x256xf32>
      %c0_26 = arith.constant 0 : index
      %c0_27 = arith.constant 0 : index
      %42 = vector.load %arg9[%c0_26, %c0_27] : memref<32x256xf32, #tpu.memory_space<vmem>>, vector<32x256xf32>
      tpu.vector_store %arg9[%c0_26, %c0_27], %41 {strides = array<i32>} : memref<32x256xf32, #tpu.memory_space<vmem>>, vector<32x256xf32>,
    } else {
    }
    %c0 = arith.constant 0 : index
    %c0_1 = arith.constant 0 : index
    %3 = vector.load %arg8[%c0, %c0_1] : memref<32x256xbf16, #tpu.memory_space<vmem>>, vector<32x256xbf16>
    %c0_2 = arith.constant 0 : index
    %c0_3 = arith.constant 0 : index
    %4 = vector.load %arg4[%c0_2, %c0_3] : memref<256x384xbf16, #tpu.memory_space<vmem>>, vector<256x384xbf16>
    %cst = arith.constant dense<0.000000e+00> : vector<32x384xf32>
    %5 = tpu.matmul %3, %4, %cst {dimension_numbers = #tpu.dot_dimension_numbers<[1], [0], [0], [1], [0, 0, 1, 1], [], []>} : vector<32x256xbf16>, vector<256x384xbf16>, vector<32x384xf32> -> vector<32x384xf32>
    %c0_4 = arith.constant 0 : index
    %c0_5 = arith.constant 0 : index
    %6 = vector.load %arg5[%c0_4, %c0_5] : memref<256x384xbf16, #tpu.memory_space<vmem>>, vector<256x384xbf16>
    %cst_6 = arith.constant dense<0.000000e+00> : vector<32x384xf32>
    %7 = tpu.matmul %3, %6, %cst_6 {dimension_numbers = #tpu.dot_dimension_numbers<[1], [0], [0], [1], [0, 0, 1, 1], [], []>} : vector<32x256xbf16>, vector<256x384xbf16>, vector<32x384xf32> -> vector<32x384xf32>
    %8 = arith.negf %5 : vector<32x384xf32>
    %9 = math.exp %8 : vector<32x384xf32>
    %cst_7 = arith.constant 1.000000e+00 : f32
    %10 = vector.broadcast %cst_7 : f32 to vector<32x384xf32>
    %11 = arith.addf %10, %9 : vector<32x384xf32>
    %12 = arith.divf %10, %11 : vector<32x384xf32>
    %13 = arith.mulf %5, %12 : vector<32x384xf32>
    %14 = arith.mulf %13, %7 : vector<32x384xf32>
    %c0_8 = arith.constant 0 : index
    %c0_9 = arith.constant 0 : index
    %15 = vector.load %arg9[%c0_8, %c0_9] : memref<32x256xf32, #tpu.memory_space<vmem>>, vector<32x256xf32>
    %16 = arith.truncf %14 : vector<32x384xf32> to vector<32x384xbf16>
    %c0_10 = arith.constant 0 : index
    %c0_11 = arith.constant 0 : index
    %17 = vector.load %arg6[%c0_10, %c0_11] : memref<384x256xbf16, #tpu.memory_space<vmem>>, vector<384x256xbf16>
    %cst_12 = arith.constant dense<0.000000e+00> : vector<32x256xf32>
    %18 = tpu.matmul %16, %17, %cst_12 {dimension_numbers = #tpu.dot_dimension_numbers<[1], [0], [0], [1], [0, 0, 1, 1], [], []>} : vector<32x384xbf16>, vector<384x256xbf16>, vector<32x256xf32> -> vector<32x256xf32>
    %19 = arith.addf %15, %18 : vector<32x256xf32>
    %c0_13 = arith.constant 0 : index
    %c0_14 = arith.constant 0 : index
    %20 = vector.load %arg9[%c0_13, %c0_14] : memref<32x256xf32, #tpu.memory_space<vmem>>, vector<32x256xf32>
    tpu.vector_store %arg9[%c0_13, %c0_14], %19 {strides = array<i32>} : memref<32x256xf32, #tpu.memory_space<vmem>>, vector<32x256xf32>,
    %c1_i32 = arith.constant 1 : i32
    %21 = arith.cmpi eq, %arg1, %c1_i32 : i32
    %22 = arith.extui %21 : i1 to i32
    %c0_i32_15 = arith.constant 0 : i32
    %23 = arith.cmpi ne, %22, %c0_i32_15 : i32
    scf.if %23 {
      %c0_16 = arith.constant 0 : index
      %c0_17 = arith.constant 0 : index
      %24 = vector.load %arg9[%c0_16, %c0_17] : memref<32x256xf32, #tpu.memory_space<vmem>>, vector<32x256xf32>
      %c0_18 = arith.constant 0 : index
      %c0_19 = arith.constant 0 : index
      %25 = vector.load %arg2[%c0_18, %c0_19] : memref<32x256xbf16, #tpu.memory_space<vmem>>, vector<32x256xbf16>
      %26 = arith.extf %25 : vector<32x256xbf16> to vector<32x256xf32>
      %27 = arith.addf %24, %26 : vector<32x256xf32>
      %28 = arith.truncf %27 : vector<32x256xf32> to vector<32x256xbf16>
      %c0_20 = arith.constant 0 : index
      %c0_21 = arith.constant 0 : index
      %29 = vector.load %arg7[%c0_20, %c0_21] : memref<32x256xbf16, #tpu.memory_space<vmem>>, vector<32x256xbf16>
      tpu.vector_store %arg7[%c0_20, %c0_21], %28 {strides = array<i32>} : memref<32x256xbf16, #tpu.memory_space<vmem>>, vector<32x256xbf16>,
    } else {
    }
    return
  }
  func.func @transform_0(%arg0: i32, %arg1: i32) -> (i32, i32) {
    %c0_i32 = arith.constant 0 : i32
    %c0_i32_0 = arith.constant 0 : i32
    return %arg0, %c0_i32 : i32, i32
  }
  func.func @transform_1(%arg0: i32, %arg1: i32) -> (i32, i32) {
    %c0_i32 = arith.constant 0 : i32
    %c0_i32_0 = arith.constant 0 : i32
    %c0_i32_1 = arith.constant 0 : i32
    return %c0_i32, %c0_i32_0 : i32, i32
  }
  func.func @transform_2(%arg0: i32, %arg1: i32) -> (i32, i32) {
    %c0_i32 = arith.constant 0 : i32
    %c0_i32_0 = arith.constant 0 : i32
    return %c0_i32, %arg1 : i32, i32
  }
  func.func @transform_3(%arg0: i32, %arg1: i32) -> (i32, i32) {
    %c0_i32 = arith.constant 0 : i32
    %c0_i32_0 = arith.constant 0 : i32
    return %c0_i32, %arg1 : i32, i32
  }
  func.func @transform_4(%arg0: i32, %arg1: i32) -> (i32, i32) {
    %c0_i32 = arith.constant 0 : i32
    %c0_i32_0 = arith.constant 0 : i32
    return %arg1, %c0_i32 : i32, i32
  }
  func.func @transform_5(%arg0: i32, %arg1: i32) -> (i32, i32) {
    %c0_i32 = arith.constant 0 : i32
    %c0_i32_0 = arith.constant 0 : i32
    return %arg0, %c0_i32 : i32, i32
  }
}

module attributes {stable_mosaic.version = 11 : i64} {
  func.func @_rmsnorm_matmul_kernel(%arg0: i32, %arg1: i32, %arg2: memref<32x256xbf16, #tpu.memory_space<vmem>>, %arg3: memref<1x256xf32, #tpu.memory_space<vmem>>, %arg4: memref<256x384xbf16, #tpu.memory_space<vmem>>, %arg5: memref<32x384xbf16, #tpu.memory_space<vmem>>) attributes {dimension_semantics = [#tpu.dimension_semantics<parallel>, #tpu.dimension_semantics<parallel>], iteration_bounds = array<i64: 1, 2>, scalar_prefetch = 0 : i64, scratch_operands = 0 : i64, tpu.core_type = #tpu.core_type<tc>, window_params = [{transform_indices = @transform_0, window_bounds = array<i64: 32, 256>}, {pipeline_mode = #tpu.pipeline_mode<synchronous>, transform_indices = @transform_1, window_bounds = array<i64: 1, 256>}, {transform_indices = @transform_2, window_bounds = array<i64: 256, 384>}, {transform_indices = @transform_3, window_bounds = array<i64: 32, 384>}]} {
    %c0 = arith.constant 0 : index
    %c0_0 = arith.constant 0 : index
    %0 = vector.load %arg2[%c0, %c0_0] : memref<32x256xbf16, #tpu.memory_space<vmem>>, vector<32x256xbf16>
    %1 = arith.extf %0 : vector<32x256xbf16> to vector<32x256xf32>
    %2 = arith.mulf %1, %1 : vector<32x256xf32>
    %cst = arith.constant dense<0.000000e+00> : vector<32xf32>
    %3 = vector.multi_reduction <add>, %2, %cst [1] : vector<32x256xf32> to vector<32xf32>
    %4 = vector.shape_cast %3 : vector<32xf32> to vector<32x1xf32>
    %cst_1 = arith.constant 2.560000e+02 : f32
    %5 = vector.broadcast %cst_1 : f32 to vector<32x1xf32>
    %6 = arith.divf %4, %5 : vector<32x1xf32>
    %cst_2 = arith.constant 9.99999974E-6 : f32
    %7 = vector.broadcast %cst_2 : f32 to vector<32x1xf32>
    %8 = arith.addf %6, %7 : vector<32x1xf32>
    %9 = math.rsqrt %8 : vector<32x1xf32>
    %10 = vector.broadcast %9 : vector<32x1xf32> to vector<32x256xf32>
    %11 = arith.mulf %1, %10 : vector<32x256xf32>
    %c0_3 = arith.constant 0 : index
    %c0_4 = arith.constant 0 : index
    %12 = vector.load %arg3[%c0_3, %c0_4] : memref<1x256xf32, #tpu.memory_space<vmem>>, vector<1x256xf32>
    %13 = vector.broadcast %12 : vector<1x256xf32> to vector<32x256xf32>
    %14 = arith.mulf %11, %13 : vector<32x256xf32>
    %15 = arith.truncf %14 : vector<32x256xf32> to vector<32x256xbf16>
    %c0_5 = arith.constant 0 : index
    %c0_6 = arith.constant 0 : index
    %16 = vector.load %arg4[%c0_5, %c0_6] : memref<256x384xbf16, #tpu.memory_space<vmem>>, vector<256x384xbf16>
    %cst_7 = arith.constant dense<0.000000e+00> : vector<32x384xf32>
    %17 = tpu.matmul %15, %16, %cst_7 {dimension_numbers = #tpu.dot_dimension_numbers<[1], [0], [0], [1], [0, 0, 1, 1], [], []>} : vector<32x256xbf16>, vector<256x384xbf16>, vector<32x384xf32> -> vector<32x384xf32>
    %18 = arith.truncf %17 : vector<32x384xf32> to vector<32x384xbf16>
    %c0_8 = arith.constant 0 : index
    %c0_9 = arith.constant 0 : index
    %19 = vector.load %arg5[%c0_8, %c0_9] : memref<32x384xbf16, #tpu.memory_space<vmem>>, vector<32x384xbf16>
    tpu.vector_store %arg5[%c0_8, %c0_9], %18 {strides = array<i32>} : memref<32x384xbf16, #tpu.memory_space<vmem>>, vector<32x384xbf16>,
    return
  }
  func.func @transform_0(%arg0: i32, %arg1: i32) -> (i32, i32) {
    %c0_i32 = arith.constant 0 : i32
    %c0_i32_0 = arith.constant 0 : i32
    return %arg0, %c0_i32 : i32, i32
  }
  func.func @transform_1(%arg0: i32, %arg1: i32) -> (i32, i32) {
    %c0_i32 = arith.constant 0 : i32
    %c0_i32_0 = arith.constant 0 : i32
    %c0_i32_1 = arith.constant 0 : i32
    return %c0_i32, %c0_i32_0 : i32, i32
  }
  func.func @transform_2(%arg0: i32, %arg1: i32) -> (i32, i32) {
    %c0_i32 = arith.constant 0 : i32
    %c0_i32_0 = arith.constant 0 : i32
    return %c0_i32, %arg1 : i32, i32
  }
  func.func @transform_3(%arg0: i32, %arg1: i32) -> (i32, i32) {
    %c0_i32 = arith.constant 0 : i32
    return %arg0, %arg1 : i32, i32
  }
}

module attributes {stable_mosaic.version = 11 : i64} {
  func.func @_rmsnorm_matmul_kernel(%arg0: i32, %arg1: i32, %arg2: memref<32x256xbf16, #tpu.memory_space<vmem>>, %arg3: memref<1x256xf32, #tpu.memory_space<vmem>>, %arg4: memref<256x512xbf16, #tpu.memory_space<vmem>>, %arg5: memref<32x512xbf16, #tpu.memory_space<vmem>>) attributes {dimension_semantics = [#tpu.dimension_semantics<parallel>, #tpu.dimension_semantics<parallel>], iteration_bounds = array<i64: 1, 1>, scalar_prefetch = 0 : i64, scratch_operands = 0 : i64, tpu.core_type = #tpu.core_type<tc>, window_params = [{transform_indices = @transform_0, window_bounds = array<i64: 32, 256>}, {pipeline_mode = #tpu.pipeline_mode<synchronous>, transform_indices = @transform_1, window_bounds = array<i64: 1, 256>}, {transform_indices = @transform_2, window_bounds = array<i64: 256, 512>}, {transform_indices = @transform_3, window_bounds = array<i64: 32, 512>}]} {
    %c0 = arith.constant 0 : index
    %c0_0 = arith.constant 0 : index
    %0 = vector.load %arg2[%c0, %c0_0] : memref<32x256xbf16, #tpu.memory_space<vmem>>, vector<32x256xbf16>
    %1 = arith.extf %0 : vector<32x256xbf16> to vector<32x256xf32>
    %2 = arith.mulf %1, %1 : vector<32x256xf32>
    %cst = arith.constant dense<0.000000e+00> : vector<32xf32>
    %3 = vector.multi_reduction <add>, %2, %cst [1] : vector<32x256xf32> to vector<32xf32>
    %4 = vector.shape_cast %3 : vector<32xf32> to vector<32x1xf32>
    %cst_1 = arith.constant 2.560000e+02 : f32
    %5 = vector.broadcast %cst_1 : f32 to vector<32x1xf32>
    %6 = arith.divf %4, %5 : vector<32x1xf32>
    %cst_2 = arith.constant 9.99999974E-6 : f32
    %7 = vector.broadcast %cst_2 : f32 to vector<32x1xf32>
    %8 = arith.addf %6, %7 : vector<32x1xf32>
    %9 = math.rsqrt %8 : vector<32x1xf32>
    %10 = vector.broadcast %9 : vector<32x1xf32> to vector<32x256xf32>
    %11 = arith.mulf %1, %10 : vector<32x256xf32>
    %c0_3 = arith.constant 0 : index
    %c0_4 = arith.constant 0 : index
    %12 = vector.load %arg3[%c0_3, %c0_4] : memref<1x256xf32, #tpu.memory_space<vmem>>, vector<1x256xf32>
    %13 = vector.broadcast %12 : vector<1x256xf32> to vector<32x256xf32>
    %14 = arith.mulf %11, %13 : vector<32x256xf32>
    %15 = arith.truncf %14 : vector<32x256xf32> to vector<32x256xbf16>
    %c0_5 = arith.constant 0 : index
    %c0_6 = arith.constant 0 : index
    %16 = vector.load %arg4[%c0_5, %c0_6] : memref<256x512xbf16, #tpu.memory_space<vmem>>, vector<256x512xbf16>
    %cst_7 = arith.constant dense<0.000000e+00> : vector<32x512xf32>
    %17 = tpu.matmul %15, %16, %cst_7 {dimension_numbers = #tpu.dot_dimension_numbers<[1], [0], [0], [1], [0, 0, 1, 1], [], []>} : vector<32x256xbf16>, vector<256x512xbf16>, vector<32x512xf32> -> vector<32x512xf32>
    %18 = arith.truncf %17 : vector<32x512xf32> to vector<32x512xbf16>
    %c0_8 = arith.constant 0 : index
    %c0_9 = arith.constant 0 : index
    %19 = vector.load %arg5[%c0_8, %c0_9] : memref<32x512xbf16, #tpu.memory_space<vmem>>, vector<32x512xbf16>
    tpu.vector_store %arg5[%c0_8, %c0_9], %18 {strides = array<i32>} : memref<32x512xbf16, #tpu.memory_space<vmem>>, vector<32x512xbf16>,
    return
  }
  func.func @transform_0(%arg0: i32, %arg1: i32) -> (i32, i32) {
    %c0_i32 = arith.constant 0 : i32
    %c0_i32_0 = arith.constant 0 : i32
    return %arg0, %c0_i32 : i32, i32
  }
  func.func @transform_1(%arg0: i32, %arg1: i32) -> (i32, i32) {
    %c0_i32 = arith.constant 0 : i32
    %c0_i32_0 = arith.constant 0 : i32
    %c0_i32_1 = arith.constant 0 : i32
    return %c0_i32, %c0_i32_0 : i32, i32
  }
  func.func @transform_2(%arg0: i32, %arg1: i32) -> (i32, i32) {
    %c0_i32 = arith.constant 0 : i32
    %c0_i32_0 = arith.constant 0 : i32
    return %c0_i32, %arg1 : i32, i32
  }
  func.func @transform_3(%arg0: i32, %arg1: i32) -> (i32, i32) {
    %c0_i32 = arith.constant 0 : i32
    return %arg0, %arg1 : i32, i32
  }
}

</mosaic_0001>

<bundles_post_ra>
// kernel: llama2_forward.9
= control target key start
LH: loop header
LB: loop body
LE: loop exit
PB: predicated region body
PF: predicated region fallthrough
CT: control target
= control target key end

     0   :  { %8 = vsyncpa [#allocation3], 0  ;;  %s1501_s0 = inlined_call_operand.vmem [shape: bf16[32,256], index: 0, kind: input, shape index: {}]   ;;  %s1502_s1 = inlined_call_operand.vmem [shape: f32[1,256], index: 1, kind: input, shape index: {}]   ;;  %s1503_s2 = inlined_call_operand.hbm [shape: bf16[256,768], index: 2, kind: input, shape index: {}]   ;;  %s1504_s3 = inlined_call_operand.vmem [shape: bf16[32,768], index: 3, kind: output, shape index: {}]  }
   0x1   :  { %10 = vsyncpa [#allocation3 + $0x1], 0  ;;  %s1270_s12 = smov 0   ;;  %s1272_s13 = smov 0  }
   0x2   :  { %s1274_s14 = smov 0   ;;  %s1276_s15 = smov 0  }
   0x3   :  { %s1278_s16 = smov 0   ;;  %s1280_s17 = smov 0  }
   0x4 LB: > { %s921_s18 = sadd.s32 4294967295, %s1244_s17   ;;  %s25_s19 = sadd.s32 1, %s1240_s16  ;;  %s1244_s17 = sphi %s1280_s17, %s16_s17   ;;  %s1240_s16 = sphi %s1278_s16, %s1513_s16   ;;  %s1236_s15 = sphi %s1276_s15, %s1512_s15   ;;  %s1232_s14 = sphi %s1274_s14, %s1511_s14   ;;  %s1228_s13 = sphi %s1272_s13, %s1510_s13   ;;  %s1224_s12 = sphi %s1270_s12, %s1509_s12  }
   0x5   : > { %p26_p0 = scmp.ge.s32.totalorder %s25_s19, 2  ;;  %s82_s20 = sadd.s32 1, %s1232_s14 }
   0x6   : > { %p89_p1 = scmp.ne.s32.totalorder %s1232_s14, %s1228_s13  ;;  %p90_p2 = scmp.eq.s32.totalorder %s1244_s17, 0 }
   0x7   : > { %s1515_s19 = smov (%p26_p0, %s25_s19), 0  ;;  %p95_p4 = scmp.ne.s32.totalorder %s1228_s13, %s1224_s12 }
   0x8   : > { %p1306_p3 = por %p90_p2, %p89_p1  ;;  %s79_s22 = ssub.s32 %s1240_s16, %s1515_s19 }
   0x9   : > { %p96_p5 = scmp.eq.s32.totalorder %s921_s18, 0  ;;  %p80_p6 = scmp.eq.s32.totalorder %s79_s22, 0 }
   0xa   : > { %p121_p7 = scmp.eq.s32.totalorder %s921_s18, 1  ;;  %p1042_p10 = scmp.lt.s32.totalorder %s1244_s17, 2 }
   0xb   : > { %p1313_p8 = por %p96_p5, %p95_p4  ;;  %s160_s26 = sand.u32 1, %s1232_s14  }
   0xc   : > { %s1318_s24 = scalar_select %p80_p6, %s1232_s14, %s82_s20  }
   0xd   : > { %p1320_p9 = por %p121_p7, %p89_p1  ;;  %s995_s27 = smul.u32 192, %s1240_s16 }
   0xe   : > { %s1033_s28 = smul.u32 384, %s160_s26  ;;  %p1332_p11 = pnand %p1042_p10, %p1306_p3 }
   0xf   : > { %s170_s4 = scalar_lea.hbm %s1503_s2, %s995_s27  ;;  %p927_p12 = scmp.ge.s32.totalorder %s1244_s17, 1 }
  0x10   : > { %s164_s6 = scalar_lea.vmem [#allocation2], %s1033_s28  ;;  %s161_s8 = scalar_lea.sflag [#allocation3], %s160_s26 }
  0x11   : > { %s171_s7 = sshll.u32 %s164_s6, 4  ;;  %p1168_p13 = pneg %p1332_p11  ;;  %s172_s7 = int_to_ptr.vmem [resolvable:$true] %s171_s7 }
  0x12   : > { %s1179_s9 = scalar_lea.vmem %s172_s7, 6144  ;;  %s1246_s10 = smov [#allocation2]  }
  0x13   : > { %p1180_p0 = scmp.ne.s32.totalorder %s172_s7, %s1179_s9  ;;  %s1184_s11 = sshll.u32 %s1246_s10, 4  ;;  %s1185_s11 = int_to_ptr.vmem [resolvable:$false] %s1184_s11 }
  0x14   : > { %s1186_s12 = scalar_lea.vmem %s1185_s11, 12288  ;;  %p1187_p3 = scmp.lt.s32.totalorder %s172_s7, %s1185_s11 }
  0x15   : > { %p1182_p1 = pnand %p1180_p0, %p1168_p13  ;;  %p1188_p4 = scmp.lt.s32.totalorder %s1186_s12, %s1179_s9 }
  0x17   : > { %p1183_p2 = pneg %p1182_p1  ;;  %p1189_p5 = por %p1188_p4, %p1187_p3 }
  0x19   : > { %p1190_p6 = pnand %p1189_p5, %p1183_p2 }
  0x1b   : > { %1193 = shalt.err (!%p1190_p6)
}
  0x1c   : > { %s1247_s18 = smov 384   ;;  %s1248_s20 = smov 192  }
  0x1d   : > { %s1249_s21 = smov 12   ;;  %p179_p7 = scmp.lt.s32.totalorder %s1244_s17, 3 }
  0x1e   : > { %1041 = dma.hbm_to_vmem [thread:$0]  (!%p1332_p11), %s170_s4, 6144, %s172_s7, %s161_s8, %s1247_s18, %s1248_s20, %s1249_s21  }
  0x1f   : > { %p180_p10 = pnand %p927_p12, %p179_p7 }
  0x20   : > { %s1345_s22 = sand.u32 (!%p180_p10), 1, %s1228_s13  }
  0x21   : > { %183 = sbr.rel (%p180_p10) target bundleno = 433 (0x1b1), region = 32  ;;  %s186_s27 = scalar_lea.sflag (!%p180_p10), [#allocation3], %s1345_s22 }
  0x22   : > { %s1034_s26 = smul.u32 (!%p180_p10), 384, %s1345_s22 }
  0x24   : > { %s1349_s28 = scalar_lea.vmem (!%p180_p10), [#allocation2], %s1034_s26 }
  0x26   : > { %1219 = dma.done.wait (%p1313_p8), %s186_s27, 6144  }
  0x27   : > { %1221 = vsyncadd (%p1313_p8), %s186_s27, 4294961152  ;;  %v228_v0 = vld [vmem:[%s1501_s0] sm:$0xff]  ;;  %v230_v1 = vld [vmem:[%s1501_s0 + $0x10] sm:$0xff]  ;;  %s1035_s11 = smul.u32 48, %s1345_s22 }
  0x28   : > { %v229_v2 = vld [vmem:[%s1501_s0 + $0x8] sm:$0xff]  ;;  %v1364_v3 = vunpack.c.l.bf16 %v228_v0  ;;  %v1366_v4 = vunpack.c.h.bf16 %v228_v0  ;;  %v1368_v5 = vunpack.c.l.bf16 %v230_v1  ;;  %v1370_v6 = vunpack.c.h.bf16 %v230_v1  ;;  %v231_v7 = vld [vmem:[%s1501_s0 + $0x18] sm:$0xff]  ;;  %v1097_v18 = vld [vmem:[%s1349_s28 + $0x94] ss:$12 sps:$4 sm:$0xff]   ;;  %s1004_s18 = smul.u32 (%p1320_p9), 12, %s1236_s15 }
  0x29   : > { %v1375_v8 = vunpack.c.l.bf16 %v229_v2  ;;  %v1377_v9 = vunpack.c.h.bf16 %v229_v2  ;;  %v1379_v10 = vunpack.c.l.bf16 %v231_v7  ;;  %v1381_v11 = vunpack.c.h.bf16 %v231_v7  ;;  %v1094_v12 = vld [vmem:[%s1349_s28 + $0xac] ss:$12 sps:$4 sm:$0xff]   ;;  %v1096_v13 = vld [vmem:[%s1349_s28 + $0xa8] ss:$12 sps:$4 sm:$0xff]   ;;  %v1099_v25 = vld [vmem:[%s1349_s28 + $0x90] ss:$12 sps:$4 sm:$0xff]  }
  0x2a   : > { %v240_v14 = vmul.f32 %v1364_v3, %v1364_v3  ;;  %v241_v15 = vmul.f32 %v1366_v4, %v1366_v4  ;;  %v244_v16 = vmul.f32 %v1368_v5, %v1368_v5  ;;  %v245_v17 = vmul.f32 %v1370_v6, %v1370_v6  ;;  %625 = vmatprep.subr.bf16.mxu0 %v1094_v12  ;;  %v1100_v26 = vld [vmem:[%s1349_s28 + $0x7c] ss:$12 sps:$4 sm:$0xff]   ;;  %v1102_v29 = vld [vmem:[%s1349_s28 + $0x78] ss:$12 sps:$4 sm:$0xff]   ;;  %v1105_v31 = vld [vmem:[%s1349_s28 + $0x60] ss:$12 sps:$4 sm:$0xff]   ;;  %s787_s25 = scalar_lea.vmem (%p1320_p9), %s1504_s3, %s1004_s18 }
  0x2b   : > { %v242_v19 = vmul.f32 %v1375_v8, %v1375_v8  ;;  %v243_v20 = vmul.f32 %v1377_v9, %v1377_v9  ;;  %v246_v21 = vmul.f32 %v1379_v10, %v1379_v10  ;;  %v247_v22 = vmul.f32 %v1381_v11, %v1381_v11  ;;  %626 = vmatpush1.bf16.msra.mxu0 %v1096_v13  ;;  %v1103_v30 = vld [vmem:[%s1349_s28 + $0x64] ss:$12 sps:$4 sm:$0xff]   ;;  %v1106_v33 = vld [vmem:[%s1349_s28 + $0x4c] ss:$12 sps:$4 sm:$0xff]   ;;  %v1108_v35 = vld [vmem:[%s1349_s28 + $0x48] ss:$12 sps:$4 sm:$0xff]  }
  0x2c   : > { %v248_v23 = vadd.f32 %v241_v15, %v240_v14  ;;  %v254_v24 = vadd.f32 %v245_v17, %v244_v16  ;;  %627 = vmatprep.subr.bf16.mxu0 %v1097_v18  ;;  %v1120_v32 = vld [vmem:[%s1349_s28 + $0x170] ss:$12 sps:$4 sm:$0xff]   ;;  %v1109_v36 = vld [vmem:[%s1349_s28 + $0x34] ss:$12 sps:$4 sm:$0xff]   ;;  %v1125_v37 = vld [vmem:[%s1349_s28 + $0x158] ss:$12 sps:$4 sm:$0xff]  }
  0x2d   : > { %v251_v27 = vadd.f32 %v243_v20, %v242_v19  ;;  %v257_v28 = vadd.f32 %v247_v22, %v246_v21  ;;  %1005 = vmatprep.subr.bf16.mxu1 %v1120_v32  ;;  %v1122_v34 = vld [vmem:[%s1349_s28 + $0xb0] ss:$12 sps:$4 sm:$0xff]   ;;  %v1127_v38 = vld [vmem:[%s1349_s28 + $0x98] ss:$12 sps:$4 sm:$0xff]   ;;  %v1130_v40 = vld [vmem:[%s1349_s28 + $0x140] ss:$12 sps:$4 sm:$0xff]  }
  0x2e   : > { %249 = vadd.xlane.f32.xlu0 %v248_v23  ;;  %255 = vadd.xlane.f32.xlu1 %v254_v24  ;;  %v1111_v39 = vld [vmem:[%s1349_s28 + $0x30] ss:$12 sps:$4 sm:$0xff]   ;;  %v1132_v42 = vld [vmem:[%s1349_s28 + $0x80] ss:$12 sps:$4 sm:$0xff]   ;;  %v1135_v43 = vld [vmem:[%s1349_s28 + $0x128] ss:$12 sps:$4 sm:$0xff]  }
  0x2f   : > { %628 = vmatpush1.bf16.msra.mxu0 %v1099_v25  ;;  %1006 = vmatpush3.bf16.msra.mxu1 %v1122_v34  ;;  %v1112_v41 = vld [vmem:[%s1349_s28 + $0x1c] ss:$12 sps:$4 sm:$0xff]   ;;  %v1114_v44 = vld [vmem:[%s1349_s28 + $0x18] ss:$12 sps:$4 sm:$0xff]   ;;  %v1117_v48 = vld [vmem:[%s1349_s28] ss:$12 sps:$4 sm:$0xff]  }
  0x30   : > { %629 = vmatprep.subr.bf16.mxu0 %v1100_v26  ;;  %1007 = vmatprep.subr.bf16.mxu1 %v1125_v37  ;;  %v1137_v45 = vld [vmem:[%s1349_s28 + $0x68] ss:$12 sps:$4 sm:$0xff]   ;;  %v1115_v46 = vld [vmem:[%s1349_s28 + $0x4] ss:$12 sps:$4 sm:$0xff]   ;;  %v1118_v50 = vld [vmem:[%s1349_s28 + $0x16c] ss:$12 sps:$4 sm:$0xff]  }
  0x31   : > { %v1140_v47 = vld [vmem:[%s1349_s28 + $0x110] ss:$12 sps:$4 sm:$0xff]   ;;  %v1145_v51 = vld [vmem:[%s1349_s28 + $0xf8] ss:$12 sps:$4 sm:$0xff]   ;;  %v1121_v52 = vld [vmem:[%s1349_s28 + $0x168] ss:$12 sps:$4 sm:$0xff]  }
  0x32   : > { %252 = vadd.xlane.f32.xlu0 %v251_v27  ;;  %258 = vadd.xlane.f32.xlu1 %v257_v28  ;;  %v1142_v49 = vld [vmem:[%s1349_s28 + $0x50] ss:$12 sps:$4 sm:$0xff]   ;;  %v1123_v53 = vld [vmem:[%s1349_s28 + $0x154] ss:$12 sps:$4 sm:$0xff]   ;;  %v1147_v54 = vld [vmem:[%s1349_s28 + $0x38] ss:$12 sps:$4 sm:$0xff]   ;;  %v283_v28 = vlaneseq }
  0x33   : > { %630 = vmatpush1.bf16.msra.mxu0 %v1102_v29  ;;  %1008 = vmatpush3.bf16.msra.mxu1 %v1127_v38  ;;  %v1150_v55 = vld [vmem:[%s1349_s28 + $0xe0] ss:$12 sps:$4 sm:$0xff]   ;;  %v1126_v56 = vld [vmem:[%s1349_s28 + $0x150] ss:$12 sps:$4 sm:$0xff]   ;;  %v1155_v59 = vld [vmem:[%s1349_s28 + $0xc8] ss:$12 sps:$4 sm:$0xff]  }
  0x34   : > { %631 = vmatprep.subr.bf16.mxu0 %v1103_v30  ;;  %1009 = vmatprep.subr.bf16.mxu1 %v1130_v40  ;;  %v1152_v57 = vld [vmem:[%s1349_s28 + $0x20] ss:$12 sps:$4 sm:$0xff]   ;;  %v1128_v58 = vld [vmem:[%s1349_s28 + $0x13c] ss:$12 sps:$4 sm:$0xff]   ;;  %v1131_v60 = vld [vmem:[%s1349_s28 + $0x138] ss:$12 sps:$4 sm:$0xff]  }
  0x35   : > { %v1157_v61 = vld [vmem:[%s1349_s28 + $0x8] ss:$12 sps:$4 sm:$0xff]   ;;  %v1133_v62 = vld [vmem:[%s1349_s28 + $0x124] ss:$12 sps:$4 sm:$0xff]   ;;  %v1136_v63 = vld [vmem:[%s1349_s28 + $0x120] ss:$12 sps:$4 sm:$0xff]  }
  0x36   : > { %v1138_v0 = vld [vmem:[%s1349_s28 + $0x10c] ss:$12 sps:$4 sm:$0xff]   ;;  %v1141_v1 = vld [vmem:[%s1349_s28 + $0x108] ss:$12 sps:$4 sm:$0xff]   ;;  %v1146_v7 = vld [vmem:[%s1349_s28 + $0xf0] ss:$12 sps:$4 sm:$0xff]  }
  0x37   : > { %632 = vmatpush1.bf16.msra.mxu0 %v1105_v31  ;;  %1010 = vmatpush3.bf16.msra.mxu1 %v1132_v42  ;;  %v1143_v2 = vld [vmem:[%s1349_s28 + $0xf4] ss:$12 sps:$4 sm:$0xff]   ;;  %v1148_v12 = vld [vmem:[%s1349_s28 + $0xdc] ss:$12 sps:$4 sm:$0xff]   ;;  %v1151_v13 = vld [vmem:[%s1349_s28 + $0xd8] ss:$12 sps:$4 sm:$0xff]  }
  0x38   : > { %633 = vmatprep.subr.bf16.mxu0 %v1106_v33  ;;  %1011 = vmatprep.subr.bf16.mxu1 %v1135_v43  ;;  %v1153_v14 = vld [vmem:[%s1349_s28 + $0xc4] ss:$12 sps:$4 sm:$0xff]   ;;  %v1156_v15 = vld [vmem:[%s1349_s28 + $0xc0] ss:$12 sps:$4 sm:$0xff]   ;;  %v284_v29 = vshrl.u32 %v283_v28, 7  ;;  %s1459_s12 = scalar_lea.vmem [#allocation4], %s1035_s11 }
  0x39   : > { %v281_v33 = vld [vmem:[%s1502_s1] sm:$0x3] }
  0x3a   : > { %v285_v30 = vsub.s32 0, %v284_v29  ;;  %v289_v31 = vsub.s32 1, %v284_v29 }
  0x3b   : > { %634 = vmatpush1.bf16.msra.mxu0 %v1108_v35  ;;  %1012 = vmatpush3.bf16.msra.mxu1 %v1137_v45 }
  0x3c   : > { %635 = vmatprep.subr.bf16.mxu0 %v1109_v36  ;;  %1013 = vmatprep.subr.bf16.mxu1 %v1140_v47  ;;  %v286_v37 = vrot.slane %v281_v33, %v285_v30  ;;  %v290_v38 = vrot.slane %v281_v33, %v289_v31 }
  0x3f   : > { %636 = vmatpush1.bf16.msra.mxu0 %v1111_v39  ;;  %1014 = vmatpush3.bf16.msra.mxu1 %v1142_v49 }
  0x40   : > { %637 = vmatprep.subr.bf16.mxu0 %v1112_v41  ;;  %1015 = vmatprep.subr.bf16.mxu1 %v1145_v51 }
  0x43   : > { %638 = vmatpush1.bf16.msra.mxu0 %v1114_v44  ;;  %1016 = vmatpush3.bf16.msra.mxu1 %v1147_v54 }
  0x44   : > { %639 = vmatprep.subr.bf16.mxu0 %v1115_v46  ;;  %1017 = vmatprep.subr.bf16.mxu1 %v1150_v55 }
  0x47   : > { %640 = vmatpush1.bf16.msra.mxu0 %v1117_v48  ;;  %1018 = vmatpush3.bf16.msra.mxu1 %v1152_v57 }
  0x48   : > { %641 = vmatprep.subr.bf16.mxu0 %v1118_v50  ;;  %1019 = vmatprep.subr.bf16.mxu1 %v1155_v59 }
  0x4b   : > { %642 = vmatpush2.bf16.msra.mxu0 %v1121_v52  ;;  %1020 = vmatpush3.bf16.msra.mxu1 %v1157_v61 }
  0x4c   : > { %643 = vmatprep.subr.bf16.mxu0 %v1123_v53 }
  0x4f   : > { %644 = vmatpush2.bf16.msra.mxu0 %v1126_v56 }
  0x50   : > { %645 = vmatprep.subr.bf16.mxu0 %v1128_v58 }
  0x53   : > { %646 = vmatpush2.bf16.msra.mxu0 %v1131_v60 }
  0x54   : > { %647 = vmatprep.subr.bf16.mxu0 %v1133_v62 }
  0x57   : > { %648 = vmatpush2.bf16.msra.mxu0 %v1136_v63 }
  0x58   : > { %649 = vmatprep.subr.bf16.mxu0 %v1138_v0 }
  0x5b   : > { %650 = vmatpush2.bf16.msra.mxu0 %v1141_v1 }
  0x5c   : > { %651 = vmatprep.subr.bf16.mxu0 %v1143_v2 }
  0x5f   : > { %652 = vmatpush2.bf16.msra.mxu0 %v1146_v7 }
  0x60   : > { %653 = vmatprep.subr.bf16.mxu0 %v1148_v12 }
  0x63   : > { %654 = vmatpush2.bf16.msra.mxu0 %v1151_v13 }
  0x64   : > { %655 = vmatprep.subr.bf16.mxu0 %v1153_v14 }
  0x67   : > { %656 = vmatpush2.bf16.msra.mxu0 %v1156_v15 }
  0xb7   : > { %v250_v16 = vpop.xlane.xlu0 %249  ;;  %v256_v17 = vpop.xlane.xlu1 %255 }
  0xb8   : > { %v261_v18 = vmul.f32 0.00390625, %v250_v16  ;;  %v263_v19 = vmul.f32 0.00390625, %v256_v17 }
  0xba   : > { %v265_v20 = vadd.f32 1e-05, %v261_v18  ;;  %v267_v21 = vadd.f32 1e-05, %v263_v19 }
  0xbb   : > { %v253_v22 = vpop.xlane.xlu0 %252  ;;  %v259_v23 = vpop.xlane.xlu1 %258 }
  0xbc   : > { %1158 = vrsqrt.f32 %v265_v20  ;;  %v262_v24 = vmul.f32 0.00390625, %v253_v22  ;;  %v264_v25 = vmul.f32 0.00390625, %v259_v23 }
  0xbd   : > { %1160 = vrsqrt.f32 %v267_v21 }
  0xbe   : > { %v266_v26 = vadd.f32 1e-05, %v262_v24  ;;  %v268_v27 = vadd.f32 1e-05, %v264_v25 }
  0xc0   : > { %1162 = vrsqrt.f32 %v266_v26 }
  0xc1   : > { %1164 = vrsqrt.f32 %v268_v27 }
  0xc9   : > { %v1159_v32 = vpop.eup %1158 }
  0xca   : > { %v1161_v34 = vpop.eup %1160  ;;  %v274_v36 = vmul.f32 %v1159_v32, %v1366_v4  ;;  %v273_v39 = vmul.f32 %v1159_v32, %v1364_v3 }
  0xcb   : > { %v278_v35 = vmul.f32 %v1161_v34, %v1370_v6  ;;  %v277_v3 = vmul.f32 %v1161_v34, %v1368_v5 }
  0xcc   : > { %v294_v46 = vmul.f32 %v290_v38, %v274_v36  ;;  %v293_v48 = vmul.f32 %v286_v37, %v273_v39 }
  0xcd   : > { %v1163_v40 = vpop.eup %1162  ;;  %v298_v45 = vmul.f32 %v290_v38, %v278_v35 }
  0xce   : > { %v1165_v41 = vpop.eup %1164  ;;  %v276_v42 = vmul.f32 %v1163_v40, %v1377_v9  ;;  %v275_v43 = vmul.f32 %v1163_v40, %v1375_v8  ;;  %v297_v8 = vmul.f32 %v286_v37, %v277_v3 }
  0xcf   : > { %v280_v44 = vmul.f32 %v1165_v41, %v1381_v11  ;;  %v279_v52 = vmul.f32 %v1165_v41, %v1379_v10 }
  0xd0   : > { %v296_v47 = vmul.f32 %v290_v38, %v276_v42  ;;  %v295_v49 = vmul.f32 %v286_v37, %v275_v43 }
  0xd1   : > { %v300_v6 = vmul.f32 %v290_v38, %v280_v44  ;;  %v299_v9 = vmul.f32 %v286_v37, %v279_v52 }
  0xd2   : > { %v302_v50 = vpack.c.bf16 %v296_v47, %v294_v46  ;;  %v301_v4 = vpack.c.bf16 %v295_v49, %v293_v48 }
  0xd3   : > { %v304_v51 = vpack.c.bf16 %v300_v6, %v298_v45  ;;  %v303_v11 = vpack.c.bf16 %v299_v9, %v297_v8 }
  0xd4   : > { %657 = vmatprep.mubr.bf16.mxu0 %v302_v50  ;;  %710 = vmatprep.mubr.bf16.mxu1 %v302_v50 }
  0xd5   : > { %658 = vmatmul.mubr.bf16.vlgmr.msra.gmra.mxu0 %v301_v4  ;;  %711 = vmatmul.mubr.bf16.vlgmr.msra.gmra.mxu1 %v301_v4 }
  0xd6   : > { %667 = vmatprep.mubr.bf16.mxu0 %v304_v51  ;;  %718 = vmatprep.mubr.bf16.mxu1 %v304_v51 }
  0xdd   : > { %668 = vmatmul.mubr.bf16.gmra.mxu0 %v303_v11  ;;  %719 = vmatmul.mubr.bf16.gmra.mxu1 %v303_v11 }
 0x195   : > { %v659_v53 = vpop.f32.mrf.mxu0  ;;  %v1021_v54 = vpop.f32.mrf.mxu1 }
 0x197   : > { %v661_v55 = vpop.f32.mrf.mxu0  ;;  %v1022_v56 = vpop.f32.mrf.mxu1 }
 0x198   : > { %v996_v57 = vpack.c.bf16 %v661_v55, %v659_v53  ;;  %v1023_v5 = vadd.f32 %v1022_v56, %v1021_v54 }
 0x199   : > { %v663_v58 = vpop.f32.mrf.mxu0  ;;  %v1024_v10 = vpop.f32.mrf.mxu1 }
 0x19a   : > { %767 = vst [vmem:[%s1459_s12] sm:$0xff] %v996_v57  ;;  %v997_v59 = vpack.c.bf16 %v1023_v5, %v1023_v5 }
 0x19b   : > { %v665_v60 = vpop.f32.mrf.mxu0  ;;  %v1025_v61 = vpop.f32.mrf.mxu1 }
 0x19c   : > { %768 = vst [vmem:[%s1459_s12 + $0x8] sm:$0xf] %v997_v59  ;;  %v998_v62 = vpack.c.bf16 %v665_v60, %v663_v58  ;;  %v1026_v63 = vadd.f32 %v1025_v61, %v1024_v10 }
 0x19d   : > { %v669_v0 = vpop.f32.mrf.mxu0  ;;  %v1027_v1 = vpop.f32.mrf.mxu1 }
 0x19e   : > { %769 = vst [vmem:[%s1459_s12 + $0xc] sm:$0xff] %v998_v62  ;;  %v999_v2 = vpack.c.bf16 %v1026_v63, %v1026_v63 }
 0x19f   : > { %v671_v7 = vpop.f32.mrf.mxu0  ;;  %v1028_v12 = vpop.f32.mrf.mxu1 }
 0x1a0   : > { %770 = vst [vmem:[%s1459_s12 + $0x14] sm:$0xf] %v999_v2  ;;  %v1000_v13 = vpack.c.bf16 %v671_v7, %v669_v0  ;;  %v1029_v14 = vadd.f32 %v1028_v12, %v1027_v1 }
 0x1a1   : > { %v673_v15 = vpop.f32.mrf.mxu0  ;;  %v1030_v16 = vpop.f32.mrf.mxu1  ;;  %v802_v23 = vld [vmem:[%s1459_s12] sm:$0xff] (%p1320_p9) }
 0x1a2   : > { %771 = vst [vmem:[%s1459_s12 + $0x18] sm:$0xff] %v1000_v13  ;;  %v1001_v17 = vpack.c.bf16 %v1029_v14, %v1029_v14  ;;  %803 = vst [vmem:[%s787_s25] sm:$0xff] (%p1320_p9), %v802_v23 }
 0x1a3   : > { %v675_v18 = vpop.f32.mrf.mxu0  ;;  %v1031_v19 = vpop.f32.mrf.mxu1  ;;  %v985_v27 = vld [vmem:[%s1459_s12 + $0x8] sm:$0xf] (%p1320_p9) }
 0x1a4   : > { %772 = vst [vmem:[%s1459_s12 + $0x20] sm:$0xf] %v1001_v17  ;;  %v1002_v20 = vpack.c.bf16 %v675_v18, %v673_v15  ;;  %v1032_v21 = vadd.f32 %v1031_v19, %v1030_v16  ;;  %781 = sbr.rel (!%p1320_p9) target bundleno = 433 (0x1b1), region = 40  ;;  %986 = vst [vmem:[%s787_s25 + $0x8] sm:$0xf] (%p1320_p9), %v985_v27 }
 0x1a5   : > { %v804_v24 = vld [vmem:[%s1459_s12 + $0xc] sm:$0xff] (%p1320_p9) }
 0x1a6   : > { %773 = vst [vmem:[%s1459_s12 + $0x24] sm:$0xff] %v1002_v20  ;;  %v1003_v22 = vpack.c.bf16 %v1032_v21, %v1032_v21  ;;  %805 = vst [vmem:[%s787_s25 + $0x18] sm:$0xff] (%p1320_p9), %v804_v24 }
 0x1a7   : > { %v987_v28 = vld [vmem:[%s1459_s12 + $0x14] sm:$0xf] (%p1320_p9) }
 0x1a8   : > { %774 = vst [vmem:[%s1459_s12 + $0x2c] sm:$0xf] %v1003_v22  ;;  %988 = vst [vmem:[%s787_s25 + $0x20] sm:$0xf] (%p1320_p9), %v987_v28 }
 0x1a9   : > { %v806_v25 = vld [vmem:[%s1459_s12 + $0x18] sm:$0xff] }
 0x1aa   : > { %807 = vst [vmem:[%s787_s25 + $0x30] sm:$0xff] %v806_v25 }
 0x1ab   : > { %v989_v29 = vld [vmem:[%s1459_s12 + $0x20] sm:$0xf] }
 0x1ac   : > { %990 = vst [vmem:[%s787_s25 + $0x38] sm:$0xf] %v989_v29 }
 0x1ad   : > { %v808_v26 = vld [vmem:[%s1459_s12 + $0x24] sm:$0xff] }
 0x1ae   : > { %809 = vst [vmem:[%s787_s25 + $0x48] sm:$0xff] %v808_v26 }
 0x1af   : > { %v991_v30 = vld [vmem:[%s1459_s12 + $0x2c] sm:$0xf] }
 0x1b0   : > { %992 = vst [vmem:[%s787_s25 + $0x50] sm:$0xf] %v991_v30 }
 0x1b1 PF: > { %s16_s17 = sadd.s32 1, %s1244_s17   ;;  %s1509_s12 = smov %s1228_s13 }
 0x1b2   : > { %p13_p8 = scmp.ge.s32.totalorder %s16_s17, 4   ;;  %s1510_s13 = smov %s1232_s14 }
 0x1b3   : > { %s1511_s14 = smov %s1318_s24  ;;  %s1512_s15 = smov %s1240_s16 }
 0x1b4   : > { %s1513_s16 = smov %s1515_s19  ;;  %15 = sbr.rel (!%p13_p8) target bundleno = 4 (0x4), region = 107 }
 0x1b9   :  { %841 = vsyncpa [#allocation3], 1 }
 0x1ba   :  { %843 = vsyncpa [#allocation3 + $0x1], 1 }

// kernel: llama2_forward.11
= control target key start
LH: loop header
LB: loop body
LE: loop exit
PB: predicated region body
PF: predicated region fallthrough
CT: control target
= control target key end

     0   :  { %s609_s1 = inlined_call_operand.vmem [shape: bf16[256,256], index: 1, kind: input, shape index: {}]   ;;  %s610_s0 = inlined_call_operand.vmem [shape: bf16[32,256], index: 0, kind: input, shape index: {}]   ;;  %s611_s2 = inlined_call_operand.vmem [shape: bf16[32,256], index: 2, kind: input, shape index: {}]   ;;  %s612_s3 = inlined_call_operand.vmem [shape: bf16[32,256], index: 3, kind: output, shape index: {}]  }
   0x1   :  { %v403_v0 = vld [vmem:[%s609_s1 + $0x74] ss:$8 sps:$4 sm:$0xff]   ;;  %v405_v1 = vld [vmem:[%s609_s1 + $0x70] ss:$8 sps:$4 sm:$0xff]   ;;  %v406_v2 = vld [vmem:[%s609_s1 + $0x64] ss:$8 sps:$4 sm:$0xff]  }
   0x2   :  { %242 = vmatprep.subr.bf16.mxu0 %v403_v0  ;;  %371 = vmatprep.subr.bf16.mxu1 %v403_v0  ;;  %v408_v3 = vld [vmem:[%s609_s1 + $0x60] ss:$8 sps:$4 sm:$0xff]   ;;  %v409_v4 = vld [vmem:[%s609_s1 + $0x54] ss:$8 sps:$4 sm:$0xff]   ;;  %v411_v5 = vld [vmem:[%s609_s1 + $0x50] ss:$8 sps:$4 sm:$0xff]  }
   0x3   :  { %243 = vmatpush1.bf16.msra.mxu0 %v405_v1  ;;  %387 = vmatpush1.bf16.msra.mxu1 %v405_v1  ;;  %v412_v6 = vld [vmem:[%s609_s1 + $0x44] ss:$8 sps:$4 sm:$0xff]   ;;  %v414_v7 = vld [vmem:[%s609_s1 + $0x40] ss:$8 sps:$4 sm:$0xff]   ;;  %v415_v8 = vld [vmem:[%s609_s1 + $0x34] ss:$8 sps:$4 sm:$0xff]  }
   0x4   :  { %244 = vmatprep.subr.bf16.mxu0 %v406_v2  ;;  %372 = vmatprep.subr.bf16.mxu1 %v406_v2  ;;  %v417_v9 = vld [vmem:[%s609_s1 + $0x30] ss:$8 sps:$4 sm:$0xff]   ;;  %v418_v10 = vld [vmem:[%s609_s1 + $0x24] ss:$8 sps:$4 sm:$0xff]   ;;  %v420_v11 = vld [vmem:[%s609_s1 + $0x20] ss:$8 sps:$4 sm:$0xff]  }
   0x5   :  { %v421_v12 = vld [vmem:[%s609_s1 + $0x14] ss:$8 sps:$4 sm:$0xff]   ;;  %v453_v13 = vld [vmem:[%s610_s0 + $0x4] ss:$8 sps:$4 sm:$0xff]   ;;  %v423_v14 = vld [vmem:[%s609_s1 + $0x10] ss:$8 sps:$4 sm:$0xff]  }
   0x6   :  { %v456_v15 = vld [vmem:[%s610_s0 + $0x14] ss:$8 sps:$4 sm:$0xff]   ;;  %v424_v16 = vld [vmem:[%s609_s1 + $0x4] ss:$8 sps:$4 sm:$0xff]   ;;  %274 = vmatprep.mubr.bf16.mxu0 %v453_v13  ;;  %v426_v17 = vld [vmem:[%s609_s1] ss:$8 sps:$4 sm:$0xff]  }
   0x7   :  { %245 = vmatpush1.bf16.msra.mxu0 %v408_v3  ;;  %388 = vmatpush1.bf16.msra.mxu1 %v408_v3  ;;  %v427_v18 = vld [vmem:[%s609_s1 + $0xf4] ss:$8 sps:$4 sm:$0xff]   ;;  %v429_v19 = vld [vmem:[%s609_s1 + $0xf0] ss:$8 sps:$4 sm:$0xff]   ;;  %v430_v20 = vld [vmem:[%s609_s1 + $0xe4] ss:$8 sps:$4 sm:$0xff]  }
   0x8   :  { %246 = vmatprep.subr.bf16.mxu0 %v409_v4  ;;  %373 = vmatprep.subr.bf16.mxu1 %v409_v4  ;;  %v432_v21 = vld [vmem:[%s609_s1 + $0xe0] ss:$8 sps:$4 sm:$0xff]   ;;  %v433_v22 = vld [vmem:[%s609_s1 + $0xd4] ss:$8 sps:$4 sm:$0xff]   ;;  %v435_v23 = vld [vmem:[%s609_s1 + $0xd0] ss:$8 sps:$4 sm:$0xff]  }
   0x9   :  { %284 = vmatprep.mubr.bf16.mxu1 %v456_v15  ;;  %v436_v24 = vld [vmem:[%s609_s1 + $0xc4] ss:$8 sps:$4 sm:$0xff]   ;;  %v438_v25 = vld [vmem:[%s609_s1 + $0xc0] ss:$8 sps:$4 sm:$0xff]   ;;  %v439_v26 = vld [vmem:[%s609_s1 + $0xb4] ss:$8 sps:$4 sm:$0xff]  }
   0xa   :  { %v441_v27 = vld [vmem:[%s609_s1 + $0xb0] ss:$8 sps:$4 sm:$0xff]   ;;  %v442_v28 = vld [vmem:[%s609_s1 + $0xa4] ss:$8 sps:$4 sm:$0xff]   ;;  %v444_v29 = vld [vmem:[%s609_s1 + $0xa0] ss:$8 sps:$4 sm:$0xff]  }
   0xb   :  { %247 = vmatpush1.bf16.msra.mxu0 %v411_v5  ;;  %389 = vmatpush1.bf16.msra.mxu1 %v411_v5  ;;  %v445_v30 = vld [vmem:[%s609_s1 + $0x94] ss:$8 sps:$4 sm:$0xff]   ;;  %v447_v31 = vld [vmem:[%s609_s1 + $0x90] ss:$8 sps:$4 sm:$0xff]   ;;  %v448_v32 = vld [vmem:[%s609_s1 + $0x84] ss:$8 sps:$4 sm:$0xff]  }
   0xc   :  { %248 = vmatprep.subr.bf16.mxu0 %v412_v6  ;;  %374 = vmatprep.subr.bf16.mxu1 %v412_v6  ;;  %v450_v33 = vld [vmem:[%s609_s1 + $0x80] ss:$8 sps:$4 sm:$0xff]   ;;  %v454_v35 = vld [vmem:[%s610_s0 + $0x10] ss:$8 sps:$4 sm:$0xff]  }
   0xd   :  { %v451_v34 = vld [vmem:[%s610_s0] ss:$8 sps:$4 sm:$0xff]   ;;  %v52_v37 = vld [vmem:[%s611_s2 + $0x10] sm:$0xff]  ;;  %v53_v43 = vld [vmem:[%s611_s2 + $0x18] sm:$0xff] }
   0xe   :  { %v50_v36 = vld [vmem:[%s611_s2] sm:$0xff]  ;;  %v58_v39 = vunpack.c.l.bf16 %v52_v37  ;;  %v59_v41 = vunpack.c.h.bf16 %v52_v37  ;;  %v51_v42 = vld [vmem:[%s611_s2 + $0x8] sm:$0xff]  ;;  %v60_v49 = vunpack.c.l.bf16 %v53_v43  ;;  %v61_v51 = vunpack.c.h.bf16 %v53_v43 }
   0xf   :  { %249 = vmatpush1.bf16.msra.mxu0 %v414_v7  ;;  %390 = vmatpush1.bf16.msra.mxu1 %v414_v7  ;;  %v54_v38 = vunpack.c.l.bf16 %v50_v36  ;;  %v55_v40 = vunpack.c.h.bf16 %v50_v36  ;;  %v56_v48 = vunpack.c.l.bf16 %v51_v42  ;;  %v57_v50 = vunpack.c.h.bf16 %v51_v42 }
  0x10   :  { %250 = vmatprep.subr.bf16.mxu0 %v415_v8  ;;  %375 = vmatprep.subr.bf16.mxu1 %v415_v8 }
  0x13   :  { %251 = vmatpush1.bf16.msra.mxu0 %v417_v9  ;;  %391 = vmatpush1.bf16.msra.mxu1 %v417_v9 }
  0x14   :  { %252 = vmatprep.subr.bf16.mxu0 %v418_v10  ;;  %376 = vmatprep.subr.bf16.mxu1 %v418_v10 }
  0x17   :  { %253 = vmatpush1.bf16.msra.mxu0 %v420_v11  ;;  %392 = vmatpush1.bf16.msra.mxu1 %v420_v11 }
  0x18   :  { %254 = vmatprep.subr.bf16.mxu0 %v421_v12  ;;  %377 = vmatprep.subr.bf16.mxu1 %v421_v12 }
  0x1b   :  { %255 = vmatpush1.bf16.msra.mxu0 %v423_v14  ;;  %393 = vmatpush1.bf16.msra.mxu1 %v423_v14 }
  0x1c   :  { %256 = vmatprep.subr.bf16.mxu0 %v424_v16  ;;  %378 = vmatprep.subr.bf16.mxu1 %v424_v16 }
  0x1f   :  { %257 = vmatpush1.bf16.msra.mxu0 %v426_v17  ;;  %394 = vmatpush1.bf16.msra.mxu1 %v426_v17 }
  0x20   :  { %258 = vmatprep.subr.bf16.mxu0 %v427_v18  ;;  %379 = vmatprep.subr.bf16.mxu1 %v427_v18 }
  0x23   :  { %259 = vmatpush2.bf16.msra.mxu0 %v429_v19  ;;  %395 = vmatpush2.bf16.msra.mxu1 %v429_v19 }
  0x24   :  { %260 = vmatprep.subr.bf16.mxu0 %v430_v20  ;;  %380 = vmatprep.subr.bf16.mxu1 %v430_v20 }
  0x27   :  { %261 = vmatpush2.bf16.msra.mxu0 %v432_v21  ;;  %396 = vmatpush2.bf16.msra.mxu1 %v432_v21 }
  0x28   :  { %262 = vmatprep.subr.bf16.mxu0 %v433_v22  ;;  %381 = vmatprep.subr.bf16.mxu1 %v433_v22 }
  0x2b   :  { %263 = vmatpush2.bf16.msra.mxu0 %v435_v23  ;;  %397 = vmatpush2.bf16.msra.mxu1 %v435_v23 }
  0x2c   :  { %264 = vmatprep.subr.bf16.mxu0 %v436_v24  ;;  %382 = vmatprep.subr.bf16.mxu1 %v436_v24 }
  0x2f   :  { %265 = vmatpush2.bf16.msra.mxu0 %v438_v25  ;;  %398 = vmatpush2.bf16.msra.mxu1 %v438_v25 }
  0x30   :  { %266 = vmatprep.subr.bf16.mxu0 %v439_v26  ;;  %383 = vmatprep.subr.bf16.mxu1 %v439_v26 }
  0x33   :  { %267 = vmatpush2.bf16.msra.mxu0 %v441_v27  ;;  %399 = vmatpush2.bf16.msra.mxu1 %v441_v27 }
  0x34   :  { %268 = vmatprep.subr.bf16.mxu0 %v442_v28  ;;  %384 = vmatprep.subr.bf16.mxu1 %v442_v28 }
  0x37   :  { %269 = vmatpush2.bf16.msra.mxu0 %v444_v29  ;;  %400 = vmatpush2.bf16.msra.mxu1 %v444_v29 }
  0x38   :  { %270 = vmatprep.subr.bf16.mxu0 %v445_v30  ;;  %385 = vmatprep.subr.bf16.mxu1 %v445_v30 }
  0x3b   :  { %271 = vmatpush2.bf16.msra.mxu0 %v447_v31  ;;  %401 = vmatpush2.bf16.msra.mxu1 %v447_v31 }
  0x3c   :  { %272 = vmatprep.subr.bf16.mxu0 %v448_v32  ;;  %386 = vmatprep.subr.bf16.mxu1 %v448_v32 }
  0x3f   :  { %273 = vmatpush2.bf16.msra.mxu0 %v450_v33  ;;  %402 = vmatpush2.bf16.msra.mxu1 %v450_v33 }
  0x42   :  { %275 = vmatmul.mubr.bf16.vlgmr.msra.gmra.mxu0 %v451_v34  ;;  %285 = vmatmul.mubr.bf16.vlgmr.msra.gmra.mxu1 %v454_v35 }
 0x102   :  { %v276_v44 = vpop.f32.mrf.mxu0  ;;  %v286_v45 = vpop.f32.mrf.mxu1 }
 0x103   :  { %v277_v52 = vadd.f32 %v276_v44, %v54_v38  ;;  %v287_v53 = vadd.f32 %v286_v45, %v58_v39 }
 0x104   :  { %v278_v46 = vpop.f32.mrf.mxu0  ;;  %v288_v47 = vpop.f32.mrf.mxu1 }
 0x105   :  { %v279_v54 = vadd.f32 %v278_v46, %v55_v40  ;;  %v289_v55 = vadd.f32 %v288_v47, %v59_v41 }
 0x106   :  { %v280_v56 = vpop.f32.mrf.mxu0  ;;  %v290_v57 = vpop.f32.mrf.mxu1 }
 0x107   :  { %v367_v58 = vpack.c.bf16 %v279_v54, %v277_v52  ;;  %v369_v59 = vpack.c.bf16 %v289_v55, %v287_v53  ;;  %v281_v62 = vadd.f32 %v280_v56, %v56_v48  ;;  %v291_v63 = vadd.f32 %v290_v57, %v60_v49 }
 0x108   :  { %v282_v60 = vpop.f32.mrf.mxu0  ;;  %v292_v61 = vpop.f32.mrf.mxu1 }
 0x109   :  { %319 = vst [vmem:[%s612_s3] sm:$0xff] %v367_v58  ;;  %321 = vst [vmem:[%s612_s3 + $0x10] sm:$0xff] %v369_v59  ;;  %v283_v0 = vadd.f32 %v282_v60, %v57_v50  ;;  %v293_v1 = vadd.f32 %v292_v61, %v61_v51 }
 0x10b   :  { %v368_v2 = vpack.c.bf16 %v283_v0, %v281_v62  ;;  %v370_v3 = vpack.c.bf16 %v293_v1, %v291_v63 }
 0x10d   :  { %320 = vst [vmem:[%s612_s3 + $0x8] sm:$0xff] %v368_v2  ;;  %322 = vst [vmem:[%s612_s3 + $0x18] sm:$0xff] %v370_v3 }

// kernel: llama2_forward.10
= control target key start
LH: loop header
LB: loop body
LE: loop exit
PB: predicated region body
PF: predicated region fallthrough
CT: control target
= control target key end

     0   :  { %s1097_s18 = smov 0   ;;  %s1099_s19 = smov 0   ;;  %s1226_s0 = inlined_call_operand.vmem [shape: bf16[2,2,16,128], index: 0, kind: input, shape index: {}]   ;;  %s1227_s1 = inlined_call_operand.vmem [shape: bf16[2,2,16,128], index: 1, kind: input, shape index: {}]   ;;  %s1228_s2 = inlined_call_operand.vmem [shape: bf16[2,2,16,128], index: 2, kind: input, shape index: {}]   ;;  %s1229_s3 = inlined_call_operand.vmem [shape: f32[16,128], index: 3, kind: input, shape index: {}]   ;;  %s1230_s4 = inlined_call_operand.vmem [shape: f32[16,128], index: 4, kind: input, shape index: {}]   ;;  %s1231_s5 = inlined_call_operand.vmem [shape: bf16[2,2,16,128], index: 5, kind: output, shape index: {}]  }
   0x1   :  { %s1101_s20 = smov 0  }
   0x2 LB: > { %s27_s21 = sadd.s32 1, %s1058_s19  ;;  %p887_p0 = scmp.ge.s32.totalorder %s1062_s20, 1  ;;  %s1062_s20 = sphi %s1101_s20, %s15_s20   ;;  %s1058_s19 = sphi %s1099_s19, %s1233_s19   ;;  %s1054_s18 = sphi %s1097_s18, %s1232_s18  }
   0x3   : > { %p29_p1 = scmp.ge.s32.totalorder %s27_s21, 2  ;;  %p245_p2 = scmp.lt.s32.totalorder %s1062_s20, 3 }
   0x5   : > { %s1235_s21 = smov (%p29_p1, %s27_s21), 0  ;;  %p246_p3 = pnand %p887_p0, %p245_p2 }
   0x6   : > { %p304_p4 = scmp.lt.s32.totalorder (!%p246_p3), %s1054_s18, 1  ;;  %s1064_s29 = smov (!%p246_p3), 64  }
   0x7   : > { %249 = sbr.rel (%p246_p3) target bundleno = 883 (0x373), region = 40 }
   0xc   : > { %s1237_s18 = smov (!%p304_p4, %s1054_s18), 1  ;;  %v1065_v11 = vmov 0.0   ;;  %vm1066_vm0 = vmmov 0   ;;  %vm396_vm1 = vcmask 523264   ;;  %v348_v31 = vld [vmem:[%s1229_s3] sm:$0xff]  ;;  %v349_v32 = vld [vmem:[%s1229_s3 + $0x8] sm:$0xff] }
   0xd   : > { %s1115_s22 = sshll.u32 %s1237_s18, 4  ;;  %951 = vmatprep.subr.bf16.mxu0 %v1065_v11  ;;  %957 = vmatprep.subr.bf16.mxu1 %v1065_v11  ;;  %v350_v33 = vld [vmem:[%s1230_s4] sm:$0xff]  ;;  %v351_v38 = vld [vmem:[%s1230_s4 + $0x8] sm:$0xff]  ;;  %vm574_vm3 = vcmask 130048  }
   0xe   : > { %s323_s25 = scalar_lea.vmem %s1227_s1, %s1115_s22  ;;  %s312_s28 = scalar_lea.vmem %s1226_s0, %s1115_s22  ;;  %953 = vmatprep.mubr.msk.bf16.mxu0 %vm1066_vm0, %v1065_v11  ;;  %959 = vmatprep.mubr.msk.bf16.mxu1 %vm1066_vm0, %v1065_v11 }
   0xf   : > { %v941_v0 = vld [vmem:[%s323_s25 + $0x8] sm:$0xff]   ;;  %v923_v1 = vld [vmem:[%s323_s25] sm:$0xff]   ;;  %s334_s15 = scalar_lea.vmem %s1228_s2, %s1115_s22  ;;  %s345_s18 = scalar_lea.vmem %s1231_s5, %s1115_s22 }
  0x10   : > { %v1121_v2 = vunpack.c.l.bf16 %v941_v0  ;;  %v1123_v3 = vunpack.c.h.bf16 %v941_v0  ;;  %v924_v4 = vunpack.c.l.bf16 %v923_v1  ;;  %v925_v5 = vunpack.c.h.bf16 %v923_v1  ;;  %v915_v10 = vld [vmem:[%s312_s28] sm:$0xff]   ;;  %v940_v16 = vld [vmem:[%s312_s28 + $0x8] sm:$0xff]  }
  0x11   : > { %v1139_v14 = vunpack.c.h.bf16 %v915_v10  ;;  %v1141_v15 = vunpack.c.l.bf16 %v915_v10  ;;  %v1147_v19 = vunpack.c.h.bf16 %v940_v16  ;;  %v1149_v20 = vunpack.c.l.bf16 %v940_v16 }
  0x12   : > { %v1007_v6 = vpack.i.bf16 %v1123_v3, %v1121_v2  ;;  %v1002_v7 = vpack.i.bf16 %v925_v5, %v924_v4  ;;  %v429_v8 = vsub.f32 0.0, %v1121_v2  ;;  %v427_v9 = vsub.f32 0.0, %v924_v4 }
  0x13   : > { %v430_v12 = vsub.f32 0.0, %v1123_v3  ;;  %v428_v13 = vsub.f32 0.0, %v925_v5  ;;  %v361_v17 = vsub.f32 0.0, %v1139_v14  ;;  %v360_v18 = vsub.f32 0.0, %v1141_v15 }
  0x14   : > { %1008 = vrot.lane.b32.xlu1 %v1007_v6, %s1064_s29  ;;  %1003 = vrot.lane.b32.xlu0 %v1002_v7, %s1064_s29  ;;  %v363_v21 = vsub.f32 0.0, %v1147_v19  ;;  %v362_v22 = vsub.f32 0.0, %v1149_v20  ;;  %v1017_v23 = vpack.i.bf16 %v1147_v19, %v1149_v20  ;;  %v1012_v24 = vpack.i.bf16 %v1139_v14, %v1141_v15 }
  0x15   : > { %v467_v39 = vmul.f32 %v924_v4, %v348_v31  ;;  %v468_v40 = vmul.f32 %v925_v5, %v349_v32  ;;  %v469_v45 = vmul.f32 %v1121_v2, %v348_v31  ;;  %v470_v46 = vmul.f32 %v1123_v3, %v349_v32 }
  0x16   : > { %v401_v3 = vmul.f32 %v1141_v15, %v348_v31  ;;  %v402_v4 = vmul.f32 %v1139_v14, %v349_v32  ;;  %v403_v5 = vmul.f32 %v1149_v20, %v348_v31  ;;  %v404_v6 = vmul.f32 %v1147_v19, %v349_v32 }
  0x18   : > { %439 = vrot.lane.b32.xlu1 %v429_v8, %s1064_s29  ;;  %435 = vrot.lane.b32.xlu0 %v427_v9, %s1064_s29 }
  0x1c   : > { %441 = vrot.lane.b32.xlu1 %v430_v12, %s1064_s29  ;;  %437 = vrot.lane.b32.xlu0 %v428_v13, %s1064_s29 }
  0x20   : > { %370 = vrot.lane.b32.xlu1 %v361_v17, %s1064_s29  ;;  %368 = vrot.lane.b32.xlu0 %v360_v18, %s1064_s29 }
  0x24   : > { %374 = vrot.lane.b32.xlu1 %v363_v21, %s1064_s29  ;;  %372 = vrot.lane.b32.xlu0 %v362_v22, %s1064_s29 }
  0x28   : > { %1018 = vrot.lane.b32.xlu1 %v1017_v23, %s1064_s29  ;;  %1013 = vrot.lane.b32.xlu0 %v1012_v24, %s1064_s29 }
  0x86   : > { %v1009_v25 = vpop.permute.xlu1 %1008  ;;  %v1004_v26 = vpop.permute.xlu0 %1003 }
  0x87   : > { %v1010_v27 = vunpack.i.l.bf16 %v1009_v25  ;;  %v1005_v28 = vunpack.i.l.bf16 %v1004_v26  ;;  %v1011_v36 = vunpack.i.h.bf16 %v1009_v25  ;;  %v1006_v37 = vunpack.i.h.bf16 %v1004_v26 }
  0x88   : > { %v563_v26 = vlaneseq }
  0x8a   : > { %v440_v29 = vpop.permute.xlu1 %439  ;;  %v436_v30 = vpop.permute.xlu0 %435 }
  0x8b   : > { %v465_v34 = vsel %vm396_vm1, %v440_v29, %v1010_v27  ;;  %v463_v35 = vsel %vm396_vm1, %v436_v30, %v1005_v28  ;;  %v564_v27 = vshrl.u32 %v563_v26, 7  ;;  %v567_v28 = vand.u32 127, %v563_v26 }
  0x8c   : > { %v473_v41 = vmul.f32 %v465_v34, %v350_v33  ;;  %v471_v42 = vmul.f32 %v463_v35, %v350_v33 }
  0x8d   : > { %vm568_vm2 = vcmp.gt.s32.totalorder %v567_v28, %v564_v27  ;;  %v565_v29 = vadd.s32 8, %v564_v27 }
  0x8e   : > { %v442_v43 = vpop.permute.xlu1 %441  ;;  %v438_v44 = vpop.permute.xlu0 %437  ;;  %v475_v53 = vadd.f32 %v471_v42, %v467_v39  ;;  %v477_v55 = vadd.f32 %v473_v41, %v469_v45 }
  0x8f   : > { %v466_v47 = vsel %vm396_vm1, %v442_v43, %v1011_v36  ;;  %v464_v48 = vsel %vm396_vm1, %v438_v44, %v1006_v37  ;;  %vm569_vm4 = vcmp.gt.s32.totalorder %v567_v28, %v565_v29 }
  0x90   : > { %v474_v49 = vmul.f32 %v466_v47, %v351_v38  ;;  %v472_v50 = vmul.f32 %v464_v48, %v351_v38 }
  0x92   : > { %v371_v51 = vpop.permute.xlu1 %370  ;;  %v369_v52 = vpop.permute.xlu0 %368  ;;  %v476_v54 = vadd.f32 %v472_v50, %v468_v40  ;;  %v478_v56 = vadd.f32 %v474_v49, %v470_v46 }
  0x94   : > { %v479_v57 = vpack.c.bf16 %v476_v54, %v475_v53  ;;  %v480_v58 = vpack.c.bf16 %v478_v56, %v477_v55 }
  0x96   : > { %952 = vmatpush3.bf16.xpose.msra.mxu0 %v479_v57  ;;  %958 = vmatpush3.bf16.xpose.msra.mxu1 %v480_v58  ;;  %v375_v59 = vpop.permute.xlu1 %374  ;;  %v373_v60 = vpop.permute.xlu0 %372 }
  0x97   : > { %963 = vmatprep.subr.bf16.mxu0 %v1065_v11  ;;  %969 = vmatprep.subr.bf16.mxu1 %v1065_v11 }
  0x9a   : > { %v1019_v61 = vpop.permute.xlu1 %1018  ;;  %v1014_v62 = vpop.permute.xlu0 %1013 }
  0x9b   : > { %v1021_v63 = vunpack.i.h.bf16 %v1019_v61  ;;  %v1020_v0 = vunpack.i.l.bf16 %v1019_v61  ;;  %v1016_v1 = vunpack.i.h.bf16 %v1014_v62  ;;  %v1015_v2 = vunpack.i.l.bf16 %v1014_v62 }
  0x9d   : > { %v400_v7 = vsel %vm396_vm1, %v375_v59, %v1021_v63  ;;  %v399_v8 = vsel %vm396_vm1, %v373_v60, %v1020_v0  ;;  %v398_v9 = vsel %vm396_vm1, %v371_v51, %v1016_v1  ;;  %v397_v10 = vsel %vm396_vm1, %v369_v52, %v1015_v2  ;;  %v1022_v1 = vld [vmem:[%s334_s15] sm:$0xff]   ;;  %v1023_v2 = vld [vmem:[%s334_s15 + $0x8] sm:$0xff]  }
  0x9e   : > { %v408_v12 = vmul.f32 %v400_v7, %v351_v38  ;;  %v407_v13 = vmul.f32 %v399_v8, %v350_v33  ;;  %v406_v16 = vmul.f32 %v398_v9, %v351_v38  ;;  %v405_v17 = vmul.f32 %v397_v10, %v350_v33 }
  0xa0   : > { %v409_v18 = vadd.f32 %v405_v17, %v401_v3  ;;  %v410_v15 = vadd.f32 %v406_v16, %v402_v4  ;;  %v411_v21 = vadd.f32 %v407_v13, %v403_v5  ;;  %v412_v14 = vadd.f32 %v408_v12, %v404_v6 }
  0xa2   : > { %v413_v22 = vmul.f32 0.088388346, %v409_v18  ;;  %v414_v20 = vmul.f32 0.088388346, %v410_v15  ;;  %v415_v23 = vmul.f32 0.088388346, %v411_v21 }
  0xa3   : > { %v416_v19 = vmul.f32 0.088388346, %v412_v14 }
  0xa4   : > { %v417_v24 = vpack.c.bf16 %v414_v20, %v413_v22 }
  0xa5   : > { %v418_v25 = vpack.c.bf16 %v416_v19, %v415_v23 }
  0xa6   : > { %954 = vmatmul.mubr.bf16.vlgmr.msra.gmra.mxu0 %v417_v24 }
  0xa7   : > { %960 = vmatmul.mubr.bf16.vlgmr.msra.gmra.mxu1 %v418_v25  ;;  %965 = vmatprep.mubr.msk.bf16.mxu0 %vm1066_vm0, %v1065_v11 }
  0xa8   : > { %971 = vmatprep.mubr.msk.bf16.mxu1 %vm1066_vm0, %v1065_v11  ;;  %964 = vmatpush3.bf16.msra.mxu0 %v1022_v1 }
  0xa9   : > { %970 = vmatpush3.bf16.msra.mxu1 %v1023_v2 }
 0x166   : > { %v515_v30 = vpop.f32.mrf.mxu0 }
 0x167   : > { %v570_v31 = vsel %vm568_vm2, -1e+30, %v515_v30  ;;  %v556_v32 = vpop.f32.mrf.mxu1 }
 0x168   : > { %v955_v33 = vpop.f32.mrf.mxu0  ;;  %v575_v34 = vsel %vm574_vm3, %v570_v31, -inf  ;;  %v572_v35 = vsel %vm568_vm2, -1e+30, %v556_v32 }
 0x169   : > { %v961_v36 = vpop.f32.mrf.mxu1  ;;  %576 = vmax.xlane.f32.xlu0 %v575_v34  ;;  %v581_v40 = vsel %vm574_vm3, %v572_v35, -inf }
 0x16a   : > { %v518_v37 = vpop.f32.mrf.mxu0 }
 0x16b   : > { %v571_v38 = vsel %vm569_vm4, -1e+30, %v518_v37  ;;  %v559_v39 = vpop.f32.mrf.mxu1 }
 0x16c   : > { %v956_v11 = vpop.f32.mrf.mxu0  ;;  %v578_v41 = vsel %vm574_vm3, %v571_v38, -inf  ;;  %v573_v42 = vsel %vm569_vm4, -1e+30, %v559_v39 }
 0x16d   : > { %v962_v43 = vpop.f32.mrf.mxu1  ;;  %582 = vmax.xlane.f32.xlu0 %v581_v40  ;;  %579 = vmax.xlane.f32.xlu1 %v578_v41  ;;  %v584_v44 = vsel %vm574_vm3, %v573_v42, -inf }
 0x171   : > { %585 = vmax.xlane.f32.xlu0 %v584_v44 }
 0x1f2   : > { %v577_v45 = vpop.xlane.xlu0 %576 }
 0x1f3   : > { %v587_v46 = vsub.f32 %v570_v31, %v577_v45 }
 0x1f5   : > { %v591_v47 = vmul.f32 1.442695, %v587_v46 }
 0x1f6   : > { %v583_v48 = vpop.xlane.xlu0 %582  ;;  %v580_v49 = vpop.xlane.xlu1 %579 }
 0x1f7   : > { %1024 = vpow2.f32 %v591_v47  ;;  %v589_v50 = vsub.f32 %v572_v35, %v583_v48  ;;  %v588_v51 = vsub.f32 %v571_v38, %v580_v49 }
 0x1f9   : > { %v595_v52 = vmul.f32 1.442695, %v589_v50  ;;  %v593_v53 = vmul.f32 1.442695, %v588_v51 }
 0x1fa   : > { %v586_v54 = vpop.xlane.xlu0 %585 }
 0x1fb   : > { %1026 = vpow2.f32 %v595_v52  ;;  %v590_v55 = vsub.f32 %v573_v42, %v586_v54 }
 0x1fc   : > { %1028 = vpow2.f32 %v593_v53 }
 0x1fd   : > { %v597_v56 = vmul.f32 1.442695, %v590_v55 }
 0x1ff   : > { %1030 = vpow2.f32 %v597_v56 }
 0x204   : > { %v1025_v57 = vpop.eup %1024 }
 0x205   : > { %v599_v58 = vsel %vm574_vm3, %v1025_v57, 0.0 }
 0x206   : > { %600 = vadd.xlane.f32.xlu1 %v599_v58 }
 0x208   : > { %v1027_v59 = vpop.eup %1026 }
 0x209   : > { %v1029_v60 = vpop.eup %1028  ;;  %v605_v61 = vsel %vm574_vm3, %v1027_v59, 0.0 }
 0x20a   : > { %606 = vadd.xlane.f32.xlu1 %v605_v61  ;;  %v602_v62 = vsel %vm574_vm3, %v1029_v60, 0.0 }
 0x20b   : > { %603 = vadd.xlane.f32.xlu0 %v602_v62 }
 0x20c   : > { %v1031_v63 = vpop.eup %1030 }
 0x20d   : > { %v608_v0 = vsel %vm574_vm3, %v1031_v63, 0.0 }
 0x20f   : > { %609 = vadd.xlane.f32.xlu0 %v608_v0 }
 0x28f   : > { %v601_v3 = vpop.xlane.xlu1 %600 }
 0x290   : > { %1032 = vrcp.f32 %v601_v3 }
 0x293   : > { %v607_v5 = vpop.xlane.xlu1 %606 }
 0x294   : > { %v604_v4 = vpop.xlane.xlu0 %603 }
 0x295   : > { %1034 = vrcp.f32 %v604_v4 }
 0x296   : > { %1036 = vrcp.f32 %v607_v5 }
 0x298   : > { %v610_v6 = vpop.xlane.xlu0 %609 }
 0x299   : > { %1038 = vrcp.f32 %v610_v6 }
 0x29d   : > { %v1033_v7 = vpop.eup %1032 }
 0x29e   : > { %v615_v9 = vmul.f32 %v1033_v7, %v1025_v57 }
 0x2a2   : > { %v1035_v8 = vpop.eup %1034 }
 0x2a3   : > { %v616_v10 = vmul.f32 %v1035_v8, %v1029_v60  ;;  %v1037_v12 = vpop.eup %1036 }
 0x2a4   : > { %v617_v17 = vmul.f32 %v1037_v12, %v1027_v59 }
 0x2a5   : > { %v619_v13 = vpack.c.bf16 %v616_v10, %v615_v9 }
 0x2a6   : > { %v1039_v16 = vpop.eup %1038 }
 0x2a7   : > { %v618_v18 = vmul.f32 %v1039_v16, %v1031_v63  ;;  %966 = vmatmul.mubr.msk.bf16.vlgmr.msra.gmra.mxu0 %vm574_vm3, %v619_v13 }
 0x2a9   : > { %v620_v15 = vpack.c.bf16 %v618_v18, %v617_v17 }
 0x2ab   : > { %972 = vmatmul.mubr.msk.bf16.vlgmr.msra.gmra.mxu1 %vm574_vm3, %v620_v15 }
 0x367   : > { %v668_v21 = vpop.f32.mrf.mxu0 }
 0x369   : > { %v967_v14 = vpop.f32.mrf.mxu0 }
 0x36b   : > { %v671_v22 = vpop.f32.mrf.mxu0  ;;  %v718_v20 = vpop.f32.mrf.mxu1 }
 0x36c   : > { %v933_v23 = vpack.c.bf16 %v671_v22, %v668_v21 }
 0x36d   : > { %v968_v19 = vpop.f32.mrf.mxu0  ;;  %v973_v24 = vpop.f32.mrf.mxu1 }
 0x36e   : > { %934 = vst [vmem:[%s345_s18] sm:$0xff] %v933_v23  }
 0x36f   : > { %v721_v25 = vpop.f32.mrf.mxu1 }
 0x370   : > { %v938_v26 = vpack.c.bf16 %v721_v25, %v718_v20 }
 0x371   : > { %v974_v27 = vpop.f32.mrf.mxu1 }
 0x372   : > { %942 = vst [vmem:[%s345_s18 + $0x8] sm:$0xff] %v938_v26  }
 0x373 PF: > { %s15_s20 = sadd.s32 1, %s1062_s20   ;;  %s1232_s18 = smov %s1058_s19 }
 0x374   : > { %p12_p5 = scmp.ge.s32.totalorder %s15_s20, 4   ;;  %s1233_s19 = smov %s1235_s21 }
 0x376   :  { %14 = sbr.rel (!%p12_p5) target bundleno = 2 (0x2), region = 76 }

// kernel: llama2_forward.13
= control target key start
LH: loop header
LB: loop body
LE: loop exit
PB: predicated region body
PF: predicated region fallthrough
CT: control target
= control target key end

     0   :  { %s1407_s12 = smov 0   ;;  %s1409_s13 = smov 0   ;;  %s1738_s0 = inlined_call_operand.vmem [shape: bf16[32,256], index: 0, kind: input, shape index: {}]   ;;  %s1739_s1 = inlined_call_operand.vmem [shape: f32[1,256], index: 1, kind: input, shape index: {}]   ;;  %s1740_s2 = inlined_call_operand.vmem [shape: bf16[256,768], index: 2, kind: input, shape index: {}]   ;;  %s1741_s3 = inlined_call_operand.vmem [shape: bf16[32,768], index: 3, kind: output, shape index: {}]  }
   0x1   :  { %s1411_s14 = smov 0   ;;  %s1413_s15 = smov 0  }
   0x2   :  { %s1415_s16 = smov 0  }
   0x3 LB: > { %s22_s17 = sadd.s32 1, %s1381_s15  ;;  %s1056_s18 = sadd.s32 4294967295, %s1385_s16   ;;  %s1385_s16 = sphi %s1415_s16, %s13_s16   ;;  %s1381_s15 = sphi %s1413_s15, %s1746_s15   ;;  %s1377_s14 = sphi %s1411_s14, %s1745_s14   ;;  %s1373_s13 = sphi %s1409_s13, %s1744_s13   ;;  %s1369_s12 = sphi %s1407_s12, %s1743_s12  }
   0x4   : > { %p23_p0 = scmp.ge.s32.totalorder %s22_s17, 2  ;;  %p86_p1 = scmp.ne.s32.totalorder %s1373_s13, %s1369_s12 }
   0x5   : > { %p87_p2 = scmp.eq.s32.totalorder %s1385_s16, 0  ;;  %p118_p4 = scmp.eq.s32.totalorder %s1056_s18, 1 }
   0x6   : > { %s1748_s17 = smov (%p23_p0, %s22_s17), 0  ;;  %s79_s20 = sadd.s32 1, %s1373_s13 }
   0x7   : > { %p88_p3 = por %p87_p2, %p86_p1  ;;  %s76_s19 = ssub.s32 %s1381_s15, %s1748_s17 }
   0x8   : > { %p77_p5 = scmp.eq.s32.totalorder %s76_s19, 0  ;;  %p1442_p6 = por %p118_p4, %p86_p1 }
   0x9   : > { %p1060_p7 = scmp.ge.s32.totalorder %s1385_s16, 2 }
   0xa   : > { %s1447_s22 = scalar_select %p77_p5, %s1373_s13, %s79_s20  }
   0xb   : > { %153 = sbr.rel (%p1060_p7) target bundleno = 58 (0x3a), region = 24 }
  0x10   : > { %156 = sbr.rel (!%p88_p3) target bundleno = 58 (0x3a), region = 28  ;;  %s158_s23 = sand.u32 (%p88_p3), 1, %s1373_s13  }
  0x11   : > { %s1194_s24 = smul.u32 (%p88_p3), 12, %s1381_s15 }
  0x12   : > { %s1232_s25 = smul.u32 (%p88_p3), 384, %s158_s23 }
  0x13   : > { %s1455_s28 = scalar_lea.vmem (%p88_p3), %s1740_s2, %s1194_s24 }
  0x14   : > { %v178_v0 = vld [vmem:[%s1455_s28] sm:$0xff] (%p88_p3)  ;;  %v180_v1 = vld [vmem:[%s1455_s28 + $0x18] sm:$0xff] (%p88_p3)  ;;  %v182_v2 = vld [vmem:[%s1455_s28 + $0x30] sm:$0xff] (%p88_p3)  ;;  %s1460_s29 = scalar_lea.vmem (%p88_p3), [#allocation2], %s1232_s25 }
  0x15   : > { %179 = vst [vmem:[%s1460_s29] sm:$0xff] %v178_v0  ;;  %181 = vst [vmem:[%s1460_s29 + $0xc] sm:$0xff] %v180_v1  ;;  %v184_v3 = vld [vmem:[%s1455_s28 + $0x48] sm:$0xff]  ;;  %v186_v4 = vld [vmem:[%s1455_s28 + $0x60] sm:$0xff] }
  0x16   : > { %183 = vst [vmem:[%s1460_s29 + $0x18] sm:$0xff] %v182_v2  ;;  %v188_v5 = vld [vmem:[%s1455_s28 + $0x78] sm:$0xff]  ;;  %185 = vst [vmem:[%s1460_s29 + $0x24] sm:$0xff] %v184_v3  ;;  %v190_v6 = vld [vmem:[%s1455_s28 + $0x90] sm:$0xff] }
  0x17   : > { %187 = vst [vmem:[%s1460_s29 + $0x30] sm:$0xff] %v186_v4  ;;  %189 = vst [vmem:[%s1460_s29 + $0x3c] sm:$0xff] %v188_v5  ;;  %v192_v7 = vld [vmem:[%s1455_s28 + $0xa8] sm:$0xff]  ;;  %v194_v8 = vld [vmem:[%s1455_s28 + $0xc0] sm:$0xff] }
  0x18   : > { %191 = vst [vmem:[%s1460_s29 + $0x48] sm:$0xff] %v190_v6  ;;  %193 = vst [vmem:[%s1460_s29 + $0x54] sm:$0xff] %v192_v7  ;;  %v196_v9 = vld [vmem:[%s1455_s28 + $0xd8] sm:$0xff]  ;;  %v198_v10 = vld [vmem:[%s1455_s28 + $0xf0] sm:$0xff] }
  0x19   : > { %195 = vst [vmem:[%s1460_s29 + $0x60] sm:$0xff] %v194_v8  ;;  %v200_v11 = vld [vmem:[%s1455_s28 + $0x108] sm:$0xff]  ;;  %197 = vst [vmem:[%s1460_s29 + $0x6c] sm:$0xff] %v196_v9  ;;  %v202_v12 = vld [vmem:[%s1455_s28 + $0x120] sm:$0xff] }
  0x1a   : > { %199 = vst [vmem:[%s1460_s29 + $0x78] sm:$0xff] %v198_v10  ;;  %201 = vst [vmem:[%s1460_s29 + $0x84] sm:$0xff] %v200_v11  ;;  %v204_v13 = vld [vmem:[%s1455_s28 + $0x138] sm:$0xff]  ;;  %v206_v14 = vld [vmem:[%s1455_s28 + $0x150] sm:$0xff] }
  0x1b   : > { %203 = vst [vmem:[%s1460_s29 + $0x90] sm:$0xff] %v202_v12  ;;  %205 = vst [vmem:[%s1460_s29 + $0x9c] sm:$0xff] %v204_v13  ;;  %v208_v15 = vld [vmem:[%s1455_s28 + $0x168] sm:$0xff]  ;;  %v210_v16 = vld [vmem:[%s1455_s28 + $0x180] sm:$0xff] }
  0x1c   : > { %207 = vst [vmem:[%s1460_s29 + $0xa8] sm:$0xff] %v206_v14  ;;  %v212_v17 = vld [vmem:[%s1455_s28 + $0x198] sm:$0xff]  ;;  %209 = vst [vmem:[%s1460_s29 + $0xb4] sm:$0xff] %v208_v15  ;;  %v214_v18 = vld [vmem:[%s1455_s28 + $0x1b0] sm:$0xff] }
  0x1d   : > { %211 = vst [vmem:[%s1460_s29 + $0xc0] sm:$0xff] %v210_v16  ;;  %213 = vst [vmem:[%s1460_s29 + $0xcc] sm:$0xff] %v212_v17  ;;  %v216_v19 = vld [vmem:[%s1455_s28 + $0x1c8] sm:$0xff]  ;;  %v218_v20 = vld [vmem:[%s1455_s28 + $0x1e0] sm:$0xff] }
  0x1e   : > { %215 = vst [vmem:[%s1460_s29 + $0xd8] sm:$0xff] %v214_v18  ;;  %217 = vst [vmem:[%s1460_s29 + $0xe4] sm:$0xff] %v216_v19  ;;  %v220_v21 = vld [vmem:[%s1455_s28 + $0x1f8] sm:$0xff]  ;;  %v222_v22 = vld [vmem:[%s1455_s28 + $0x210] sm:$0xff] }
  0x1f   : > { %219 = vst [vmem:[%s1460_s29 + $0xf0] sm:$0xff] %v218_v20  ;;  %v224_v23 = vld [vmem:[%s1455_s28 + $0x228] sm:$0xff]  ;;  %221 = vst [vmem:[%s1460_s29 + $0xfc] sm:$0xff] %v220_v21  ;;  %v226_v24 = vld [vmem:[%s1455_s28 + $0x240] sm:$0xff] }
  0x20   : > { %223 = vst [vmem:[%s1460_s29 + $0x108] sm:$0xff] %v222_v22  ;;  %225 = vst [vmem:[%s1460_s29 + $0x114] sm:$0xff] %v224_v23  ;;  %v228_v25 = vld [vmem:[%s1455_s28 + $0x258] sm:$0xff]  ;;  %v230_v26 = vld [vmem:[%s1455_s28 + $0x270] sm:$0xff] }
  0x21   : > { %227 = vst [vmem:[%s1460_s29 + $0x120] sm:$0xff] %v226_v24  ;;  %229 = vst [vmem:[%s1460_s29 + $0x12c] sm:$0xff] %v228_v25  ;;  %v232_v27 = vld [vmem:[%s1455_s28 + $0x288] sm:$0xff]  ;;  %v234_v28 = vld [vmem:[%s1455_s28 + $0x2a0] sm:$0xff] }
  0x22   : > { %231 = vst [vmem:[%s1460_s29 + $0x138] sm:$0xff] %v230_v26  ;;  %v236_v29 = vld [vmem:[%s1455_s28 + $0x2b8] sm:$0xff]  ;;  %233 = vst [vmem:[%s1460_s29 + $0x144] sm:$0xff] %v232_v27  ;;  %v238_v30 = vld [vmem:[%s1455_s28 + $0x2d0] sm:$0xff] }
  0x23   : > { %235 = vst [vmem:[%s1460_s29 + $0x150] sm:$0xff] %v234_v28  ;;  %237 = vst [vmem:[%s1460_s29 + $0x15c] sm:$0xff] %v236_v29  ;;  %v240_v31 = vld [vmem:[%s1455_s28 + $0x2e8] sm:$0xff]  ;;  %v1064_v33 = vld [vmem:[%s1455_s28 + $0x20] sm:$0xf] }
  0x24   : > { %v1062_v32 = vld [vmem:[%s1455_s28 + $0x8] sm:$0xf]  ;;  %239 = vst [vmem:[%s1460_s29 + $0x168] sm:$0xff] %v238_v30  ;;  %241 = vst [vmem:[%s1460_s29 + $0x174] sm:$0xff] %v240_v31  ;;  %v1066_v34 = vld [vmem:[%s1455_s28 + $0x38] sm:$0xf] }
  0x25   : > { %1063 = vst [vmem:[%s1460_s29 + $0x8] sm:$0xf] %v1062_v32  ;;  %v1068_v35 = vld [vmem:[%s1455_s28 + $0x50] sm:$0xf]  ;;  %1065 = vst [vmem:[%s1460_s29 + $0x14] sm:$0xf] %v1064_v33 }
  0x26   : > { %1067 = vst [vmem:[%s1460_s29 + $0x20] sm:$0xf] %v1066_v34  ;;  %1069 = vst [vmem:[%s1460_s29 + $0x2c] sm:$0xf] %v1068_v35  ;;  %v1070_v36 = vld [vmem:[%s1455_s28 + $0x68] sm:$0xf] }
  0x27   : > { %v1072_v37 = vld [vmem:[%s1455_s28 + $0x80] sm:$0xf]  ;;  %v1074_v38 = vld [vmem:[%s1455_s28 + $0x98] sm:$0xf]  ;;  %1071 = vst [vmem:[%s1460_s29 + $0x38] sm:$0xf] %v1070_v36 }
  0x28   : > { %1073 = vst [vmem:[%s1460_s29 + $0x44] sm:$0xf] %v1072_v37  ;;  %1075 = vst [vmem:[%s1460_s29 + $0x50] sm:$0xf] %v1074_v38  ;;  %v1076_v39 = vld [vmem:[%s1455_s28 + $0xb0] sm:$0xf] }
  0x29   : > { %v1078_v40 = vld [vmem:[%s1455_s28 + $0xc8] sm:$0xf]  ;;  %v1080_v41 = vld [vmem:[%s1455_s28 + $0xe0] sm:$0xf]  ;;  %1077 = vst [vmem:[%s1460_s29 + $0x5c] sm:$0xf] %v1076_v39 }
  0x2a   : > { %1079 = vst [vmem:[%s1460_s29 + $0x68] sm:$0xf] %v1078_v40  ;;  %1081 = vst [vmem:[%s1460_s29 + $0x74] sm:$0xf] %v1080_v41  ;;  %v1082_v42 = vld [vmem:[%s1455_s28 + $0xf8] sm:$0xf] }
  0x2b   : > { %v1084_v43 = vld [vmem:[%s1455_s28 + $0x110] sm:$0xf]  ;;  %v1086_v44 = vld [vmem:[%s1455_s28 + $0x128] sm:$0xf]  ;;  %1083 = vst [vmem:[%s1460_s29 + $0x80] sm:$0xf] %v1082_v42 }
  0x2c   : > { %1085 = vst [vmem:[%s1460_s29 + $0x8c] sm:$0xf] %v1084_v43  ;;  %1087 = vst [vmem:[%s1460_s29 + $0x98] sm:$0xf] %v1086_v44  ;;  %v1088_v45 = vld [vmem:[%s1455_s28 + $0x140] sm:$0xf] }
  0x2d   : > { %v1090_v46 = vld [vmem:[%s1455_s28 + $0x158] sm:$0xf]  ;;  %v1092_v47 = vld [vmem:[%s1455_s28 + $0x170] sm:$0xf]  ;;  %1089 = vst [vmem:[%s1460_s29 + $0xa4] sm:$0xf] %v1088_v45 }
  0x2e   : > { %1091 = vst [vmem:[%s1460_s29 + $0xb0] sm:$0xf] %v1090_v46  ;;  %1093 = vst [vmem:[%s1460_s29 + $0xbc] sm:$0xf] %v1092_v47  ;;  %v1094_v48 = vld [vmem:[%s1455_s28 + $0x188] sm:$0xf] }
  0x2f   : > { %v1096_v49 = vld [vmem:[%s1455_s28 + $0x1a0] sm:$0xf]  ;;  %v1098_v50 = vld [vmem:[%s1455_s28 + $0x1b8] sm:$0xf]  ;;  %1095 = vst [vmem:[%s1460_s29 + $0xc8] sm:$0xf] %v1094_v48 }
  0x30   : > { %1097 = vst [vmem:[%s1460_s29 + $0xd4] sm:$0xf] %v1096_v49  ;;  %1099 = vst [vmem:[%s1460_s29 + $0xe0] sm:$0xf] %v1098_v50  ;;  %v1100_v51 = vld [vmem:[%s1455_s28 + $0x1d0] sm:$0xf] }
  0x31   : > { %v1102_v52 = vld [vmem:[%s1455_s28 + $0x1e8] sm:$0xf]  ;;  %v1104_v53 = vld [vmem:[%s1455_s28 + $0x200] sm:$0xf]  ;;  %1101 = vst [vmem:[%s1460_s29 + $0xec] sm:$0xf] %v1100_v51 }
  0x32   : > { %1103 = vst [vmem:[%s1460_s29 + $0xf8] sm:$0xf] %v1102_v52  ;;  %1105 = vst [vmem:[%s1460_s29 + $0x104] sm:$0xf] %v1104_v53  ;;  %v1106_v54 = vld [vmem:[%s1455_s28 + $0x218] sm:$0xf] }
  0x33   : > { %v1108_v55 = vld [vmem:[%s1455_s28 + $0x230] sm:$0xf]  ;;  %v1110_v56 = vld [vmem:[%s1455_s28 + $0x248] sm:$0xf]  ;;  %1107 = vst [vmem:[%s1460_s29 + $0x110] sm:$0xf] %v1106_v54 }
  0x34   : > { %1109 = vst [vmem:[%s1460_s29 + $0x11c] sm:$0xf] %v1108_v55  ;;  %1111 = vst [vmem:[%s1460_s29 + $0x128] sm:$0xf] %v1110_v56  ;;  %v1112_v57 = vld [vmem:[%s1455_s28 + $0x260] sm:$0xf] }
  0x35   : > { %v1114_v58 = vld [vmem:[%s1455_s28 + $0x278] sm:$0xf]  ;;  %v1116_v59 = vld [vmem:[%s1455_s28 + $0x290] sm:$0xf]  ;;  %1113 = vst [vmem:[%s1460_s29 + $0x134] sm:$0xf] %v1112_v57 }
  0x36   : > { %1115 = vst [vmem:[%s1460_s29 + $0x140] sm:$0xf] %v1114_v58  ;;  %1117 = vst [vmem:[%s1460_s29 + $0x14c] sm:$0xf] %v1116_v59  ;;  %v1118_v60 = vld [vmem:[%s1455_s28 + $0x2a8] sm:$0xf] }
  0x37   : > { %v1120_v61 = vld [vmem:[%s1455_s28 + $0x2c0] sm:$0xf]  ;;  %v1122_v62 = vld [vmem:[%s1455_s28 + $0x2d8] sm:$0xf]  ;;  %1119 = vst [vmem:[%s1460_s29 + $0x158] sm:$0xf] %v1118_v60 }
  0x38   : > { %1121 = vst [vmem:[%s1460_s29 + $0x164] sm:$0xf] %v1120_v61  ;;  %1123 = vst [vmem:[%s1460_s29 + $0x170] sm:$0xf] %v1122_v62  ;;  %v1124_v63 = vld [vmem:[%s1455_s28 + $0x2f0] sm:$0xf] }
  0x39   : > { %1125 = vst [vmem:[%s1460_s29 + $0x17c] sm:$0xf] %v1124_v63 }
  0x3a PF: > { %p1126_p8 = scmp.ge.s32.totalorder %s1385_s16, 1  ;;  %p318_p9 = scmp.lt.s32.totalorder %s1385_s16, 3 }
  0x3c   : > { %p319_p10 = pnand %p1126_p8, %p318_p9 }
  0x3d   : > { %s325_s9 = sand.u32 (!%p319_p10), 1, %s1369_s12  }
  0x3e   : > { %322 = sbr.rel (%p319_p10) target bundleno = 461 (0x1cd), region = 54 }
  0x3f   : > { %s1233_s18 = smul.u32 (!%p319_p10), 384, %s325_s9 }
  0x40   : > { %s1234_s24 = smul.u32 (!%p319_p10), 48, %s325_s9 }
  0x41   : > { %s1636_s19 = scalar_lea.vmem (!%p319_p10), [#allocation2], %s1233_s18 }
  0x42   : > { %s1699_s25 = scalar_lea.vmem (!%p319_p10), [#allocation3], %s1234_s24 }
  0x43   : > { %v364_v0 = vld [vmem:[%s1738_s0] sm:$0xff]  ;;  %v366_v1 = vld [vmem:[%s1738_s0 + $0x10] sm:$0xff]  ;;  %v365_v2 = vld [vmem:[%s1738_s0 + $0x8] sm:$0xff]  ;;  %s1203_s12 = smul.u32 (%p1442_p6), 12, %s1377_s14 }
  0x44   : > { %v1599_v3 = vunpack.c.l.bf16 %v364_v0  ;;  %v1601_v4 = vunpack.c.h.bf16 %v364_v0  ;;  %v1603_v5 = vunpack.c.l.bf16 %v366_v1  ;;  %v1605_v6 = vunpack.c.h.bf16 %v366_v1  ;;  %v367_v7 = vld [vmem:[%s1738_s0 + $0x18] sm:$0xff]  ;;  %v1277_v23 = vld [vmem:[%s1636_s19 + $0xa8] ss:$12 sps:$4 sm:$0xff]   ;;  %v1284_v30 = vld [vmem:[%s1636_s19 + $0x64] ss:$12 sps:$4 sm:$0xff]  }
  0x45   : > { %v1612_v8 = vunpack.c.l.bf16 %v365_v2  ;;  %v1614_v9 = vunpack.c.h.bf16 %v365_v2  ;;  %v1616_v10 = vunpack.c.l.bf16 %v367_v7  ;;  %v1618_v11 = vunpack.c.h.bf16 %v367_v7  ;;  %v1275_v20 = vld [vmem:[%s1636_s19 + $0xac] ss:$12 sps:$4 sm:$0xff]   ;;  %v1278_v24 = vld [vmem:[%s1636_s19 + $0x94] ss:$12 sps:$4 sm:$0xff]   ;;  %v1280_v27 = vld [vmem:[%s1636_s19 + $0x90] ss:$12 sps:$4 sm:$0xff]   ;;  %s923_s21 = scalar_lea.vmem (%p1442_p6), %s1741_s3, %s1203_s12 }
  0x46   : > { %v376_v12 = vmul.f32 %v1599_v3, %v1599_v3  ;;  %v377_v13 = vmul.f32 %v1601_v4, %v1601_v4  ;;  %v380_v14 = vmul.f32 %v1603_v5, %v1603_v5  ;;  %v381_v15 = vmul.f32 %v1605_v6, %v1605_v6  ;;  %761 = vmatprep.subr.bf16.mxu0 %v1275_v20  ;;  %v1281_v28 = vld [vmem:[%s1636_s19 + $0x7c] ss:$12 sps:$4 sm:$0xff]   ;;  %v1283_v29 = vld [vmem:[%s1636_s19 + $0x78] ss:$12 sps:$4 sm:$0xff]   ;;  %v1286_v31 = vld [vmem:[%s1636_s19 + $0x60] ss:$12 sps:$4 sm:$0xff]  }
  0x47   : > { %v378_v16 = vmul.f32 %v1612_v8, %v1612_v8  ;;  %v379_v17 = vmul.f32 %v1614_v9, %v1614_v9  ;;  %v382_v18 = vmul.f32 %v1616_v10, %v1616_v10  ;;  %v383_v19 = vmul.f32 %v1618_v11, %v1618_v11  ;;  %762 = vmatpush1.bf16.msra.mxu0 %v1277_v23  ;;  %v1287_v32 = vld [vmem:[%s1636_s19 + $0x4c] ss:$12 sps:$4 sm:$0xff]   ;;  %v1301_v33 = vld [vmem:[%s1636_s19 + $0x170] ss:$12 sps:$4 sm:$0xff]   ;;  %v1289_v35 = vld [vmem:[%s1636_s19 + $0x48] ss:$12 sps:$4 sm:$0xff]  }
  0x48   : > { %v384_v21 = vadd.f32 %v377_v13, %v376_v12  ;;  %v390_v22 = vadd.f32 %v381_v15, %v380_v14  ;;  %763 = vmatprep.subr.bf16.mxu0 %v1278_v24  ;;  %v1303_v34 = vld [vmem:[%s1636_s19 + $0xb0] ss:$12 sps:$4 sm:$0xff]   ;;  %1204 = vmatprep.subr.bf16.mxu1 %v1301_v33  ;;  %v1306_v36 = vld [vmem:[%s1636_s19 + $0x158] ss:$12 sps:$4 sm:$0xff]   ;;  %v1290_v37 = vld [vmem:[%s1636_s19 + $0x34] ss:$12 sps:$4 sm:$0xff]  }
  0x49   : > { %v387_v25 = vadd.f32 %v379_v17, %v378_v16  ;;  %v393_v26 = vadd.f32 %v383_v19, %v382_v18  ;;  %1205 = vmatpush3.bf16.msra.mxu1 %v1303_v34  ;;  %v1308_v38 = vld [vmem:[%s1636_s19 + $0x98] ss:$12 sps:$4 sm:$0xff]   ;;  %v1292_v39 = vld [vmem:[%s1636_s19 + $0x30] ss:$12 sps:$4 sm:$0xff]   ;;  %v1311_v40 = vld [vmem:[%s1636_s19 + $0x140] ss:$12 sps:$4 sm:$0xff]  }
  0x4a   : > { %385 = vadd.xlane.f32.xlu0 %v384_v21  ;;  %391 = vadd.xlane.f32.xlu1 %v390_v22  ;;  %v1313_v41 = vld [vmem:[%s1636_s19 + $0x80] ss:$12 sps:$4 sm:$0xff]   ;;  %v1293_v42 = vld [vmem:[%s1636_s19 + $0x1c] ss:$12 sps:$4 sm:$0xff]   ;;  %v1295_v43 = vld [vmem:[%s1636_s19 + $0x18] ss:$12 sps:$4 sm:$0xff]  }
  0x4b   : > { %764 = vmatpush1.bf16.msra.mxu0 %v1280_v27  ;;  %1206 = vmatprep.subr.bf16.mxu1 %v1306_v36  ;;  %v1316_v44 = vld [vmem:[%s1636_s19 + $0x128] ss:$12 sps:$4 sm:$0xff]   ;;  %v1296_v46 = vld [vmem:[%s1636_s19 + $0x4] ss:$12 sps:$4 sm:$0xff]   ;;  %v1298_v49 = vld [vmem:[%s1636_s19] ss:$12 sps:$4 sm:$0xff]  }
  0x4c   : > { %765 = vmatprep.subr.bf16.mxu0 %v1281_v28  ;;  %v1318_v45 = vld [vmem:[%s1636_s19 + $0x68] ss:$12 sps:$4 sm:$0xff]   ;;  %v1321_v47 = vld [vmem:[%s1636_s19 + $0x110] ss:$12 sps:$4 sm:$0xff]   ;;  %v1299_v50 = vld [vmem:[%s1636_s19 + $0x16c] ss:$12 sps:$4 sm:$0xff]   ;;  %v419_v28 = vlaneseq }
  0x4d   : > { %1207 = vmatpush3.bf16.msra.mxu1 %v1308_v38  ;;  %v1323_v48 = vld [vmem:[%s1636_s19 + $0x50] ss:$12 sps:$4 sm:$0xff]   ;;  %v1326_v51 = vld [vmem:[%s1636_s19 + $0xf8] ss:$12 sps:$4 sm:$0xff]   ;;  %v1302_v53 = vld [vmem:[%s1636_s19 + $0x168] ss:$12 sps:$4 sm:$0xff]  }
  0x4e   : > { %388 = vadd.xlane.f32.xlu0 %v387_v25  ;;  %394 = vadd.xlane.f32.xlu1 %v393_v26  ;;  %v1328_v52 = vld [vmem:[%s1636_s19 + $0x38] ss:$12 sps:$4 sm:$0xff]   ;;  %v1331_v54 = vld [vmem:[%s1636_s19 + $0xe0] ss:$12 sps:$4 sm:$0xff]   ;;  %v1307_v56 = vld [vmem:[%s1636_s19 + $0x150] ss:$12 sps:$4 sm:$0xff]  }
  0x4f   : > { %766 = vmatpush1.bf16.msra.mxu0 %v1283_v29  ;;  %1208 = vmatprep.subr.bf16.mxu1 %v1311_v40  ;;  %v1304_v55 = vld [vmem:[%s1636_s19 + $0x154] ss:$12 sps:$4 sm:$0xff]   ;;  %v1309_v59 = vld [vmem:[%s1636_s19 + $0x13c] ss:$12 sps:$4 sm:$0xff]   ;;  %v1312_v61 = vld [vmem:[%s1636_s19 + $0x138] ss:$12 sps:$4 sm:$0xff]  }
  0x50   : > { %767 = vmatprep.subr.bf16.mxu0 %v1284_v30  ;;  %v1333_v57 = vld [vmem:[%s1636_s19 + $0x20] ss:$12 sps:$4 sm:$0xff]   ;;  %v1336_v58 = vld [vmem:[%s1636_s19 + $0xc8] ss:$12 sps:$4 sm:$0xff]   ;;  %v1314_v62 = vld [vmem:[%s1636_s19 + $0x124] ss:$12 sps:$4 sm:$0xff]  }
  0x51   : > { %1209 = vmatpush3.bf16.msra.mxu1 %v1313_v41  ;;  %v1338_v60 = vld [vmem:[%s1636_s19 + $0x8] ss:$12 sps:$4 sm:$0xff]   ;;  %v1317_v63 = vld [vmem:[%s1636_s19 + $0x120] ss:$12 sps:$4 sm:$0xff]   ;;  %v1327_v7 = vld [vmem:[%s1636_s19 + $0xf0] ss:$12 sps:$4 sm:$0xff]  }
  0x52   : > { %1210 = vmatprep.subr.bf16.mxu1 %v1316_v44  ;;  %v1319_v0 = vld [vmem:[%s1636_s19 + $0x10c] ss:$12 sps:$4 sm:$0xff]   ;;  %v1322_v1 = vld [vmem:[%s1636_s19 + $0x108] ss:$12 sps:$4 sm:$0xff]   ;;  %v1334_v14 = vld [vmem:[%s1636_s19 + $0xc4] ss:$12 sps:$4 sm:$0xff]  }
  0x53   : > { %768 = vmatpush1.bf16.msra.mxu0 %v1286_v31  ;;  %v1324_v2 = vld [vmem:[%s1636_s19 + $0xf4] ss:$12 sps:$4 sm:$0xff]   ;;  %v1329_v12 = vld [vmem:[%s1636_s19 + $0xdc] ss:$12 sps:$4 sm:$0xff]   ;;  %v1332_v13 = vld [vmem:[%s1636_s19 + $0xd8] ss:$12 sps:$4 sm:$0xff]  }
  0x54   : > { %769 = vmatprep.subr.bf16.mxu0 %v1287_v32  ;;  %v1337_v15 = vld [vmem:[%s1636_s19 + $0xc0] ss:$12 sps:$4 sm:$0xff]   ;;  %v420_v29 = vshrl.u32 %v419_v28, 7 }
  0x55   : > { %1211 = vmatpush3.bf16.msra.mxu1 %v1318_v45  ;;  %v417_v33 = vld [vmem:[%s1739_s1] sm:$0x3] }
  0x56   : > { %1212 = vmatprep.subr.bf16.mxu1 %v1321_v47  ;;  %v421_v30 = vsub.s32 0, %v420_v29  ;;  %v425_v31 = vsub.s32 1, %v420_v29 }
  0x57   : > { %770 = vmatpush1.bf16.msra.mxu0 %v1289_v35 }
  0x58   : > { %771 = vmatprep.subr.bf16.mxu0 %v1290_v37  ;;  %v422_v37 = vrot.slane %v417_v33, %v421_v30  ;;  %v426_v38 = vrot.slane %v417_v33, %v425_v31 }
  0x59   : > { %1213 = vmatpush3.bf16.msra.mxu1 %v1323_v48 }
  0x5a   : > { %1214 = vmatprep.subr.bf16.mxu1 %v1326_v51 }
  0x5b   : > { %772 = vmatpush1.bf16.msra.mxu0 %v1292_v39 }
  0x5c   : > { %773 = vmatprep.subr.bf16.mxu0 %v1293_v42 }
  0x5d   : > { %1215 = vmatpush3.bf16.msra.mxu1 %v1328_v52 }
  0x5e   : > { %1216 = vmatprep.subr.bf16.mxu1 %v1331_v54 }
  0x5f   : > { %774 = vmatpush1.bf16.msra.mxu0 %v1295_v43 }
  0x60   : > { %775 = vmatprep.subr.bf16.mxu0 %v1296_v46 }
  0x61   : > { %1217 = vmatpush3.bf16.msra.mxu1 %v1333_v57 }
  0x62   : > { %1218 = vmatprep.subr.bf16.mxu1 %v1336_v58 }
  0x63   : > { %776 = vmatpush1.bf16.msra.mxu0 %v1298_v49 }
  0x64   : > { %777 = vmatprep.subr.bf16.mxu0 %v1299_v50 }
  0x65   : > { %1219 = vmatpush3.bf16.msra.mxu1 %v1338_v60 }
  0x67   : > { %778 = vmatpush2.bf16.msra.mxu0 %v1302_v53 }
  0x68   : > { %779 = vmatprep.subr.bf16.mxu0 %v1304_v55 }
  0x6b   : > { %780 = vmatpush2.bf16.msra.mxu0 %v1307_v56 }
  0x6c   : > { %781 = vmatprep.subr.bf16.mxu0 %v1309_v59 }
  0x6f   : > { %782 = vmatpush2.bf16.msra.mxu0 %v1312_v61 }
  0x70   : > { %783 = vmatprep.subr.bf16.mxu0 %v1314_v62 }
  0x73   : > { %784 = vmatpush2.bf16.msra.mxu0 %v1317_v63 }
  0x74   : > { %785 = vmatprep.subr.bf16.mxu0 %v1319_v0 }
  0x77   : > { %786 = vmatpush2.bf16.msra.mxu0 %v1322_v1 }
  0x78   : > { %787 = vmatprep.subr.bf16.mxu0 %v1324_v2 }
  0x7b   : > { %788 = vmatpush2.bf16.msra.mxu0 %v1327_v7 }
  0x7c   : > { %789 = vmatprep.subr.bf16.mxu0 %v1329_v12 }
  0x7f   : > { %790 = vmatpush2.bf16.msra.mxu0 %v1332_v13 }
  0x80   : > { %791 = vmatprep.subr.bf16.mxu0 %v1334_v14 }
  0x83   : > { %792 = vmatpush2.bf16.msra.mxu0 %v1337_v15 }
  0xd3   : > { %v386_v16 = vpop.xlane.xlu0 %385  ;;  %v392_v17 = vpop.xlane.xlu1 %391 }
  0xd4   : > { %v397_v18 = vmul.f32 0.00390625, %v386_v16  ;;  %v399_v19 = vmul.f32 0.00390625, %v392_v17 }
  0xd6   : > { %v401_v20 = vadd.f32 1e-05, %v397_v18  ;;  %v403_v21 = vadd.f32 1e-05, %v399_v19 }
  0xd7   : > { %v389_v22 = vpop.xlane.xlu0 %388  ;;  %v395_v23 = vpop.xlane.xlu1 %394 }
  0xd8   : > { %1339 = vrsqrt.f32 %v401_v20  ;;  %v398_v24 = vmul.f32 0.00390625, %v389_v22  ;;  %v400_v25 = vmul.f32 0.00390625, %v395_v23 }
  0xd9   : > { %1341 = vrsqrt.f32 %v403_v21 }
  0xda   : > { %v402_v26 = vadd.f32 1e-05, %v398_v24  ;;  %v404_v27 = vadd.f32 1e-05, %v400_v25 }
  0xdc   : > { %1343 = vrsqrt.f32 %v402_v26 }
  0xdd   : > { %1345 = vrsqrt.f32 %v404_v27 }
  0xe5   : > { %v1340_v32 = vpop.eup %1339 }
  0xe6   : > { %v1342_v34 = vpop.eup %1341  ;;  %v410_v36 = vmul.f32 %v1340_v32, %v1601_v4  ;;  %v409_v39 = vmul.f32 %v1340_v32, %v1599_v3 }
  0xe7   : > { %v414_v35 = vmul.f32 %v1342_v34, %v1605_v6  ;;  %v413_v3 = vmul.f32 %v1342_v34, %v1603_v5 }
  0xe8   : > { %v430_v46 = vmul.f32 %v426_v38, %v410_v36  ;;  %v429_v48 = vmul.f32 %v422_v37, %v409_v39 }
  0xe9   : > { %v1344_v40 = vpop.eup %1343  ;;  %v434_v45 = vmul.f32 %v426_v38, %v414_v35 }
  0xea   : > { %v1346_v41 = vpop.eup %1345  ;;  %v412_v42 = vmul.f32 %v1344_v40, %v1614_v9  ;;  %v411_v43 = vmul.f32 %v1344_v40, %v1612_v8  ;;  %v433_v8 = vmul.f32 %v422_v37, %v413_v3 }
  0xeb   : > { %v416_v44 = vmul.f32 %v1346_v41, %v1618_v11  ;;  %v415_v52 = vmul.f32 %v1346_v41, %v1616_v10 }
  0xec   : > { %v432_v47 = vmul.f32 %v426_v38, %v412_v42  ;;  %v431_v49 = vmul.f32 %v422_v37, %v411_v43 }
  0xed   : > { %v436_v6 = vmul.f32 %v426_v38, %v416_v44  ;;  %v435_v9 = vmul.f32 %v422_v37, %v415_v52 }
  0xee   : > { %v438_v50 = vpack.c.bf16 %v432_v47, %v430_v46  ;;  %v437_v4 = vpack.c.bf16 %v431_v49, %v429_v48 }
  0xef   : > { %v440_v51 = vpack.c.bf16 %v436_v6, %v434_v45  ;;  %v439_v11 = vpack.c.bf16 %v435_v9, %v433_v8 }
  0xf0   : > { %793 = vmatprep.mubr.bf16.mxu0 %v438_v50  ;;  %846 = vmatprep.mubr.bf16.mxu1 %v438_v50 }
  0xf1   : > { %794 = vmatmul.mubr.bf16.vlgmr.msra.gmra.mxu0 %v437_v4  ;;  %847 = vmatmul.mubr.bf16.vlgmr.msra.gmra.mxu1 %v437_v4 }
  0xf2   : > { %803 = vmatprep.mubr.bf16.mxu0 %v440_v51  ;;  %854 = vmatprep.mubr.bf16.mxu1 %v440_v51 }
  0xf9   : > { %804 = vmatmul.mubr.bf16.gmra.mxu0 %v439_v11  ;;  %855 = vmatmul.mubr.bf16.gmra.mxu1 %v439_v11 }
 0x1b1   : > { %v795_v53 = vpop.f32.mrf.mxu0  ;;  %v1220_v54 = vpop.f32.mrf.mxu1 }
 0x1b3   : > { %v797_v55 = vpop.f32.mrf.mxu0  ;;  %v1221_v56 = vpop.f32.mrf.mxu1 }
 0x1b4   : > { %v1195_v5 = vpack.c.bf16 %v797_v55, %v795_v53  ;;  %v1222_v57 = vadd.f32 %v1221_v56, %v1220_v54 }
 0x1b5   : > { %v799_v10 = vpop.f32.mrf.mxu0  ;;  %v1223_v58 = vpop.f32.mrf.mxu1 }
 0x1b6   : > { %903 = vst [vmem:[%s1699_s25] sm:$0xff] %v1195_v5  ;;  %v1196_v59 = vpack.c.bf16 %v1222_v57, %v1222_v57 }
 0x1b7   : > { %v801_v60 = vpop.f32.mrf.mxu0  ;;  %v1224_v61 = vpop.f32.mrf.mxu1 }
 0x1b8   : > { %904 = vst [vmem:[%s1699_s25 + $0x8] sm:$0xf] %v1196_v59  ;;  %v1197_v62 = vpack.c.bf16 %v801_v60, %v799_v10  ;;  %v1225_v63 = vadd.f32 %v1224_v61, %v1223_v58 }
 0x1b9   : > { %v805_v0 = vpop.f32.mrf.mxu0  ;;  %v1226_v1 = vpop.f32.mrf.mxu1 }
 0x1ba   : > { %905 = vst [vmem:[%s1699_s25 + $0xc] sm:$0xff] %v1197_v62  ;;  %v1198_v2 = vpack.c.bf16 %v1225_v63, %v1225_v63 }
 0x1bb   : > { %v807_v7 = vpop.f32.mrf.mxu0  ;;  %v1227_v12 = vpop.f32.mrf.mxu1 }
 0x1bc   : > { %906 = vst [vmem:[%s1699_s25 + $0x14] sm:$0xf] %v1198_v2  ;;  %v1199_v13 = vpack.c.bf16 %v807_v7, %v805_v0  ;;  %v1228_v14 = vadd.f32 %v1227_v12, %v1226_v1 }
 0x1bd   : > { %v809_v15 = vpop.f32.mrf.mxu0  ;;  %v1229_v16 = vpop.f32.mrf.mxu1  ;;  %v938_v23 = vld [vmem:[%s1699_s25] sm:$0xff] (%p1442_p6) }
 0x1be   : > { %907 = vst [vmem:[%s1699_s25 + $0x18] sm:$0xff] %v1199_v13  ;;  %v1200_v17 = vpack.c.bf16 %v1228_v14, %v1228_v14  ;;  %939 = vst [vmem:[%s923_s21] sm:$0xff] (%p1442_p6), %v938_v23 }
 0x1bf   : > { %v811_v18 = vpop.f32.mrf.mxu0  ;;  %v1230_v19 = vpop.f32.mrf.mxu1  ;;  %v1184_v27 = vld [vmem:[%s1699_s25 + $0x8] sm:$0xf] (%p1442_p6) }
 0x1c0   : > { %908 = vst [vmem:[%s1699_s25 + $0x20] sm:$0xf] %v1200_v17  ;;  %v1201_v20 = vpack.c.bf16 %v811_v18, %v809_v15  ;;  %v1231_v21 = vadd.f32 %v1230_v19, %v1229_v16  ;;  %917 = sbr.rel (!%p1442_p6) target bundleno = 461 (0x1cd), region = 62  ;;  %1185 = vst [vmem:[%s923_s21 + $0x8] sm:$0xf] (%p1442_p6), %v1184_v27 }
 0x1c1   : > { %v940_v24 = vld [vmem:[%s1699_s25 + $0xc] sm:$0xff] (%p1442_p6) }
 0x1c2   : > { %909 = vst [vmem:[%s1699_s25 + $0x24] sm:$0xff] %v1201_v20  ;;  %v1202_v22 = vpack.c.bf16 %v1231_v21, %v1231_v21  ;;  %941 = vst [vmem:[%s923_s21 + $0x18] sm:$0xff] (%p1442_p6), %v940_v24 }
 0x1c3   : > { %v1186_v28 = vld [vmem:[%s1699_s25 + $0x14] sm:$0xf] (%p1442_p6) }
 0x1c4   : > { %910 = vst [vmem:[%s1699_s25 + $0x2c] sm:$0xf] %v1202_v22  ;;  %1187 = vst [vmem:[%s923_s21 + $0x20] sm:$0xf] (%p1442_p6), %v1186_v28 }
 0x1c5   : > { %v942_v25 = vld [vmem:[%s1699_s25 + $0x18] sm:$0xff] }
 0x1c6   : > { %943 = vst [vmem:[%s923_s21 + $0x30] sm:$0xff] %v942_v25 }
 0x1c7   : > { %v1188_v29 = vld [vmem:[%s1699_s25 + $0x20] sm:$0xf] }
 0x1c8   : > { %1189 = vst [vmem:[%s923_s21 + $0x38] sm:$0xf] %v1188_v29 }
 0x1c9   : > { %v944_v26 = vld [vmem:[%s1699_s25 + $0x24] sm:$0xff] }
 0x1ca   : > { %945 = vst [vmem:[%s923_s21 + $0x48] sm:$0xff] %v944_v26 }
 0x1cb   : > { %v1190_v30 = vld [vmem:[%s1699_s25 + $0x2c] sm:$0xf] }
 0x1cc   : > { %1191 = vst [vmem:[%s923_s21 + $0x50] sm:$0xf] %v1190_v30 }
 0x1cd PF: > { %s13_s16 = sadd.s32 1, %s1385_s16   ;;  %s1743_s12 = smov %s1373_s13 }
 0x1ce   : > { %p10_p11 = scmp.ge.s32.totalorder %s13_s16, 4   ;;  %s1744_s13 = smov %s1447_s22 }
 0x1cf   : > { %s1745_s14 = smov %s1381_s15  ;;  %s1746_s15 = smov %s1748_s17 }
 0x1d0   :  { %12 = sbr.rel (!%p10_p11) target bundleno = 3 (0x3), region = 134 }

// kernel: llama2_forward.17
= control target key start
LH: loop header
LB: loop body
LE: loop exit
PB: predicated region body
PF: predicated region fallthrough
CT: control target
= control target key end

     0   :  { %s1136_s0 = inlined_call_operand.vmem [shape: bf16[32,256], index: 0, kind: input, shape index: {}]   ;;  %s1137_s1 = inlined_call_operand.vmem [shape: f32[1,256], index: 1, kind: input, shape index: {}]   ;;  %s1138_s2 = inlined_call_operand.vmem [shape: bf16[256,512], index: 2, kind: input, shape index: {}]   ;;  %s1139_s3 = inlined_call_operand.hbm [shape: bf16[32,512], index: 3, kind: output, shape index: {}]  }
   0x1   :  { %v15_v0 = vld [vmem:[%s1136_s0] sm:$0xff]  ;;  %v17_v1 = vld [vmem:[%s1136_s0 + $0x10] sm:$0xff]  ;;  %v16_v2 = vld [vmem:[%s1136_s0 + $0x8] sm:$0xff] }
   0x2   :  { %v895_v3 = vunpack.c.l.bf16 %v15_v0  ;;  %v897_v4 = vunpack.c.h.bf16 %v15_v0  ;;  %v899_v5 = vunpack.c.l.bf16 %v17_v1  ;;  %v901_v6 = vunpack.c.h.bf16 %v17_v1  ;;  %v18_v7 = vld [vmem:[%s1136_s0 + $0x18] sm:$0xff]  ;;  %v737_v12 = vld [vmem:[%s1138_s2 + $0xe4] ss:$16 sps:$4 sm:$0xff]   ;;  %v741_v18 = vld [vmem:[%s1138_s2 + $0xe0] ss:$16 sps:$4 sm:$0xff]  }
   0x3   :  { %v906_v8 = vunpack.c.l.bf16 %v16_v2  ;;  %v908_v9 = vunpack.c.h.bf16 %v16_v2  ;;  %v910_v10 = vunpack.c.l.bf16 %v18_v7  ;;  %v912_v11 = vunpack.c.h.bf16 %v18_v7  ;;  %v739_v17 = vld [vmem:[%s1138_s2 + $0xec] ss:$16 sps:$4 sm:$0xff]   ;;  %v742_v19 = vld [vmem:[%s1138_s2 + $0xe8] ss:$16 sps:$4 sm:$0xff]   ;;  %476 = vmatprep.subr.bf16.mxu0 %v737_v12  ;;  %v743_v24 = vld [vmem:[%s1138_s2 + $0xc4] ss:$16 sps:$4 sm:$0xff]  }
   0x4   :  { %v27_v13 = vmul.f32 %v895_v3, %v895_v3  ;;  %v28_v14 = vmul.f32 %v897_v4, %v897_v4  ;;  %v31_v15 = vmul.f32 %v899_v5, %v899_v5  ;;  %v32_v16 = vmul.f32 %v901_v6, %v901_v6  ;;  %529 = vmatprep.subr.bf16.mxu1 %v739_v17  ;;  %v745_v27 = vld [vmem:[%s1138_s2 + $0xcc] ss:$16 sps:$4 sm:$0xff]   ;;  %v747_v28 = vld [vmem:[%s1138_s2 + $0xc0] ss:$16 sps:$4 sm:$0xff]   ;;  %v748_v29 = vld [vmem:[%s1138_s2 + $0xc8] ss:$16 sps:$4 sm:$0xff]  }
   0x5   :  { %v29_v20 = vmul.f32 %v906_v8, %v906_v8  ;;  %v30_v21 = vmul.f32 %v908_v9, %v908_v9  ;;  %v33_v22 = vmul.f32 %v910_v10, %v910_v10  ;;  %v34_v23 = vmul.f32 %v912_v11, %v912_v11  ;;  %477 = vmatpush1.bf16.msra.mxu0 %v741_v18  ;;  %v749_v32 = vld [vmem:[%s1138_s2 + $0xa4] ss:$16 sps:$4 sm:$0xff]   ;;  %v751_v33 = vld [vmem:[%s1138_s2 + $0xac] ss:$16 sps:$4 sm:$0xff]   ;;  %v753_v34 = vld [vmem:[%s1138_s2 + $0xa0] ss:$16 sps:$4 sm:$0xff]  }
   0x6   :  { %v35_v25 = vadd.f32 %v28_v14, %v27_v13  ;;  %v41_v26 = vadd.f32 %v32_v16, %v31_v15  ;;  %530 = vmatpush1.bf16.msra.mxu1 %v742_v19  ;;  %478 = vmatprep.subr.bf16.mxu0 %v743_v24  ;;  %v754_v35 = vld [vmem:[%s1138_s2 + $0xa8] ss:$16 sps:$4 sm:$0xff]   ;;  %v755_v36 = vld [vmem:[%s1138_s2 + $0x84] ss:$16 sps:$4 sm:$0xff]   ;;  %v757_v37 = vld [vmem:[%s1138_s2 + $0x8c] ss:$16 sps:$4 sm:$0xff]  }
   0x7   :  { %v38_v30 = vadd.f32 %v30_v21, %v29_v20  ;;  %v44_v31 = vadd.f32 %v34_v23, %v33_v22  ;;  %531 = vmatprep.subr.bf16.mxu1 %v745_v27  ;;  %v759_v38 = vld [vmem:[%s1138_s2 + $0x80] ss:$16 sps:$4 sm:$0xff]   ;;  %v760_v39 = vld [vmem:[%s1138_s2 + $0x88] ss:$16 sps:$4 sm:$0xff]   ;;  %v761_v40 = vld [vmem:[%s1138_s2 + $0x64] ss:$16 sps:$4 sm:$0xff]  }
   0x8   :  { %36 = vadd.xlane.f32.xlu0 %v35_v25  ;;  %42 = vadd.xlane.f32.xlu1 %v41_v26  ;;  %v763_v41 = vld [vmem:[%s1138_s2 + $0x6c] ss:$16 sps:$4 sm:$0xff]   ;;  %v765_v42 = vld [vmem:[%s1138_s2 + $0x60] ss:$16 sps:$4 sm:$0xff]   ;;  %v766_v43 = vld [vmem:[%s1138_s2 + $0x68] ss:$16 sps:$4 sm:$0xff]  }
   0x9   :  { %479 = vmatpush1.bf16.msra.mxu0 %v747_v28  ;;  %v767_v44 = vld [vmem:[%s1138_s2 + $0x44] ss:$16 sps:$4 sm:$0xff]   ;;  %v769_v45 = vld [vmem:[%s1138_s2 + $0x4c] ss:$16 sps:$4 sm:$0xff]   ;;  %v771_v46 = vld [vmem:[%s1138_s2 + $0x40] ss:$16 sps:$4 sm:$0xff]  }
   0xa   :  { %532 = vmatpush1.bf16.msra.mxu1 %v748_v29  ;;  %480 = vmatprep.subr.bf16.mxu0 %v749_v32  ;;  %v772_v47 = vld [vmem:[%s1138_s2 + $0x48] ss:$16 sps:$4 sm:$0xff]   ;;  %v773_v48 = vld [vmem:[%s1138_s2 + $0x24] ss:$16 sps:$4 sm:$0xff]   ;;  %v775_v49 = vld [vmem:[%s1138_s2 + $0x2c] ss:$16 sps:$4 sm:$0xff]  }
   0xb   :  { %533 = vmatprep.subr.bf16.mxu1 %v751_v33  ;;  %v777_v50 = vld [vmem:[%s1138_s2 + $0x20] ss:$16 sps:$4 sm:$0xff]   ;;  %v778_v51 = vld [vmem:[%s1138_s2 + $0x28] ss:$16 sps:$4 sm:$0xff]   ;;  %v779_v52 = vld [vmem:[%s1138_s2 + $0x4] ss:$16 sps:$4 sm:$0xff]  }
   0xc   :  { %39 = vadd.xlane.f32.xlu0 %v38_v30  ;;  %45 = vadd.xlane.f32.xlu1 %v44_v31  ;;  %v781_v53 = vld [vmem:[%s1138_s2 + $0xc] ss:$16 sps:$4 sm:$0xff]   ;;  %v783_v54 = vld [vmem:[%s1138_s2] ss:$16 sps:$4 sm:$0xff]   ;;  %v784_v55 = vld [vmem:[%s1138_s2 + $0x8] ss:$16 sps:$4 sm:$0xff]  }
   0xd   :  { %481 = vmatpush1.bf16.msra.mxu0 %v753_v34  ;;  %v785_v56 = vld [vmem:[%s1138_s2 + $0x1e4] ss:$16 sps:$4 sm:$0xff]   ;;  %v787_v57 = vld [vmem:[%s1138_s2 + $0x1ec] ss:$16 sps:$4 sm:$0xff]   ;;  %v789_v58 = vld [vmem:[%s1138_s2 + $0x1e0] ss:$16 sps:$4 sm:$0xff]  }
   0xe   :  { %534 = vmatpush1.bf16.msra.mxu1 %v754_v35  ;;  %482 = vmatprep.subr.bf16.mxu0 %v755_v36  ;;  %v790_v59 = vld [vmem:[%s1138_s2 + $0x1e8] ss:$16 sps:$4 sm:$0xff]   ;;  %v791_v60 = vld [vmem:[%s1138_s2 + $0x1c4] ss:$16 sps:$4 sm:$0xff]   ;;  %v793_v61 = vld [vmem:[%s1138_s2 + $0x1cc] ss:$16 sps:$4 sm:$0xff]  }
   0xf   :  { %535 = vmatprep.subr.bf16.mxu1 %v757_v37  ;;  %v795_v62 = vld [vmem:[%s1138_s2 + $0x1c0] ss:$16 sps:$4 sm:$0xff]   ;;  %v796_v63 = vld [vmem:[%s1138_s2 + $0x1c8] ss:$16 sps:$4 sm:$0xff]   ;;  %v797_v0 = vld [vmem:[%s1138_s2 + $0x1a4] ss:$16 sps:$4 sm:$0xff]  }
  0x10   :  { %v799_v1 = vld [vmem:[%s1138_s2 + $0x1ac] ss:$16 sps:$4 sm:$0xff]   ;;  %v801_v2 = vld [vmem:[%s1138_s2 + $0x1a0] ss:$16 sps:$4 sm:$0xff]   ;;  %v802_v7 = vld [vmem:[%s1138_s2 + $0x1a8] ss:$16 sps:$4 sm:$0xff]  }
  0x11   :  { %483 = vmatpush1.bf16.msra.mxu0 %v759_v38  ;;  %v803_v12 = vld [vmem:[%s1138_s2 + $0x184] ss:$16 sps:$4 sm:$0xff]   ;;  %v805_v13 = vld [vmem:[%s1138_s2 + $0x18c] ss:$16 sps:$4 sm:$0xff]  }
  0x12   :  { %536 = vmatpush1.bf16.msra.mxu1 %v760_v39  ;;  %484 = vmatprep.subr.bf16.mxu0 %v761_v40 }
  0x13   :  { %537 = vmatprep.subr.bf16.mxu1 %v763_v41 }
  0x15   :  { %485 = vmatpush1.bf16.msra.mxu0 %v765_v42 }
  0x16   :  { %538 = vmatpush1.bf16.msra.mxu1 %v766_v43  ;;  %486 = vmatprep.subr.bf16.mxu0 %v767_v44 }
  0x17   :  { %539 = vmatprep.subr.bf16.mxu1 %v769_v45 }
  0x19   :  { %487 = vmatpush1.bf16.msra.mxu0 %v771_v46 }
  0x1a   :  { %540 = vmatpush1.bf16.msra.mxu1 %v772_v47  ;;  %488 = vmatprep.subr.bf16.mxu0 %v773_v48 }
  0x1b   :  { %541 = vmatprep.subr.bf16.mxu1 %v775_v49 }
  0x1d   :  { %489 = vmatpush1.bf16.msra.mxu0 %v777_v50 }
  0x1e   :  { %542 = vmatpush1.bf16.msra.mxu1 %v778_v51  ;;  %490 = vmatprep.subr.bf16.mxu0 %v779_v52 }
  0x1f   :  { %543 = vmatprep.subr.bf16.mxu1 %v781_v53 }
  0x21   :  { %491 = vmatpush1.bf16.msra.mxu0 %v783_v54 }
  0x22   :  { %544 = vmatpush1.bf16.msra.mxu1 %v784_v55  ;;  %492 = vmatprep.subr.bf16.mxu0 %v785_v56 }
  0x23   :  { %545 = vmatprep.subr.bf16.mxu1 %v787_v57 }
  0x25   :  { %493 = vmatpush2.bf16.msra.mxu0 %v789_v58 }
  0x26   :  { %546 = vmatpush2.bf16.msra.mxu1 %v790_v59  ;;  %494 = vmatprep.subr.bf16.mxu0 %v791_v60 }
  0x27   :  { %547 = vmatprep.subr.bf16.mxu1 %v793_v61 }
  0x29   :  { %495 = vmatpush2.bf16.msra.mxu0 %v795_v62 }
  0x2a   :  { %548 = vmatpush2.bf16.msra.mxu1 %v796_v63  ;;  %496 = vmatprep.subr.bf16.mxu0 %v797_v0 }
  0x2b   :  { %549 = vmatprep.subr.bf16.mxu1 %v799_v1 }
  0x2c   :  { %8 = vsyncpa [#allocation3], 0  ;;  %v807_v14 = vld [vmem:[%s1138_s2 + $0x180] ss:$16 sps:$4 sm:$0xff]   ;;  %v808_v15 = vld [vmem:[%s1138_s2 + $0x188] ss:$16 sps:$4 sm:$0xff]   ;;  %v70_v44 = vlaneseq }
  0x2d   :  { %497 = vmatpush2.bf16.msra.mxu0 %v801_v2  ;;  %v809_v16 = vld [vmem:[%s1138_s2 + $0x164] ss:$16 sps:$4 sm:$0xff]   ;;  %v811_v17 = vld [vmem:[%s1138_s2 + $0x16c] ss:$16 sps:$4 sm:$0xff]   ;;  %v813_v18 = vld [vmem:[%s1138_s2 + $0x160] ss:$16 sps:$4 sm:$0xff]  }
  0x2e   :  { %550 = vmatpush2.bf16.msra.mxu1 %v802_v7  ;;  %498 = vmatprep.subr.bf16.mxu0 %v803_v12  ;;  %v814_v19 = vld [vmem:[%s1138_s2 + $0x168] ss:$16 sps:$4 sm:$0xff]   ;;  %v815_v20 = vld [vmem:[%s1138_s2 + $0x144] ss:$16 sps:$4 sm:$0xff]   ;;  %v817_v21 = vld [vmem:[%s1138_s2 + $0x14c] ss:$16 sps:$4 sm:$0xff]  }
  0x2f   :  { %551 = vmatprep.subr.bf16.mxu1 %v805_v13  ;;  %v819_v22 = vld [vmem:[%s1138_s2 + $0x140] ss:$16 sps:$4 sm:$0xff]   ;;  %v820_v23 = vld [vmem:[%s1138_s2 + $0x148] ss:$16 sps:$4 sm:$0xff]   ;;  %v821_v24 = vld [vmem:[%s1138_s2 + $0x124] ss:$16 sps:$4 sm:$0xff]  }
  0x30   :  { %v823_v25 = vld [vmem:[%s1138_s2 + $0x12c] ss:$16 sps:$4 sm:$0xff]   ;;  %v825_v26 = vld [vmem:[%s1138_s2 + $0x120] ss:$16 sps:$4 sm:$0xff]   ;;  %v826_v27 = vld [vmem:[%s1138_s2 + $0x128] ss:$16 sps:$4 sm:$0xff]  }
  0x31   :  { %499 = vmatpush2.bf16.msra.mxu0 %v807_v14  ;;  %v827_v28 = vld [vmem:[%s1138_s2 + $0x104] ss:$16 sps:$4 sm:$0xff]   ;;  %v829_v29 = vld [vmem:[%s1138_s2 + $0x10c] ss:$16 sps:$4 sm:$0xff]   ;;  %v831_v30 = vld [vmem:[%s1138_s2 + $0x100] ss:$16 sps:$4 sm:$0xff]  }
  0x32   :  { %552 = vmatpush2.bf16.msra.mxu1 %v808_v15  ;;  %500 = vmatprep.subr.bf16.mxu0 %v809_v16  ;;  %v832_v31 = vld [vmem:[%s1138_s2 + $0x108] ss:$16 sps:$4 sm:$0xff]   ;;  %v71_v45 = vshrl.u32 %v70_v44, 7  ;;  %v68_v49 = vld [vmem:[%s1137_s1] sm:$0x3]  ;;  %s863_s1 = smov [#allocation2]  }
  0x33   :  { %553 = vmatprep.subr.bf16.mxu1 %v811_v17  ;;  %s643_s9 = sshll.u32 %s863_s1, 4  ;;  %s644_s9 = int_to_ptr.vmem [resolvable:$true] %s643_s9 }
  0x34   :  { %v72_v46 = vsub.s32 0, %v71_v45  ;;  %v76_v47 = vsub.s32 1, %v71_v45  ;;  %s841_s10 = scalar_lea.vmem %s644_s9, 1024  ;;  %p846_p1 = scmp.lt.s32.totalorder %s644_s9, %s644_s9 }
  0x35   :  { %501 = vmatpush2.bf16.msra.mxu0 %v813_v18  ;;  %p842_p0 = scmp.ne.s32.totalorder %s644_s9, %s841_s10  ;;  %p847_p2 = scmp.lt.s32.totalorder %s841_s10, %s841_s10 }
  0x36   :  { %554 = vmatpush2.bf16.msra.mxu1 %v814_v19  ;;  %502 = vmatprep.subr.bf16.mxu0 %v815_v20  ;;  %v73_v53 = vrot.slane %v68_v49, %v72_v46  ;;  %v77_v54 = vrot.slane %v68_v49, %v76_v47 }
  0x37   :  { %555 = vmatprep.subr.bf16.mxu1 %v817_v21  ;;  %p848_p3 = por %p847_p2, %p846_p1 }
  0x39   :  { %503 = vmatpush2.bf16.msra.mxu0 %v819_v22  ;;  %p849_p4 = pnand %p848_p3, %p842_p0 }
  0x3a   :  { %556 = vmatpush2.bf16.msra.mxu1 %v820_v23  ;;  %504 = vmatprep.subr.bf16.mxu0 %v821_v24 }
  0x3b   :  { %557 = vmatprep.subr.bf16.mxu1 %v823_v25 }
  0x3d   :  { %505 = vmatpush2.bf16.msra.mxu0 %v825_v26 }
  0x3e   :  { %558 = vmatpush2.bf16.msra.mxu1 %v826_v27  ;;  %506 = vmatprep.subr.bf16.mxu0 %v827_v28 }
  0x3f   :  { %559 = vmatprep.subr.bf16.mxu1 %v829_v29 }
  0x41   :  { %507 = vmatpush2.bf16.msra.mxu0 %v831_v30 }
  0x42   :  { %560 = vmatpush2.bf16.msra.mxu1 %v832_v31 }
  0x91   :  { %v37_v32 = vpop.xlane.xlu0 %36  ;;  %v43_v33 = vpop.xlane.xlu1 %42 }
  0x92   :  { %v48_v34 = vmul.f32 0.00390625, %v37_v32  ;;  %v50_v35 = vmul.f32 0.00390625, %v43_v33 }
  0x94   :  { %v52_v36 = vadd.f32 1e-05, %v48_v34  ;;  %v54_v37 = vadd.f32 1e-05, %v50_v35 }
  0x95   :  { %v40_v38 = vpop.xlane.xlu0 %39  ;;  %v46_v39 = vpop.xlane.xlu1 %45 }
  0x96   :  { %833 = vrsqrt.f32 %v52_v36  ;;  %v49_v40 = vmul.f32 0.00390625, %v40_v38  ;;  %v51_v41 = vmul.f32 0.00390625, %v46_v39 }
  0x97   :  { %835 = vrsqrt.f32 %v54_v37 }
  0x98   :  { %v53_v42 = vadd.f32 1e-05, %v49_v40  ;;  %v55_v43 = vadd.f32 1e-05, %v51_v41 }
  0x9a   :  { %837 = vrsqrt.f32 %v53_v42 }
  0x9b   :  { %839 = vrsqrt.f32 %v55_v43 }
  0xa3   :  { %v834_v48 = vpop.eup %833 }
  0xa4   :  { %v836_v50 = vpop.eup %835  ;;  %v61_v52 = vmul.f32 %v834_v48, %v897_v4  ;;  %v60_v55 = vmul.f32 %v834_v48, %v895_v3 }
  0xa5   :  { %v65_v51 = vmul.f32 %v836_v50, %v901_v6  ;;  %v64_v12 = vmul.f32 %v836_v50, %v899_v5 }
  0xa6   :  { %v81_v62 = vmul.f32 %v77_v54, %v61_v52  ;;  %v80_v0 = vmul.f32 %v73_v53, %v60_v55 }
  0xa7   :  { %v838_v56 = vpop.eup %837  ;;  %v85_v61 = vmul.f32 %v77_v54, %v65_v51 }
  0xa8   :  { %v840_v57 = vpop.eup %839  ;;  %v63_v58 = vmul.f32 %v838_v56, %v908_v9  ;;  %v62_v59 = vmul.f32 %v838_v56, %v906_v8  ;;  %v84_v8 = vmul.f32 %v73_v53, %v64_v12 }
  0xa9   :  { %v67_v60 = vmul.f32 %v840_v57, %v912_v11  ;;  %v66_v3 = vmul.f32 %v840_v57, %v910_v10 }
  0xaa   :  { %v83_v63 = vmul.f32 %v77_v54, %v63_v58  ;;  %v82_v1 = vmul.f32 %v73_v53, %v62_v59 }
  0xab   :  { %v87_v6 = vmul.f32 %v77_v54, %v67_v60  ;;  %v86_v9 = vmul.f32 %v73_v53, %v66_v3 }
  0xac   :  { %v89_v2 = vpack.c.bf16 %v83_v63, %v81_v62  ;;  %v88_v4 = vpack.c.bf16 %v82_v1, %v80_v0 }
  0xad   :  { %v91_v7 = vpack.c.bf16 %v87_v6, %v85_v61  ;;  %v90_v11 = vpack.c.bf16 %v86_v9, %v84_v8 }
  0xae   :  { %508 = vmatprep.mubr.bf16.mxu0 %v89_v2  ;;  %561 = vmatprep.mubr.bf16.mxu1 %v89_v2 }
  0xaf   :  { %509 = vmatmul.mubr.bf16.vlgmr.msra.gmra.mxu0 %v88_v4  ;;  %562 = vmatmul.mubr.bf16.vlgmr.msra.gmra.mxu1 %v88_v4 }
  0xb0   :  { %518 = vmatprep.mubr.bf16.mxu0 %v91_v7  ;;  %571 = vmatprep.mubr.bf16.mxu1 %v91_v7 }
  0xb7   :  { %519 = vmatmul.mubr.bf16.gmra.mxu0 %v90_v11  ;;  %572 = vmatmul.mubr.bf16.gmra.mxu1 %v90_v11 }
 0x16f   :  { %v510_v13 = vpop.f32.mrf.mxu0  ;;  %v563_v14 = vpop.f32.mrf.mxu1 }
 0x171   :  { %v512_v15 = vpop.f32.mrf.mxu0  ;;  %v565_v16 = vpop.f32.mrf.mxu1 }
 0x172   :  { %v726_v17 = vpack.c.bf16 %v512_v15, %v510_v13  ;;  %v727_v18 = vpack.c.bf16 %v565_v16, %v563_v14 }
 0x173   :  { %v514_v5 = vpop.f32.mrf.mxu0  ;;  %v567_v19 = vpop.f32.mrf.mxu1 }
 0x174   :  { %630 = vst [vmem:[#allocation2] sm:$0xff] %v726_v17  ;;  %631 = vst [vmem:[#allocation2 + $0x8] sm:$0xff] %v727_v18 }
 0x175   :  { %v516_v10 = vpop.f32.mrf.mxu0  ;;  %v569_v20 = vpop.f32.mrf.mxu1 }
 0x176   :  { %v728_v21 = vpack.c.bf16 %v516_v10, %v514_v5  ;;  %v729_v22 = vpack.c.bf16 %v569_v20, %v567_v19 }
 0x177   :  { %v520_v23 = vpop.f32.mrf.mxu0  ;;  %v573_v24 = vpop.f32.mrf.mxu1 }
 0x178   :  { %632 = vst [vmem:[#allocation2 + $0x10] sm:$0xff] %v728_v21  ;;  %633 = vst [vmem:[#allocation2 + $0x18] sm:$0xff] %v729_v22 }
 0x179   :  { %v522_v25 = vpop.f32.mrf.mxu0  ;;  %v575_v26 = vpop.f32.mrf.mxu1 }
 0x17a   :  { %v730_v27 = vpack.c.bf16 %v522_v25, %v520_v23  ;;  %v731_v28 = vpack.c.bf16 %v575_v26, %v573_v24 }
 0x17b   :  { %v524_v29 = vpop.f32.mrf.mxu0  ;;  %v577_v30 = vpop.f32.mrf.mxu1 }
 0x17c   :  { %634 = vst [vmem:[#allocation2 + $0x20] sm:$0xff] %v730_v27  ;;  %635 = vst [vmem:[#allocation2 + $0x28] sm:$0xff] %v731_v28 }
 0x17d   :  { %v526_v31 = vpop.f32.mrf.mxu0  ;;  %v579_v32 = vpop.f32.mrf.mxu1 }
 0x17e   :  { %v732_v33 = vpack.c.bf16 %v526_v31, %v524_v29  ;;  %v733_v34 = vpack.c.bf16 %v579_v32, %v577_v30 }
 0x180   :  { %636 = vst [vmem:[#allocation2 + $0x30] sm:$0xff] %v732_v33  ;;  %637 = vst [vmem:[#allocation2 + $0x38] sm:$0xff] %v733_v34 }
 0x181   :  { %852 = shalt.err (!%p849_p4)
}
 0x182   :  { %s864_s11 = smov 256   ;;  %s865_s12 = smov 16  }
 0x183   :  { %649 = dma.vmem_to_hbm [thread:$0]  %s644_s9, 1024, %s1139_s3, [#allocation3], %s864_s11, %s864_s11, %s865_s12  }
 0x184   :  { %861 = dma.done.wait [#allocation3], 1024  }
 0x185   :  { %862 = vsyncadd [#allocation3], 4294966272 }
 0x186   :  { %653 = vsyncpa [#allocation3], 1 }

// kernel: llama2_forward.12
= control target key start
LH: loop header
LB: loop body
LE: loop exit
PB: predicated region body
PF: predicated region fallthrough
CT: control target
= control target key end

     0   :  { %s3066_s18 = smov 0   ;;  %s3068_s19 = smov 0   ;;  %s3693_s0 = inlined_call_operand.vmem [shape: bf16[32,256], index: 0, kind: input, shape index: {}]   ;;  %s3694_s1 = inlined_call_operand.vmem [shape: f32[1,256], index: 1, kind: input, shape index: {}]   ;;  %s3695_s2 = inlined_call_operand.vmem [shape: bf16[256,768], index: 2, kind: input, shape index: {}]   ;;  %s3696_s3 = inlined_call_operand.vmem [shape: bf16[256,768], index: 3, kind: input, shape index: {}]   ;;  %s3697_s4 = inlined_call_operand.vmem [shape: bf16[768,256], index: 4, kind: input, shape index: {}]   ;;  %s3698_s5 = inlined_call_operand.vmem [shape: bf16[32,256], index: 5, kind: output, shape index: {}]  }
   0x1   :  { %s3070_s20 = smov 0   ;;  %s3072_s21 = smov 0  }
   0x2   :  { %s3074_s22 = smov 0  }
   0x3 LB: > { %s24_s23 = sadd.s32 1, %s3028_s21  ;;  %p88_p1 = scmp.ne.s32.totalorder %s3020_s19, %s3016_s18  ;;  %s3032_s22 = sphi %s3074_s22, %s15_s22   ;;  %s3028_s21 = sphi %s3072_s21, %s3703_s21   ;;  %s3024_s20 = sphi %s3070_s20, %s3702_s20   ;;  %s3020_s19 = sphi %s3068_s19, %s3701_s19   ;;  %s3016_s18 = sphi %s3066_s18, %s3700_s18  }
   0x4   : > { %p25_p0 = scmp.ge.s32.totalorder %s24_s23, 2  ;;  %p89_p2 = scmp.eq.s32.totalorder %s3032_s22, 0 }
   0x5   : > { %s81_s26 = sadd.s32 1, %s3020_s19  ;;  %p2312_p5 = scmp.ge.s32.totalorder %s3032_s22, 2 }
   0x6   : > { %s3705_s23 = smov (%p25_p0, %s24_s23), 0  ;;  %p3097_p3 = por %p89_p2, %p88_p1 }
   0x7   : > { %s78_s25 = ssub.s32 %s3028_s21, %s3705_s23  ;;  %205 = sbr.rel (%p2312_p5) target bundleno = 96 (0x60), region = 24 }
   0x8   : > { %p79_p4 = scmp.eq.s32.totalorder %s78_s25, 0 }
   0xa   : > { %s3105_s27 = scalar_select %p79_p4, %s3020_s19, %s81_s26  }
   0xc   : > { %208 = sbr.rel (!%p3097_p3) target bundleno = 54 (0x36), region = 28  ;;  %s210_s28 = sand.u32 (%p3097_p3), 1, %s3020_s19  }
   0xd   : > { %s2620_s29 = smul.u32 (%p3097_p3), 12, %s3028_s21 }
   0xe   : > { %s2687_s30 = smul.u32 (%p3097_p3), 384, %s210_s28 }
   0xf   : > { %s3115_s8 = scalar_lea.vmem (%p3097_p3), %s3695_s2, %s2620_s29 }
  0x10   : > { %v230_v0 = vld [vmem:[%s3115_s8] sm:$0xff] (%p3097_p3)  ;;  %v232_v1 = vld [vmem:[%s3115_s8 + $0x18] sm:$0xff] (%p3097_p3)  ;;  %v234_v2 = vld [vmem:[%s3115_s8 + $0x30] sm:$0xff] (%p3097_p3)  ;;  %s3120_s9 = scalar_lea.vmem (%p3097_p3), [#allocation4], %s2687_s30 }
  0x11   : > { %231 = vst [vmem:[%s3120_s9] sm:$0xff] %v230_v0  ;;  %233 = vst [vmem:[%s3120_s9 + $0xc] sm:$0xff] %v232_v1  ;;  %v236_v3 = vld [vmem:[%s3115_s8 + $0x48] sm:$0xff]  ;;  %v238_v4 = vld [vmem:[%s3115_s8 + $0x60] sm:$0xff] }
  0x12   : > { %235 = vst [vmem:[%s3120_s9 + $0x18] sm:$0xff] %v234_v2  ;;  %v240_v5 = vld [vmem:[%s3115_s8 + $0x78] sm:$0xff]  ;;  %237 = vst [vmem:[%s3120_s9 + $0x24] sm:$0xff] %v236_v3  ;;  %v242_v6 = vld [vmem:[%s3115_s8 + $0x90] sm:$0xff] }
  0x13   : > { %239 = vst [vmem:[%s3120_s9 + $0x30] sm:$0xff] %v238_v4  ;;  %241 = vst [vmem:[%s3120_s9 + $0x3c] sm:$0xff] %v240_v5  ;;  %v244_v7 = vld [vmem:[%s3115_s8 + $0xa8] sm:$0xff]  ;;  %v246_v8 = vld [vmem:[%s3115_s8 + $0xc0] sm:$0xff] }
  0x14   : > { %243 = vst [vmem:[%s3120_s9 + $0x48] sm:$0xff] %v242_v6  ;;  %245 = vst [vmem:[%s3120_s9 + $0x54] sm:$0xff] %v244_v7  ;;  %v248_v9 = vld [vmem:[%s3115_s8 + $0xd8] sm:$0xff]  ;;  %v250_v10 = vld [vmem:[%s3115_s8 + $0xf0] sm:$0xff] }
  0x15   : > { %247 = vst [vmem:[%s3120_s9 + $0x60] sm:$0xff] %v246_v8  ;;  %v252_v11 = vld [vmem:[%s3115_s8 + $0x108] sm:$0xff]  ;;  %249 = vst [vmem:[%s3120_s9 + $0x6c] sm:$0xff] %v248_v9  ;;  %v254_v12 = vld [vmem:[%s3115_s8 + $0x120] sm:$0xff] }
  0x16   : > { %251 = vst [vmem:[%s3120_s9 + $0x78] sm:$0xff] %v250_v10  ;;  %253 = vst [vmem:[%s3120_s9 + $0x84] sm:$0xff] %v252_v11  ;;  %v256_v13 = vld [vmem:[%s3115_s8 + $0x138] sm:$0xff]  ;;  %v258_v14 = vld [vmem:[%s3115_s8 + $0x150] sm:$0xff] }
  0x17   : > { %255 = vst [vmem:[%s3120_s9 + $0x90] sm:$0xff] %v254_v12  ;;  %257 = vst [vmem:[%s3120_s9 + $0x9c] sm:$0xff] %v256_v13  ;;  %v260_v15 = vld [vmem:[%s3115_s8 + $0x168] sm:$0xff]  ;;  %v262_v16 = vld [vmem:[%s3115_s8 + $0x180] sm:$0xff] }
  0x18   : > { %259 = vst [vmem:[%s3120_s9 + $0xa8] sm:$0xff] %v258_v14  ;;  %v264_v17 = vld [vmem:[%s3115_s8 + $0x198] sm:$0xff]  ;;  %261 = vst [vmem:[%s3120_s9 + $0xb4] sm:$0xff] %v260_v15  ;;  %v266_v18 = vld [vmem:[%s3115_s8 + $0x1b0] sm:$0xff] }
  0x19   : > { %263 = vst [vmem:[%s3120_s9 + $0xc0] sm:$0xff] %v262_v16  ;;  %265 = vst [vmem:[%s3120_s9 + $0xcc] sm:$0xff] %v264_v17  ;;  %v268_v19 = vld [vmem:[%s3115_s8 + $0x1c8] sm:$0xff]  ;;  %v270_v20 = vld [vmem:[%s3115_s8 + $0x1e0] sm:$0xff] }
  0x1a   : > { %267 = vst [vmem:[%s3120_s9 + $0xd8] sm:$0xff] %v266_v18  ;;  %269 = vst [vmem:[%s3120_s9 + $0xe4] sm:$0xff] %v268_v19  ;;  %v272_v21 = vld [vmem:[%s3115_s8 + $0x1f8] sm:$0xff]  ;;  %v274_v22 = vld [vmem:[%s3115_s8 + $0x210] sm:$0xff] }
  0x1b   : > { %271 = vst [vmem:[%s3120_s9 + $0xf0] sm:$0xff] %v270_v20  ;;  %v276_v23 = vld [vmem:[%s3115_s8 + $0x228] sm:$0xff]  ;;  %273 = vst [vmem:[%s3120_s9 + $0xfc] sm:$0xff] %v272_v21  ;;  %v278_v24 = vld [vmem:[%s3115_s8 + $0x240] sm:$0xff] }
  0x1c   : > { %275 = vst [vmem:[%s3120_s9 + $0x108] sm:$0xff] %v274_v22  ;;  %277 = vst [vmem:[%s3120_s9 + $0x114] sm:$0xff] %v276_v23  ;;  %v280_v25 = vld [vmem:[%s3115_s8 + $0x258] sm:$0xff]  ;;  %v282_v26 = vld [vmem:[%s3115_s8 + $0x270] sm:$0xff] }
  0x1d   : > { %279 = vst [vmem:[%s3120_s9 + $0x120] sm:$0xff] %v278_v24  ;;  %281 = vst [vmem:[%s3120_s9 + $0x12c] sm:$0xff] %v280_v25  ;;  %v284_v27 = vld [vmem:[%s3115_s8 + $0x288] sm:$0xff]  ;;  %v286_v28 = vld [vmem:[%s3115_s8 + $0x2a0] sm:$0xff] }
  0x1e   : > { %283 = vst [vmem:[%s3120_s9 + $0x138] sm:$0xff] %v282_v26  ;;  %v288_v29 = vld [vmem:[%s3115_s8 + $0x2b8] sm:$0xff]  ;;  %285 = vst [vmem:[%s3120_s9 + $0x144] sm:$0xff] %v284_v27  ;;  %v290_v30 = vld [vmem:[%s3115_s8 + $0x2d0] sm:$0xff] }
  0x1f   : > { %287 = vst [vmem:[%s3120_s9 + $0x150] sm:$0xff] %v286_v28  ;;  %289 = vst [vmem:[%s3120_s9 + $0x15c] sm:$0xff] %v288_v29  ;;  %v292_v31 = vld [vmem:[%s3115_s8 + $0x2e8] sm:$0xff]  ;;  %v2316_v33 = vld [vmem:[%s3115_s8 + $0x20] sm:$0xf] }
  0x20   : > { %v2314_v32 = vld [vmem:[%s3115_s8 + $0x8] sm:$0xf]  ;;  %291 = vst [vmem:[%s3120_s9 + $0x168] sm:$0xff] %v290_v30  ;;  %293 = vst [vmem:[%s3120_s9 + $0x174] sm:$0xff] %v292_v31  ;;  %v2318_v34 = vld [vmem:[%s3115_s8 + $0x38] sm:$0xf] }
  0x21   : > { %2315 = vst [vmem:[%s3120_s9 + $0x8] sm:$0xf] %v2314_v32  ;;  %v2320_v35 = vld [vmem:[%s3115_s8 + $0x50] sm:$0xf]  ;;  %2317 = vst [vmem:[%s3120_s9 + $0x14] sm:$0xf] %v2316_v33 }
  0x22   : > { %2319 = vst [vmem:[%s3120_s9 + $0x20] sm:$0xf] %v2318_v34  ;;  %2321 = vst [vmem:[%s3120_s9 + $0x2c] sm:$0xf] %v2320_v35  ;;  %v2322_v36 = vld [vmem:[%s3115_s8 + $0x68] sm:$0xf] }
  0x23   : > { %v2324_v37 = vld [vmem:[%s3115_s8 + $0x80] sm:$0xf]  ;;  %v2326_v38 = vld [vmem:[%s3115_s8 + $0x98] sm:$0xf]  ;;  %2323 = vst [vmem:[%s3120_s9 + $0x38] sm:$0xf] %v2322_v36 }
  0x24   : > { %2325 = vst [vmem:[%s3120_s9 + $0x44] sm:$0xf] %v2324_v37  ;;  %2327 = vst [vmem:[%s3120_s9 + $0x50] sm:$0xf] %v2326_v38  ;;  %v2328_v39 = vld [vmem:[%s3115_s8 + $0xb0] sm:$0xf] }
  0x25   : > { %v2330_v40 = vld [vmem:[%s3115_s8 + $0xc8] sm:$0xf]  ;;  %v2332_v41 = vld [vmem:[%s3115_s8 + $0xe0] sm:$0xf]  ;;  %2329 = vst [vmem:[%s3120_s9 + $0x5c] sm:$0xf] %v2328_v39 }
  0x26   : > { %2331 = vst [vmem:[%s3120_s9 + $0x68] sm:$0xf] %v2330_v40  ;;  %2333 = vst [vmem:[%s3120_s9 + $0x74] sm:$0xf] %v2332_v41  ;;  %v2334_v42 = vld [vmem:[%s3115_s8 + $0xf8] sm:$0xf] }
  0x27   : > { %v2336_v43 = vld [vmem:[%s3115_s8 + $0x110] sm:$0xf]  ;;  %v2338_v44 = vld [vmem:[%s3115_s8 + $0x128] sm:$0xf]  ;;  %2335 = vst [vmem:[%s3120_s9 + $0x80] sm:$0xf] %v2334_v42 }
  0x28   : > { %2337 = vst [vmem:[%s3120_s9 + $0x8c] sm:$0xf] %v2336_v43  ;;  %2339 = vst [vmem:[%s3120_s9 + $0x98] sm:$0xf] %v2338_v44  ;;  %v2340_v45 = vld [vmem:[%s3115_s8 + $0x140] sm:$0xf] }
  0x29   : > { %v2342_v46 = vld [vmem:[%s3115_s8 + $0x158] sm:$0xf]  ;;  %v2344_v47 = vld [vmem:[%s3115_s8 + $0x170] sm:$0xf]  ;;  %2341 = vst [vmem:[%s3120_s9 + $0xa4] sm:$0xf] %v2340_v45 }
  0x2a   : > { %2343 = vst [vmem:[%s3120_s9 + $0xb0] sm:$0xf] %v2342_v46  ;;  %2345 = vst [vmem:[%s3120_s9 + $0xbc] sm:$0xf] %v2344_v47  ;;  %v2346_v48 = vld [vmem:[%s3115_s8 + $0x188] sm:$0xf] }
  0x2b   : > { %v2348_v49 = vld [vmem:[%s3115_s8 + $0x1a0] sm:$0xf]  ;;  %v2350_v50 = vld [vmem:[%s3115_s8 + $0x1b8] sm:$0xf]  ;;  %2347 = vst [vmem:[%s3120_s9 + $0xc8] sm:$0xf] %v2346_v48 }
  0x2c   : > { %2349 = vst [vmem:[%s3120_s9 + $0xd4] sm:$0xf] %v2348_v49  ;;  %2351 = vst [vmem:[%s3120_s9 + $0xe0] sm:$0xf] %v2350_v50  ;;  %v2352_v51 = vld [vmem:[%s3115_s8 + $0x1d0] sm:$0xf] }
  0x2d   : > { %v2354_v52 = vld [vmem:[%s3115_s8 + $0x1e8] sm:$0xf]  ;;  %v2356_v53 = vld [vmem:[%s3115_s8 + $0x200] sm:$0xf]  ;;  %2353 = vst [vmem:[%s3120_s9 + $0xec] sm:$0xf] %v2352_v51 }
  0x2e   : > { %2355 = vst [vmem:[%s3120_s9 + $0xf8] sm:$0xf] %v2354_v52  ;;  %2357 = vst [vmem:[%s3120_s9 + $0x104] sm:$0xf] %v2356_v53  ;;  %v2358_v54 = vld [vmem:[%s3115_s8 + $0x218] sm:$0xf] }
  0x2f   : > { %v2360_v55 = vld [vmem:[%s3115_s8 + $0x230] sm:$0xf]  ;;  %v2362_v56 = vld [vmem:[%s3115_s8 + $0x248] sm:$0xf]  ;;  %2359 = vst [vmem:[%s3120_s9 + $0x110] sm:$0xf] %v2358_v54 }
  0x30   : > { %2361 = vst [vmem:[%s3120_s9 + $0x11c] sm:$0xf] %v2360_v55  ;;  %2363 = vst [vmem:[%s3120_s9 + $0x128] sm:$0xf] %v2362_v56  ;;  %v2364_v57 = vld [vmem:[%s3115_s8 + $0x260] sm:$0xf] }
  0x31   : > { %v2366_v58 = vld [vmem:[%s3115_s8 + $0x278] sm:$0xf]  ;;  %v2368_v59 = vld [vmem:[%s3115_s8 + $0x290] sm:$0xf]  ;;  %2365 = vst [vmem:[%s3120_s9 + $0x134] sm:$0xf] %v2364_v57 }
  0x32   : > { %2367 = vst [vmem:[%s3120_s9 + $0x140] sm:$0xf] %v2366_v58  ;;  %2369 = vst [vmem:[%s3120_s9 + $0x14c] sm:$0xf] %v2368_v59  ;;  %v2370_v60 = vld [vmem:[%s3115_s8 + $0x2a8] sm:$0xf] }
  0x33   : > { %v2372_v61 = vld [vmem:[%s3115_s8 + $0x2c0] sm:$0xf]  ;;  %v2374_v62 = vld [vmem:[%s3115_s8 + $0x2d8] sm:$0xf]  ;;  %2371 = vst [vmem:[%s3120_s9 + $0x158] sm:$0xf] %v2370_v60 }
  0x34   : > { %2373 = vst [vmem:[%s3120_s9 + $0x164] sm:$0xf] %v2372_v61  ;;  %2375 = vst [vmem:[%s3120_s9 + $0x170] sm:$0xf] %v2374_v62  ;;  %v2376_v63 = vld [vmem:[%s3115_s8 + $0x2f0] sm:$0xf] }
  0x35   : > { %2377 = vst [vmem:[%s3120_s9 + $0x17c] sm:$0xf] %v2376_v63 }
  0x36 PF: > { %371 = sbr.rel (!%p3097_p3) target bundleno = 96 (0x60), region = 54  ;;  %s373_s10 = sand.u32 (%p3097_p3), 1, %s3020_s19  }
  0x37   : > { %s2621_s11 = smul.u32 (%p3097_p3), 12, %s3028_s21 }
  0x38   : > { %s2688_s12 = smul.u32 (%p3097_p3), 384, %s373_s10 }
  0x39   : > { %s3254_s15 = scalar_lea.vmem (%p3097_p3), %s3696_s3, %s2621_s11 }
  0x3a   : > { %v393_v0 = vld [vmem:[%s3254_s15] sm:$0xff] (%p3097_p3)  ;;  %v395_v1 = vld [vmem:[%s3254_s15 + $0x18] sm:$0xff] (%p3097_p3)  ;;  %v397_v2 = vld [vmem:[%s3254_s15 + $0x30] sm:$0xff] (%p3097_p3)  ;;  %s3259_s16 = scalar_lea.vmem (%p3097_p3), [#allocation5], %s2688_s12 }
  0x3b   : > { %394 = vst [vmem:[%s3259_s16] sm:$0xff] %v393_v0  ;;  %396 = vst [vmem:[%s3259_s16 + $0xc] sm:$0xff] %v395_v1  ;;  %v399_v3 = vld [vmem:[%s3254_s15 + $0x48] sm:$0xff]  ;;  %v401_v4 = vld [vmem:[%s3254_s15 + $0x60] sm:$0xff] }
  0x3c   : > { %398 = vst [vmem:[%s3259_s16 + $0x18] sm:$0xff] %v397_v2  ;;  %v403_v5 = vld [vmem:[%s3254_s15 + $0x78] sm:$0xff]  ;;  %400 = vst [vmem:[%s3259_s16 + $0x24] sm:$0xff] %v399_v3  ;;  %v405_v6 = vld [vmem:[%s3254_s15 + $0x90] sm:$0xff] }
  0x3d   : > { %402 = vst [vmem:[%s3259_s16 + $0x30] sm:$0xff] %v401_v4  ;;  %404 = vst [vmem:[%s3259_s16 + $0x3c] sm:$0xff] %v403_v5  ;;  %v407_v7 = vld [vmem:[%s3254_s15 + $0xa8] sm:$0xff]  ;;  %v409_v8 = vld [vmem:[%s3254_s15 + $0xc0] sm:$0xff] }
  0x3e   : > { %406 = vst [vmem:[%s3259_s16 + $0x48] sm:$0xff] %v405_v6  ;;  %408 = vst [vmem:[%s3259_s16 + $0x54] sm:$0xff] %v407_v7  ;;  %v411_v9 = vld [vmem:[%s3254_s15 + $0xd8] sm:$0xff]  ;;  %v413_v10 = vld [vmem:[%s3254_s15 + $0xf0] sm:$0xff] }
  0x3f   : > { %410 = vst [vmem:[%s3259_s16 + $0x60] sm:$0xff] %v409_v8  ;;  %v415_v11 = vld [vmem:[%s3254_s15 + $0x108] sm:$0xff]  ;;  %412 = vst [vmem:[%s3259_s16 + $0x6c] sm:$0xff] %v411_v9  ;;  %v417_v12 = vld [vmem:[%s3254_s15 + $0x120] sm:$0xff] }
  0x40   : > { %414 = vst [vmem:[%s3259_s16 + $0x78] sm:$0xff] %v413_v10  ;;  %416 = vst [vmem:[%s3259_s16 + $0x84] sm:$0xff] %v415_v11  ;;  %v419_v13 = vld [vmem:[%s3254_s15 + $0x138] sm:$0xff]  ;;  %v421_v14 = vld [vmem:[%s3254_s15 + $0x150] sm:$0xff] }
  0x41   : > { %418 = vst [vmem:[%s3259_s16 + $0x90] sm:$0xff] %v417_v12  ;;  %420 = vst [vmem:[%s3259_s16 + $0x9c] sm:$0xff] %v419_v13  ;;  %v423_v15 = vld [vmem:[%s3254_s15 + $0x168] sm:$0xff]  ;;  %v425_v16 = vld [vmem:[%s3254_s15 + $0x180] sm:$0xff] }
  0x42   : > { %422 = vst [vmem:[%s3259_s16 + $0xa8] sm:$0xff] %v421_v14  ;;  %v427_v17 = vld [vmem:[%s3254_s15 + $0x198] sm:$0xff]  ;;  %424 = vst [vmem:[%s3259_s16 + $0xb4] sm:$0xff] %v423_v15  ;;  %v429_v18 = vld [vmem:[%s3254_s15 + $0x1b0] sm:$0xff] }
  0x43   : > { %426 = vst [vmem:[%s3259_s16 + $0xc0] sm:$0xff] %v425_v16  ;;  %428 = vst [vmem:[%s3259_s16 + $0xcc] sm:$0xff] %v427_v17  ;;  %v431_v19 = vld [vmem:[%s3254_s15 + $0x1c8] sm:$0xff]  ;;  %v433_v20 = vld [vmem:[%s3254_s15 + $0x1e0] sm:$0xff] }
  0x44   : > { %430 = vst [vmem:[%s3259_s16 + $0xd8] sm:$0xff] %v429_v18  ;;  %432 = vst [vmem:[%s3259_s16 + $0xe4] sm:$0xff] %v431_v19  ;;  %v435_v21 = vld [vmem:[%s3254_s15 + $0x1f8] sm:$0xff]  ;;  %v437_v22 = vld [vmem:[%s3254_s15 + $0x210] sm:$0xff] }
  0x45   : > { %434 = vst [vmem:[%s3259_s16 + $0xf0] sm:$0xff] %v433_v20  ;;  %v439_v23 = vld [vmem:[%s3254_s15 + $0x228] sm:$0xff]  ;;  %436 = vst [vmem:[%s3259_s16 + $0xfc] sm:$0xff] %v435_v21  ;;  %v441_v24 = vld [vmem:[%s3254_s15 + $0x240] sm:$0xff] }
  0x46   : > { %438 = vst [vmem:[%s3259_s16 + $0x108] sm:$0xff] %v437_v22  ;;  %440 = vst [vmem:[%s3259_s16 + $0x114] sm:$0xff] %v439_v23  ;;  %v443_v25 = vld [vmem:[%s3254_s15 + $0x258] sm:$0xff]  ;;  %v445_v26 = vld [vmem:[%s3254_s15 + $0x270] sm:$0xff] }
  0x47   : > { %442 = vst [vmem:[%s3259_s16 + $0x120] sm:$0xff] %v441_v24  ;;  %444 = vst [vmem:[%s3259_s16 + $0x12c] sm:$0xff] %v443_v25  ;;  %v447_v27 = vld [vmem:[%s3254_s15 + $0x288] sm:$0xff]  ;;  %v449_v28 = vld [vmem:[%s3254_s15 + $0x2a0] sm:$0xff] }
  0x48   : > { %446 = vst [vmem:[%s3259_s16 + $0x138] sm:$0xff] %v445_v26  ;;  %v451_v29 = vld [vmem:[%s3254_s15 + $0x2b8] sm:$0xff]  ;;  %448 = vst [vmem:[%s3259_s16 + $0x144] sm:$0xff] %v447_v27  ;;  %v453_v30 = vld [vmem:[%s3254_s15 + $0x2d0] sm:$0xff] }
  0x49   : > { %450 = vst [vmem:[%s3259_s16 + $0x150] sm:$0xff] %v449_v28  ;;  %452 = vst [vmem:[%s3259_s16 + $0x15c] sm:$0xff] %v451_v29  ;;  %v455_v31 = vld [vmem:[%s3254_s15 + $0x2e8] sm:$0xff]  ;;  %v2381_v33 = vld [vmem:[%s3254_s15 + $0x20] sm:$0xf] }
  0x4a   : > { %v2379_v32 = vld [vmem:[%s3254_s15 + $0x8] sm:$0xf]  ;;  %454 = vst [vmem:[%s3259_s16 + $0x168] sm:$0xff] %v453_v30  ;;  %456 = vst [vmem:[%s3259_s16 + $0x174] sm:$0xff] %v455_v31  ;;  %v2383_v34 = vld [vmem:[%s3254_s15 + $0x38] sm:$0xf] }
  0x4b   : > { %2380 = vst [vmem:[%s3259_s16 + $0x8] sm:$0xf] %v2379_v32  ;;  %v2385_v35 = vld [vmem:[%s3254_s15 + $0x50] sm:$0xf]  ;;  %2382 = vst [vmem:[%s3259_s16 + $0x14] sm:$0xf] %v2381_v33 }
  0x4c   : > { %2384 = vst [vmem:[%s3259_s16 + $0x20] sm:$0xf] %v2383_v34  ;;  %2386 = vst [vmem:[%s3259_s16 + $0x2c] sm:$0xf] %v2385_v35  ;;  %v2387_v36 = vld [vmem:[%s3254_s15 + $0x68] sm:$0xf] }
  0x4d   : > { %v2389_v37 = vld [vmem:[%s3254_s15 + $0x80] sm:$0xf]  ;;  %v2391_v38 = vld [vmem:[%s3254_s15 + $0x98] sm:$0xf]  ;;  %2388 = vst [vmem:[%s3259_s16 + $0x38] sm:$0xf] %v2387_v36 }
  0x4e   : > { %2390 = vst [vmem:[%s3259_s16 + $0x44] sm:$0xf] %v2389_v37  ;;  %2392 = vst [vmem:[%s3259_s16 + $0x50] sm:$0xf] %v2391_v38  ;;  %v2393_v39 = vld [vmem:[%s3254_s15 + $0xb0] sm:$0xf] }
  0x4f   : > { %v2395_v40 = vld [vmem:[%s3254_s15 + $0xc8] sm:$0xf]  ;;  %v2397_v41 = vld [vmem:[%s3254_s15 + $0xe0] sm:$0xf]  ;;  %2394 = vst [vmem:[%s3259_s16 + $0x5c] sm:$0xf] %v2393_v39 }
  0x50   : > { %2396 = vst [vmem:[%s3259_s16 + $0x68] sm:$0xf] %v2395_v40  ;;  %2398 = vst [vmem:[%s3259_s16 + $0x74] sm:$0xf] %v2397_v41  ;;  %v2399_v42 = vld [vmem:[%s3254_s15 + $0xf8] sm:$0xf] }
  0x51   : > { %v2401_v43 = vld [vmem:[%s3254_s15 + $0x110] sm:$0xf]  ;;  %v2403_v44 = vld [vmem:[%s3254_s15 + $0x128] sm:$0xf]  ;;  %2400 = vst [vmem:[%s3259_s16 + $0x80] sm:$0xf] %v2399_v42 }
  0x52   : > { %2402 = vst [vmem:[%s3259_s16 + $0x8c] sm:$0xf] %v2401_v43  ;;  %2404 = vst [vmem:[%s3259_s16 + $0x98] sm:$0xf] %v2403_v44  ;;  %v2405_v45 = vld [vmem:[%s3254_s15 + $0x140] sm:$0xf] }
  0x53   : > { %v2407_v46 = vld [vmem:[%s3254_s15 + $0x158] sm:$0xf]  ;;  %v2409_v47 = vld [vmem:[%s3254_s15 + $0x170] sm:$0xf]  ;;  %2406 = vst [vmem:[%s3259_s16 + $0xa4] sm:$0xf] %v2405_v45 }
  0x54   : > { %2408 = vst [vmem:[%s3259_s16 + $0xb0] sm:$0xf] %v2407_v46  ;;  %2410 = vst [vmem:[%s3259_s16 + $0xbc] sm:$0xf] %v2409_v47  ;;  %v2411_v48 = vld [vmem:[%s3254_s15 + $0x188] sm:$0xf] }
  0x55   : > { %v2413_v49 = vld [vmem:[%s3254_s15 + $0x1a0] sm:$0xf]  ;;  %v2415_v50 = vld [vmem:[%s3254_s15 + $0x1b8] sm:$0xf]  ;;  %2412 = vst [vmem:[%s3259_s16 + $0xc8] sm:$0xf] %v2411_v48 }
  0x56   : > { %2414 = vst [vmem:[%s3259_s16 + $0xd4] sm:$0xf] %v2413_v49  ;;  %2416 = vst [vmem:[%s3259_s16 + $0xe0] sm:$0xf] %v2415_v50  ;;  %v2417_v51 = vld [vmem:[%s3254_s15 + $0x1d0] sm:$0xf] }
  0x57   : > { %v2419_v52 = vld [vmem:[%s3254_s15 + $0x1e8] sm:$0xf]  ;;  %v2421_v53 = vld [vmem:[%s3254_s15 + $0x200] sm:$0xf]  ;;  %2418 = vst [vmem:[%s3259_s16 + $0xec] sm:$0xf] %v2417_v51 }
  0x58   : > { %2420 = vst [vmem:[%s3259_s16 + $0xf8] sm:$0xf] %v2419_v52  ;;  %2422 = vst [vmem:[%s3259_s16 + $0x104] sm:$0xf] %v2421_v53  ;;  %v2423_v54 = vld [vmem:[%s3254_s15 + $0x218] sm:$0xf] }
  0x59   : > { %v2425_v55 = vld [vmem:[%s3254_s15 + $0x230] sm:$0xf]  ;;  %v2427_v56 = vld [vmem:[%s3254_s15 + $0x248] sm:$0xf]  ;;  %2424 = vst [vmem:[%s3259_s16 + $0x110] sm:$0xf] %v2423_v54 }
  0x5a   : > { %2426 = vst [vmem:[%s3259_s16 + $0x11c] sm:$0xf] %v2425_v55  ;;  %2428 = vst [vmem:[%s3259_s16 + $0x128] sm:$0xf] %v2427_v56  ;;  %v2429_v57 = vld [vmem:[%s3254_s15 + $0x260] sm:$0xf] }
  0x5b   : > { %v2431_v58 = vld [vmem:[%s3254_s15 + $0x278] sm:$0xf]  ;;  %v2433_v59 = vld [vmem:[%s3254_s15 + $0x290] sm:$0xf]  ;;  %2430 = vst [vmem:[%s3259_s16 + $0x134] sm:$0xf] %v2429_v57 }
  0x5c   : > { %2432 = vst [vmem:[%s3259_s16 + $0x140] sm:$0xf] %v2431_v58  ;;  %2434 = vst [vmem:[%s3259_s16 + $0x14c] sm:$0xf] %v2433_v59  ;;  %v2435_v60 = vld [vmem:[%s3254_s15 + $0x2a8] sm:$0xf] }
  0x5d   : > { %v2437_v61 = vld [vmem:[%s3254_s15 + $0x2c0] sm:$0xf]  ;;  %v2439_v62 = vld [vmem:[%s3254_s15 + $0x2d8] sm:$0xf]  ;;  %2436 = vst [vmem:[%s3259_s16 + $0x158] sm:$0xf] %v2435_v60 }
  0x5e   : > { %2438 = vst [vmem:[%s3259_s16 + $0x164] sm:$0xf] %v2437_v61  ;;  %2440 = vst [vmem:[%s3259_s16 + $0x170] sm:$0xf] %v2439_v62  ;;  %v2441_v63 = vld [vmem:[%s3254_s15 + $0x2f0] sm:$0xf] }
  0x5f   : > { %2442 = vst [vmem:[%s3259_s16 + $0x17c] sm:$0xf] %v2441_v63 }
  0x60 PF: > { %p2443_p6 = scmp.ge.s32.totalorder %s3032_s22, 1  ;;  %p543_p7 = scmp.lt.s32.totalorder %s3032_s22, 3 }
  0x62   : > { %p544_p8 = pnand %p2443_p6, %p543_p7 }
  0x63   : > { %s550_s17 = sand.u32 (!%p544_p8), 1, %s3016_s18   ;;  %s610_s24 = smul.u32 (!%p544_p8), 48, %s3024_s20 }
  0x64   : > { %547 = sbr.rel (%p544_p8) target bundleno = 812 (0x32c), region = 84  ;;  %p2446_p10 = scmp.ne.s32.totalorder (!%p544_p8), %s3024_s20, 0 }
  0x65   : > { %s2689_s25 = smul.u32 (!%p544_p8), 384, %s550_s17  ;;  %p611_p9 = scmp.lt.s32.totalorder (!%p544_p8), %s610_s24, 95 }
  0x67   : > { %s3395_s6 = scalar_lea.vmem (!%p544_p8), [#allocation4], %s2689_s25  ;;  %s3397_s7 = scalar_lea.vmem (!%p544_p8), [#allocation5], %s2689_s25 }
  0x69   : > { %s3707_s24 = smov (!%p611_p9, %s610_s24), 95  ;;  %628 = sbr.rel (%p2446_p10) target bundleno = 285 (0x11d), region = 96 }
  0x6a   : > { %s2622_s26 = sshll.u32 %s3707_s24, 3 }
  0x6b   : > { %s3393_s30 = scalar_lea.vmem %s3697_s4, %s2622_s26 }
  0x6e   : > { %v631_v0 = vld [vmem:[%s3693_s0 + $0x10] sm:$0xff]  ;;  %v629_v1 = vld [vmem:[%s3693_s0] sm:$0xff]  ;;  %v632_v2 = vld [vmem:[%s3693_s0 + $0x18] sm:$0xff]  ;;  %v3034_v24 = vmov 0.0   ;;  %v684_v33 = vlaneseq }
  0x6f   : > { %v637_v3 = vunpack.c.l.bf16 %v631_v0  ;;  %v638_v4 = vunpack.c.h.bf16 %v631_v0  ;;  %v633_v5 = vunpack.c.l.bf16 %v629_v1  ;;  %v634_v6 = vunpack.c.h.bf16 %v629_v1  ;;  %v630_v7 = vld [vmem:[%s3693_s0 + $0x8] sm:$0xff]  ;;  %730 = vst [vmem:[#allocation3] sm:$0xff] %v3034_v24  ;;  %731 = vst [vmem:[#allocation3 + $0x38] sm:$0xff] %v3034_v24  ;;  %v682_v41 = vld [vmem:[%s3694_s1] sm:$0x3] }
  0x70   : > { %v3412_v8 = vunpack.c.l.bf16 %v632_v2  ;;  %v3414_v9 = vunpack.c.h.bf16 %v632_v2  ;;  %v3416_v10 = vunpack.c.l.bf16 %v630_v7  ;;  %v3418_v11 = vunpack.c.h.bf16 %v630_v7  ;;  %732 = vst [vmem:[#allocation3 + $0x8] sm:$0xff] %v3034_v24  ;;  %733 = vst [vmem:[#allocation3 + $0x18] sm:$0xff] %v3034_v24 }
  0x71   : > { %v645_v12 = vmul.f32 %v637_v3, %v637_v3  ;;  %v646_v13 = vmul.f32 %v638_v4, %v638_v4  ;;  %v641_v14 = vmul.f32 %v633_v5, %v633_v5  ;;  %v642_v15 = vmul.f32 %v634_v6, %v634_v6  ;;  %734 = vst [vmem:[#allocation3 + $0x20] sm:$0xff] %v3034_v24 }
  0x72   : > { %v647_v16 = vmul.f32 %v3412_v8, %v3412_v8  ;;  %v648_v17 = vmul.f32 %v3414_v9, %v3414_v9  ;;  %v643_v18 = vmul.f32 %v3416_v10, %v3416_v10  ;;  %v644_v19 = vmul.f32 %v3418_v11, %v3418_v11  ;;  %735 = vst [vmem:[#allocation3 + $0x10] sm:$0xff] %v3034_v24 }
  0x73   : > { %v655_v20 = vadd.f32 %v646_v13, %v645_v12  ;;  %v649_v21 = vadd.f32 %v642_v15, %v641_v14  ;;  %736 = vst [vmem:[#allocation3 + $0x30] sm:$0xff] %v3034_v24  ;;  %737 = vst [vmem:[#allocation3 + $0x28] sm:$0xff] %v3034_v24  ;;  %v685_v38 = vshrl.u32 %v684_v33, 7 }
  0x74   : > { %v658_v22 = vadd.f32 %v648_v17, %v647_v16  ;;  %v652_v23 = vadd.f32 %v644_v19, %v643_v18 }
  0x75   : > { %656 = vadd.xlane.f32.xlu1 %v655_v20  ;;  %650 = vadd.xlane.f32.xlu0 %v649_v21  ;;  %v686_v39 = vsub.s32 0, %v685_v38  ;;  %v690_v40 = vsub.s32 1, %v685_v38 }
  0x77   : > { %v687_v42 = vrot.slane %v682_v41, %v686_v39  ;;  %v691_v43 = vrot.slane %v682_v41, %v690_v40 }
  0x79   : > { %659 = vadd.xlane.f32.xlu1 %v658_v22  ;;  %653 = vadd.xlane.f32.xlu0 %v652_v23 }
  0xfe   : > { %v657_v25 = vpop.xlane.xlu1 %656  ;;  %v651_v26 = vpop.xlane.xlu0 %650 }
  0xff   : > { %v664_v27 = vmul.f32 0.00390625, %v657_v25  ;;  %v662_v28 = vmul.f32 0.00390625, %v651_v26 }
 0x101   : > { %v668_v29 = vadd.f32 1e-05, %v664_v27  ;;  %v666_v30 = vadd.f32 1e-05, %v662_v28 }
 0x102   : > { %v660_v31 = vpop.xlane.xlu1 %659  ;;  %v654_v32 = vpop.xlane.xlu0 %653 }
 0x103   : > { %2732 = vrsqrt.f32 %v668_v29  ;;  %v665_v34 = vmul.f32 0.00390625, %v660_v31  ;;  %v663_v35 = vmul.f32 0.00390625, %v654_v32 }
 0x104   : > { %2734 = vrsqrt.f32 %v666_v30 }
 0x105   : > { %v669_v36 = vadd.f32 1e-05, %v665_v34  ;;  %v667_v37 = vadd.f32 1e-05, %v663_v35 }
 0x107   : > { %2736 = vrsqrt.f32 %v669_v36 }
 0x108   : > { %2738 = vrsqrt.f32 %v667_v37 }
 0x110   : > { %v2733_v44 = vpop.eup %2732 }
 0x111   : > { %v2735_v45 = vpop.eup %2734  ;;  %v678_v46 = vmul.f32 %v2733_v44, %v637_v3  ;;  %v679_v47 = vmul.f32 %v2733_v44, %v638_v4 }
 0x112   : > { %v674_v48 = vmul.f32 %v2735_v45, %v633_v5  ;;  %v675_v49 = vmul.f32 %v2735_v45, %v634_v6 }
 0x113   : > { %v698_v50 = vmul.f32 %v687_v42, %v678_v46  ;;  %v699_v51 = vmul.f32 %v691_v43, %v679_v47 }
 0x114   : > { %v2737_v52 = vpop.eup %2736  ;;  %v694_v53 = vmul.f32 %v687_v42, %v674_v48  ;;  %v695_v54 = vmul.f32 %v691_v43, %v675_v49 }
 0x115   : > { %v2739_v55 = vpop.eup %2738  ;;  %v2625_v56 = vpack.c.bf16 %v699_v51, %v698_v50  ;;  %v680_v57 = vmul.f32 %v2737_v52, %v3412_v8  ;;  %v681_v58 = vmul.f32 %v2737_v52, %v3414_v9 }
 0x116   : > { %v2623_v59 = vpack.c.bf16 %v695_v54, %v694_v53  ;;  %v676_v60 = vmul.f32 %v2739_v55, %v3416_v10  ;;  %v677_v61 = vmul.f32 %v2739_v55, %v3418_v11 }
 0x117   : > { %728 = vst [vmem:[#allocation2 + $0x18] sm:$0xff] %v2625_v56  ;;  %v700_v62 = vmul.f32 %v687_v42, %v680_v57  ;;  %v701_v63 = vmul.f32 %v691_v43, %v681_v58 }
 0x118   : > { %726 = vst [vmem:[#allocation2 + $0x10] sm:$0xff] %v2623_v59  ;;  %v696_v0 = vmul.f32 %v687_v42, %v676_v60  ;;  %v697_v1 = vmul.f32 %v691_v43, %v677_v61 }
 0x119   : > { %v2626_v2 = vpack.c.bf16 %v701_v63, %v700_v62 }
 0x11a   : > { %v2624_v3 = vpack.c.bf16 %v697_v1, %v696_v0 }
 0x11b   : > { %729 = vst [vmem:[#allocation2 + $0x8] sm:$0xff] %v2626_v2 }
 0x11c   : > { %727 = vst [vmem:[#allocation2] sm:$0xff] %v2624_v3 }
 0x11d PF: > { %v2740_v4 = vld [vmem:[%s3395_s6 + $0xac] ss:$12 sps:$4 sm:$0xff]   ;;  %v2742_v5 = vld [vmem:[%s3395_s6 + $0x170] ss:$12 sps:$4 sm:$0xff]   ;;  %v2743_v6 = vld [vmem:[%s3395_s6 + $0xa8] ss:$12 sps:$4 sm:$0xff]  }
 0x11e   : > { %1082 = vmatprep.subr.bf16.mxu0 %v2740_v4  ;;  %2631 = vmatprep.subr.bf16.mxu1 %v2742_v5  ;;  %v2744_v7 = vld [vmem:[%s3395_s6 + $0xb0] ss:$12 sps:$4 sm:$0xff]   ;;  %v2745_v8 = vld [vmem:[%s3395_s6 + $0x94] ss:$12 sps:$4 sm:$0xff]   ;;  %v2747_v9 = vld [vmem:[%s3395_s6 + $0x158] ss:$12 sps:$4 sm:$0xff]  }
 0x11f   : > { %1083 = vmatpush1.bf16.msra.mxu0 %v2743_v6  ;;  %2632 = vmatpush3.bf16.msra.mxu1 %v2744_v7  ;;  %v2748_v10 = vld [vmem:[%s3395_s6 + $0x90] ss:$12 sps:$4 sm:$0xff]   ;;  %v2749_v11 = vld [vmem:[%s3395_s6 + $0x98] ss:$12 sps:$4 sm:$0xff]   ;;  %v2752_v13 = vld [vmem:[%s3395_s6 + $0x140] ss:$12 sps:$4 sm:$0xff]  }
 0x120   : > { %1084 = vmatprep.subr.bf16.mxu0 %v2745_v8  ;;  %2633 = vmatprep.subr.bf16.mxu1 %v2747_v9  ;;  %v2750_v12 = vld [vmem:[%s3395_s6 + $0x7c] ss:$12 sps:$4 sm:$0xff]   ;;  %v2753_v14 = vld [vmem:[%s3395_s6 + $0x78] ss:$12 sps:$4 sm:$0xff]   ;;  %v2754_v15 = vld [vmem:[%s3395_s6 + $0x80] ss:$12 sps:$4 sm:$0xff]  }
 0x121   : > { %v2755_v16 = vld [vmem:[%s3395_s6 + $0x64] ss:$12 sps:$4 sm:$0xff]   ;;  %v2757_v17 = vld [vmem:[%s3395_s6 + $0x128] ss:$12 sps:$4 sm:$0xff]   ;;  %v2758_v18 = vld [vmem:[%s3395_s6 + $0x60] ss:$12 sps:$4 sm:$0xff]  }
 0x122   : > { %v2759_v19 = vld [vmem:[%s3395_s6 + $0x68] ss:$12 sps:$4 sm:$0xff]   ;;  %v2760_v20 = vld [vmem:[%s3395_s6 + $0x4c] ss:$12 sps:$4 sm:$0xff]   ;;  %v2762_v21 = vld [vmem:[%s3395_s6 + $0x110] ss:$12 sps:$4 sm:$0xff]  }
 0x123   : > { %1085 = vmatpush1.bf16.msra.mxu0 %v2748_v10  ;;  %2634 = vmatpush3.bf16.msra.mxu1 %v2749_v11  ;;  %v2763_v22 = vld [vmem:[%s3395_s6 + $0x48] ss:$12 sps:$4 sm:$0xff]   ;;  %v2764_v23 = vld [vmem:[%s3395_s6 + $0x50] ss:$12 sps:$4 sm:$0xff]   ;;  %v2767_v25 = vld [vmem:[%s3395_s6 + $0xf8] ss:$12 sps:$4 sm:$0xff]  }
 0x124   : > { %1086 = vmatprep.subr.bf16.mxu0 %v2750_v12  ;;  %2635 = vmatprep.subr.bf16.mxu1 %v2752_v13  ;;  %v2765_v24 = vld [vmem:[%s3395_s6 + $0x34] ss:$12 sps:$4 sm:$0xff]   ;;  %v2768_v26 = vld [vmem:[%s3395_s6 + $0x30] ss:$12 sps:$4 sm:$0xff]   ;;  %v2769_v27 = vld [vmem:[%s3395_s6 + $0x38] ss:$12 sps:$4 sm:$0xff]  }
 0x125   : > { %v2770_v28 = vld [vmem:[%s3395_s6 + $0x1c] ss:$12 sps:$4 sm:$0xff]   ;;  %v2772_v29 = vld [vmem:[%s3395_s6 + $0xe0] ss:$12 sps:$4 sm:$0xff]   ;;  %v2773_v30 = vld [vmem:[%s3395_s6 + $0x18] ss:$12 sps:$4 sm:$0xff]  }
 0x126   : > { %v2774_v31 = vld [vmem:[%s3395_s6 + $0x20] ss:$12 sps:$4 sm:$0xff]   ;;  %v2775_v32 = vld [vmem:[%s3395_s6 + $0x4] ss:$12 sps:$4 sm:$0xff]   ;;  %v2777_v33 = vld [vmem:[%s3395_s6 + $0xc8] ss:$12 sps:$4 sm:$0xff]  }
 0x127   : > { %1087 = vmatpush1.bf16.msra.mxu0 %v2753_v14  ;;  %2636 = vmatpush3.bf16.msra.mxu1 %v2754_v15  ;;  %v3465_v34 = vld [vmem:[#allocation2 + $0x14] ss:$-16 sps:$4 sm:$0xff]   ;;  %v2778_v35 = vld [vmem:[%s3395_s6] ss:$12 sps:$4 sm:$0xff]   ;;  %v2791_v45 = vld [vmem:[%s3397_s7 + $0x90] ss:$12 sps:$4 sm:$0xff]  }
 0x128   : > { %1088 = vmatprep.subr.bf16.mxu0 %v2755_v16  ;;  %2637 = vmatprep.subr.bf16.mxu1 %v2757_v17  ;;  %v2779_v36 = vld [vmem:[%s3395_s6 + $0x8] ss:$12 sps:$4 sm:$0xff]   ;;  %v2782_v37 = vld [vmem:[%s3395_s6 + $0x16c] ss:$12 sps:$4 sm:$0xff]   ;;  %v3471_v38 = vld [vmem:[#allocation2 + $0x10] ss:$-16 sps:$4 sm:$0xff]  }
 0x129   : > { %1167 = vmatprep.mubr.bf16.mxu1 %v3465_v34  ;;  %v2787_v39 = vld [vmem:[%s3397_s7 + $0xac] ss:$12 sps:$4 sm:$0xff]   ;;  %v2785_v40 = vld [vmem:[%s3397_s7 + $0xa8] ss:$12 sps:$4 sm:$0xff]   ;;  %1114 = vmatprep.mubr.bf16.mxu0 %v3465_v34  ;;  %v2794_v46 = vld [vmem:[%s3395_s6 + $0x150] ss:$12 sps:$4 sm:$0xff]  }
 0x12a   : > { %v2788_v41 = vld [vmem:[%s3395_s6 + $0x168] ss:$12 sps:$4 sm:$0xff]   ;;  %v3479_v44 = vld [vmem:[#allocation2 + $0x1c] ss:$-16 sps:$4 sm:$0xff]   ;;  %v2800_v50 = vld [vmem:[%s3397_s7 + $0x78] ss:$12 sps:$4 sm:$0xff]  }
 0x12b   : > { %1089 = vmatpush1.bf16.msra.mxu0 %v2758_v18  ;;  %2638 = vmatpush3.bf16.msra.mxu1 %v2759_v19  ;;  %v2789_v42 = vld [vmem:[%s3395_s6 + $0x154] ss:$12 sps:$4 sm:$0xff]   ;;  %v2797_v47 = vld [vmem:[%s3395_s6 + $0x13c] ss:$12 sps:$4 sm:$0xff]   ;;  %v2803_v51 = vld [vmem:[%s3395_s6 + $0x138] ss:$12 sps:$4 sm:$0xff]  }
 0x12c   : > { %1090 = vmatprep.subr.bf16.mxu0 %v2760_v20  ;;  %2639 = vmatprep.subr.bf16.mxu1 %v2762_v21  ;;  %v2793_v43 = vld [vmem:[%s3397_s7 + $0x94] ss:$12 sps:$4 sm:$0xff]   ;;  %v2802_v48 = vld [vmem:[%s3397_s7 + $0x7c] ss:$12 sps:$4 sm:$0xff]   ;;  %v2804_v52 = vld [vmem:[%s3395_s6 + $0x124] ss:$12 sps:$4 sm:$0xff]  }
 0x12d   : > { %v3487_v49 = vld [vmem:[#allocation2 + $0x18] ss:$-16 sps:$4 sm:$0xff]   ;;  %v2808_v53 = vld [vmem:[%s3397_s7 + $0x64] ss:$12 sps:$4 sm:$0xff]   ;;  %v2806_v54 = vld [vmem:[%s3397_s7 + $0x60] ss:$12 sps:$4 sm:$0xff]  }
 0x12e   : > { %v2809_v55 = vld [vmem:[%s3395_s6 + $0x120] ss:$12 sps:$4 sm:$0xff]   ;;  %v2812_v58 = vld [vmem:[%s3397_s7 + $0x48] ss:$12 sps:$4 sm:$0xff]   ;;  %v2818_v62 = vld [vmem:[%s3397_s7 + $0x30] ss:$12 sps:$4 sm:$0xff]  }
 0x12f   : > { %1091 = vmatpush1.bf16.msra.mxu0 %v2763_v22  ;;  %2640 = vmatpush3.bf16.msra.mxu1 %v2764_v23  ;;  %v2810_v56 = vld [vmem:[%s3395_s6 + $0x10c] ss:$12 sps:$4 sm:$0xff]   ;;  %v2815_v59 = vld [vmem:[%s3395_s6 + $0x108] ss:$12 sps:$4 sm:$0xff]   ;;  %v2821_v63 = vld [vmem:[%s3395_s6 + $0xf0] ss:$12 sps:$4 sm:$0xff]  }
 0x130   : > { %1092 = vmatprep.subr.bf16.mxu0 %v2765_v24  ;;  %2641 = vmatprep.subr.bf16.mxu1 %v2767_v25  ;;  %v2814_v57 = vld [vmem:[%s3397_s7 + $0x4c] ss:$12 sps:$4 sm:$0xff]   ;;  %v2816_v60 = vld [vmem:[%s3395_s6 + $0xf4] ss:$12 sps:$4 sm:$0xff]   ;;  %v2822_v0 = vld [vmem:[%s3395_s6 + $0xdc] ss:$12 sps:$4 sm:$0xff]  }
 0x131   : > { %v2820_v61 = vld [vmem:[%s3397_s7 + $0x34] ss:$12 sps:$4 sm:$0xff]   ;;  %v2826_v1 = vld [vmem:[%s3397_s7 + $0x1c] ss:$12 sps:$4 sm:$0xff]   ;;  %v2824_v2 = vld [vmem:[%s3397_s7 + $0x18] ss:$12 sps:$4 sm:$0xff]  }
 0x132   : > { %v2827_v3 = vld [vmem:[%s3395_s6 + $0xd8] ss:$12 sps:$4 sm:$0xff]   ;;  %v2833_v6 = vld [vmem:[%s3395_s6 + $0xc0] ss:$12 sps:$4 sm:$0xff]   ;;  %v2837_v8 = vld [vmem:[%s3397_s7 + $0x170] ss:$12 sps:$4 sm:$0xff]  }
 0x133   : > { %1093 = vmatpush1.bf16.msra.mxu0 %v2768_v26  ;;  %2642 = vmatpush3.bf16.msra.mxu1 %v2769_v27  ;;  %v2828_v4 = vld [vmem:[%s3395_s6 + $0xc4] ss:$12 sps:$4 sm:$0xff]   ;;  %v2830_v7 = vld [vmem:[%s3397_s7] ss:$12 sps:$4 sm:$0xff]   ;;  %v2834_v10 = vld [vmem:[%s3397_s7 + $0x168] ss:$12 sps:$4 sm:$0xff]  }
 0x134   : > { %1094 = vmatprep.subr.bf16.mxu0 %v2770_v28  ;;  %2643 = vmatprep.subr.bf16.mxu1 %v2772_v29  ;;  %v2832_v5 = vld [vmem:[%s3397_s7 + $0x4] ss:$12 sps:$4 sm:$0xff]   ;;  %v2836_v9 = vld [vmem:[%s3397_s7 + $0x16c] ss:$12 sps:$4 sm:$0xff]   ;;  %v2841_v13 = vld [vmem:[%s3397_s7 + $0x154] ss:$12 sps:$4 sm:$0xff]  }
 0x135   : > { %v2838_v11 = vld [vmem:[%s3397_s7 + $0xb0] ss:$12 sps:$4 sm:$0xff]   ;;  %v2842_v12 = vld [vmem:[%s3397_s7 + $0x158] ss:$12 sps:$4 sm:$0xff]   ;;  %v2847_v16 = vld [vmem:[%s3397_s7 + $0x140] ss:$12 sps:$4 sm:$0xff]  }
 0x136   : > { %v2839_v14 = vld [vmem:[%s3397_s7 + $0x150] ss:$12 sps:$4 sm:$0xff]   ;;  %v2843_v15 = vld [vmem:[%s3397_s7 + $0x98] ss:$12 sps:$4 sm:$0xff]   ;;  %v2848_v19 = vld [vmem:[%s3397_s7 + $0x80] ss:$12 sps:$4 sm:$0xff]  }
 0x137   : > { %1095 = vmatpush1.bf16.msra.mxu0 %v2773_v30  ;;  %2644 = vmatpush3.bf16.msra.mxu1 %v2774_v31  ;;  %v2846_v17 = vld [vmem:[%s3397_s7 + $0x13c] ss:$12 sps:$4 sm:$0xff]   ;;  %v2844_v18 = vld [vmem:[%s3397_s7 + $0x138] ss:$12 sps:$4 sm:$0xff]   ;;  %v2849_v22 = vld [vmem:[%s3397_s7 + $0x120] ss:$12 sps:$4 sm:$0xff]  }
 0x138   : > { %1096 = vmatprep.subr.bf16.mxu0 %v2775_v32  ;;  %2645 = vmatprep.subr.bf16.mxu1 %v2777_v33  ;;  %v2852_v20 = vld [vmem:[%s3397_s7 + $0x128] ss:$12 sps:$4 sm:$0xff]   ;;  %v2851_v21 = vld [vmem:[%s3397_s7 + $0x124] ss:$12 sps:$4 sm:$0xff]   ;;  %v2856_v24 = vld [vmem:[%s3397_s7 + $0x10c] ss:$12 sps:$4 sm:$0xff]  }
 0x139   : > { %v2853_v23 = vld [vmem:[%s3397_s7 + $0x68] ss:$12 sps:$4 sm:$0xff]   ;;  %v2857_v25 = vld [vmem:[%s3397_s7 + $0x110] ss:$12 sps:$4 sm:$0xff]   ;;  %v2862_v28 = vld [vmem:[%s3397_s7 + $0xf8] ss:$12 sps:$4 sm:$0xff]  }
 0x13a   : > { %v2858_v26 = vld [vmem:[%s3397_s7 + $0x50] ss:$12 sps:$4 sm:$0xff]   ;;  %v2854_v27 = vld [vmem:[%s3397_s7 + $0x108] ss:$12 sps:$4 sm:$0xff]   ;;  %v2863_v30 = vld [vmem:[%s3397_s7 + $0x38] ss:$12 sps:$4 sm:$0xff]  }
 0x13b   : > { %1097 = vmatpush1.bf16.msra.mxu0 %v2778_v35  ;;  %2646 = vmatpush3.bf16.msra.mxu1 %v2779_v36  ;;  %v2861_v29 = vld [vmem:[%s3397_s7 + $0xf4] ss:$12 sps:$4 sm:$0xff]   ;;  %v2859_v31 = vld [vmem:[%s3397_s7 + $0xf0] ss:$12 sps:$4 sm:$0xff]   ;;  %v2864_v35 = vld [vmem:[%s3397_s7 + $0xd8] ss:$12 sps:$4 sm:$0xff]  }
 0x13c   : > { %1098 = vmatprep.subr.bf16.mxu0 %v2782_v37  ;;  %1504 = vmatprep.subr.bf16.mxu1 %v2787_v39  ;;  %v2867_v32 = vld [vmem:[%s3397_s7 + $0xe0] ss:$12 sps:$4 sm:$0xff]   ;;  %v2866_v33 = vld [vmem:[%s3397_s7 + $0xdc] ss:$12 sps:$4 sm:$0xff]   ;;  %v2871_v37 = vld [vmem:[%s3397_s7 + $0xc4] ss:$12 sps:$4 sm:$0xff]  }
 0x13d   : > { %v2872_v36 = vld [vmem:[%s3397_s7 + $0xc8] ss:$12 sps:$4 sm:$0xff]   ;;  %p2611_p11 = scmp.ne.s32.totalorder %s3024_s20, 1 }
 0x13e   : > { %1168 = vmatmul.mubr.bf16.vlgmr.msra.gmra.mxu1 %v3471_v38  ;;  %v2873_v39 = vld [vmem:[%s3397_s7 + $0x8] ss:$12 sps:$4 sm:$0xff]  }
 0x13f   : > { %1099 = vmatpush2.bf16.msra.mxu0 %v2788_v41  ;;  %1505 = vmatpush1.bf16.msra.mxu1 %v2785_v40  ;;  %v2869_v40 = vld [vmem:[%s3397_s7 + $0xc0] ss:$12 sps:$4 sm:$0xff]   ;;  %v2876_v41 = vld [vmem:[%s3393_s30 + $0x74] ss:$8 sps:$4 sm:$0xff]  }
 0x140   : > { %1100 = vmatprep.subr.bf16.mxu0 %v2789_v42  ;;  %1506 = vmatprep.subr.bf16.mxu1 %v2793_v43  ;;  %v2874_v42 = vld [vmem:[%s3393_s30 + $0x70] ss:$8 sps:$4 sm:$0xff]   ;;  %v2879_v43 = vld [vmem:[%s3393_s30 + $0x64] ss:$8 sps:$4 sm:$0xff]  }
 0x141   : > { %1175 = vmatprep.mubr.bf16.mxu1 %v3479_v44 }
 0x143   : > { %1101 = vmatpush2.bf16.msra.mxu0 %v2794_v46  ;;  %1507 = vmatpush1.bf16.msra.mxu1 %v2791_v45  ;;  %v2877_v45 = vld [vmem:[%s3393_s30 + $0x60] ss:$8 sps:$4 sm:$0xff]   ;;  %v2885_v46 = vld [vmem:[%s3393_s30 + $0x44] ss:$8 sps:$4 sm:$0xff]  }
 0x144   : > { %1102 = vmatprep.subr.bf16.mxu0 %v2797_v47  ;;  %1508 = vmatprep.subr.bf16.mxu1 %v2802_v48  ;;  %v2883_v47 = vld [vmem:[%s3393_s30 + $0x40] ss:$8 sps:$4 sm:$0xff]   ;;  %v2888_v48 = vld [vmem:[%s3393_s30 + $0x34] ss:$8 sps:$4 sm:$0xff]  }
 0x146   : > { %1176 = vmatmul.mubr.bf16.gmra.mxu1 %v3487_v49 }
 0x147   : > { %1103 = vmatpush2.bf16.msra.mxu0 %v2803_v51  ;;  %1509 = vmatpush1.bf16.msra.mxu1 %v2800_v50  ;;  %v2891_v50 = vld [vmem:[%s3393_s30 + $0x24] ss:$8 sps:$4 sm:$0xff]   ;;  %v2889_v51 = vld [vmem:[%s3393_s30 + $0x20] ss:$8 sps:$4 sm:$0xff]  }
 0x148   : > { %1104 = vmatprep.subr.bf16.mxu0 %v2804_v52  ;;  %1510 = vmatprep.subr.bf16.mxu1 %v2808_v53  ;;  %v2894_v52 = vld [vmem:[%s3393_s30 + $0x14] ss:$8 sps:$4 sm:$0xff]   ;;  %v2892_v53 = vld [vmem:[%s3393_s30 + $0x10] ss:$8 sps:$4 sm:$0xff]  }
 0x149   : > { %1536 = vmatprep.mubr.bf16.mxu1 %v3465_v34 }
 0x14b   : > { %1105 = vmatpush2.bf16.msra.mxu0 %v2809_v55  ;;  %1511 = vmatpush1.bf16.msra.mxu1 %v2806_v54  ;;  %v2897_v54 = vld [vmem:[%s3393_s30 + $0x4] ss:$8 sps:$4 sm:$0xff]   ;;  %v2895_v55 = vld [vmem:[%s3393_s30] ss:$8 sps:$4 sm:$0xff]  }
 0x14c   : > { %1106 = vmatprep.subr.bf16.mxu0 %v2810_v56  ;;  %1512 = vmatprep.subr.bf16.mxu1 %v2814_v57  ;;  %v2900_v56 = vld [vmem:[%s3393_s30 + $0x174] ss:$8 sps:$4 sm:$0xff]   ;;  %v2898_v57 = vld [vmem:[%s3393_s30 + $0x170] ss:$8 sps:$4 sm:$0xff]  }
 0x14f   : > { %1107 = vmatpush2.bf16.msra.mxu0 %v2815_v59  ;;  %1513 = vmatpush1.bf16.msra.mxu1 %v2812_v58  ;;  %v2903_v58 = vld [vmem:[%s3393_s30 + $0xf4] ss:$8 sps:$4 sm:$0xff]   ;;  %v2901_v59 = vld [vmem:[%s3393_s30 + $0xf0] ss:$8 sps:$4 sm:$0xff]  }
 0x150   : > { %1108 = vmatprep.subr.bf16.mxu0 %v2816_v60  ;;  %1514 = vmatprep.subr.bf16.mxu1 %v2820_v61  ;;  %v2906_v60 = vld [vmem:[%s3393_s30 + $0x164] ss:$8 sps:$4 sm:$0xff]   ;;  %v2904_v61 = vld [vmem:[%s3393_s30 + $0x160] ss:$8 sps:$4 sm:$0xff]  }
 0x153   : > { %1109 = vmatpush2.bf16.msra.mxu0 %v2821_v63  ;;  %1515 = vmatpush1.bf16.msra.mxu1 %v2818_v62  ;;  %v2909_v62 = vld [vmem:[%s3393_s30 + $0xe4] ss:$8 sps:$4 sm:$0xff]   ;;  %v2907_v63 = vld [vmem:[%s3393_s30 + $0xe0] ss:$8 sps:$4 sm:$0xff]  }
 0x154   : > { %1110 = vmatprep.subr.bf16.mxu0 %v2822_v0  ;;  %1516 = vmatprep.subr.bf16.mxu1 %v2826_v1  ;;  %v2912_v0 = vld [vmem:[%s3393_s30 + $0x154] ss:$8 sps:$4 sm:$0xff]   ;;  %v2910_v1 = vld [vmem:[%s3393_s30 + $0x150] ss:$8 sps:$4 sm:$0xff]  }
 0x157   : > { %1111 = vmatpush2.bf16.msra.mxu0 %v2827_v3  ;;  %1517 = vmatpush1.bf16.msra.mxu1 %v2824_v2  ;;  %v2915_v2 = vld [vmem:[%s3393_s30 + $0xd4] ss:$8 sps:$4 sm:$0xff]   ;;  %v2913_v3 = vld [vmem:[%s3393_s30 + $0xd0] ss:$8 sps:$4 sm:$0xff]  }
 0x158   : > { %1112 = vmatprep.subr.bf16.mxu0 %v2828_v4  ;;  %1518 = vmatprep.subr.bf16.mxu1 %v2832_v5  ;;  %v2918_v4 = vld [vmem:[%s3393_s30 + $0x144] ss:$8 sps:$4 sm:$0xff]   ;;  %v2916_v5 = vld [vmem:[%s3393_s30 + $0x140] ss:$8 sps:$4 sm:$0xff]  }
 0x15b   : > { %1113 = vmatpush2.bf16.msra.mxu0 %v2833_v6  ;;  %1519 = vmatpush1.bf16.msra.mxu1 %v2830_v7  ;;  %v2921_v6 = vld [vmem:[%s3393_s30 + $0xc4] ss:$8 sps:$4 sm:$0xff]   ;;  %v2919_v7 = vld [vmem:[%s3393_s30 + $0xc0] ss:$8 sps:$4 sm:$0xff]  }
 0x15c   : > { %2659 = vmatprep.subr.bf16.mxu0 %v2837_v8  ;;  %1520 = vmatprep.subr.bf16.mxu1 %v2836_v9  ;;  %v2924_v8 = vld [vmem:[%s3393_s30 + $0x134] ss:$8 sps:$4 sm:$0xff]   ;;  %v2922_v9 = vld [vmem:[%s3393_s30 + $0x130] ss:$8 sps:$4 sm:$0xff]  }
 0x15e   : > { %1115 = vmatmul.mubr.bf16.vlgmr.msra.gmra.mxu0 %v3471_v38 }
 0x15f   : > { %2660 = vmatpush3.bf16.msra.mxu0 %v2838_v11  ;;  %1124 = vmatprep.mubr.bf16.mxu0 %v3479_v44  ;;  %v2925_v11 = vld [vmem:[%s3393_s30 + $0xb0] ss:$8 sps:$4 sm:$0xff]  }
 0x160   : > { %1521 = vmatpush2.bf16.msra.mxu1 %v2834_v10  ;;  %2661 = vmatprep.subr.bf16.mxu0 %v2842_v12  ;;  %v2927_v10 = vld [vmem:[%s3393_s30 + $0xb4] ss:$8 sps:$4 sm:$0xff]   ;;  %v2930_v12 = vld [vmem:[%s3393_s30 + $0x124] ss:$8 sps:$4 sm:$0xff]  }
 0x161   : > { %1522 = vmatprep.subr.bf16.mxu1 %v2841_v13  ;;  %v2928_v13 = vld [vmem:[%s3393_s30 + $0x120] ss:$8 sps:$4 sm:$0xff]  }
 0x163   : > { %2662 = vmatpush3.bf16.msra.mxu0 %v2843_v15  ;;  %v2931_v15 = vld [vmem:[%s3393_s30 + $0xa0] ss:$8 sps:$4 sm:$0xff]  }
 0x164   : > { %1523 = vmatpush2.bf16.msra.mxu1 %v2839_v14  ;;  %2663 = vmatprep.subr.bf16.mxu0 %v2847_v16  ;;  %v2933_v14 = vld [vmem:[%s3393_s30 + $0xa4] ss:$8 sps:$4 sm:$0xff]   ;;  %v2936_v16 = vld [vmem:[%s3393_s30 + $0x114] ss:$8 sps:$4 sm:$0xff]  }
 0x165   : > { %1524 = vmatprep.subr.bf16.mxu1 %v2846_v17  ;;  %v2934_v17 = vld [vmem:[%s3393_s30 + $0x110] ss:$8 sps:$4 sm:$0xff]  }
 0x166   : > { %1125 = vmatmul.mubr.bf16.gmra.mxu0 %v3487_v49 }
 0x167   : > { %2664 = vmatpush3.bf16.msra.mxu0 %v2848_v19  ;;  %1589 = vmatprep.mubr.bf16.mxu0 %v3465_v34  ;;  %v2868_v34 = vld [vmem:[%s3397_s7 + $0x20] ss:$12 sps:$4 sm:$0xff]   ;;  %v2937_v19 = vld [vmem:[%s3393_s30 + $0x90] ss:$8 sps:$4 sm:$0xff]  }
 0x168   : > { %1525 = vmatpush2.bf16.msra.mxu1 %v2844_v18  ;;  %2665 = vmatprep.subr.bf16.mxu0 %v2852_v20  ;;  %v2939_v18 = vld [vmem:[%s3393_s30 + $0x94] ss:$8 sps:$4 sm:$0xff]   ;;  %v2942_v20 = vld [vmem:[%s3393_s30 + $0x104] ss:$8 sps:$4 sm:$0xff]  }
 0x169   : > { %1526 = vmatprep.subr.bf16.mxu1 %v2851_v21  ;;  %v2940_v21 = vld [vmem:[%s3393_s30 + $0x100] ss:$8 sps:$4 sm:$0xff]  }
 0x16b   : > { %2666 = vmatpush3.bf16.msra.mxu0 %v2853_v23  ;;  %v2943_v23 = vld [vmem:[%s3393_s30 + $0x80] ss:$8 sps:$4 sm:$0xff]  }
 0x16c   : > { %1527 = vmatpush2.bf16.msra.mxu1 %v2849_v22  ;;  %2667 = vmatprep.subr.bf16.mxu0 %v2857_v25  ;;  %v2945_v22 = vld [vmem:[%s3393_s30 + $0x84] ss:$8 sps:$4 sm:$0xff]  }
 0x16d   : > { %1528 = vmatprep.subr.bf16.mxu1 %v2856_v24  ;;  %v3035_v24 = vmov 0  }
 0x16f   : > { %2668 = vmatpush3.bf16.msra.mxu0 %v2858_v26 }
 0x170   : > { %1529 = vmatpush2.bf16.msra.mxu1 %v2854_v27  ;;  %2669 = vmatprep.subr.bf16.mxu0 %v2862_v28 }
 0x171   : > { %1530 = vmatprep.subr.bf16.mxu1 %v2861_v29 }
 0x173   : > { %2670 = vmatpush3.bf16.msra.mxu0 %v2863_v30 }
 0x174   : > { %1531 = vmatpush2.bf16.msra.mxu1 %v2859_v31  ;;  %2671 = vmatprep.subr.bf16.mxu0 %v2867_v32 }
 0x175   : > { %1532 = vmatprep.subr.bf16.mxu1 %v2866_v33 }
 0x177   : > { %2672 = vmatpush3.bf16.msra.mxu0 %v2868_v34 }
 0x178   : > { %1533 = vmatpush2.bf16.msra.mxu1 %v2864_v35  ;;  %2673 = vmatprep.subr.bf16.mxu0 %v2872_v36 }
 0x179   : > { %1534 = vmatprep.subr.bf16.mxu1 %v2871_v37 }
 0x17b   : > { %2674 = vmatpush3.bf16.msra.mxu0 %v2873_v39 }
 0x17c   : > { %1535 = vmatpush2.bf16.msra.mxu1 %v2869_v40  ;;  %2004 = vmatprep.subr.bf16.mxu0 %v2876_v41 }
 0x17d   : > { %2057 = vmatprep.subr.bf16.mxu1 %v2900_v56 }
 0x17e   : > { %1590 = vmatmul.mubr.bf16.vlgmr.msra.gmra.mxu0 %v3471_v38 }
 0x17f   : > { %1537 = vmatmul.mubr.bf16.vlgmr.msra.gmra.mxu1 %v3471_v38  ;;  %1597 = vmatprep.mubr.bf16.mxu0 %v3479_v44  ;;  %v2882_v38 = vld [vmem:[%s3393_s30 + $0x54] ss:$8 sps:$4 sm:$0xff]  }
 0x180   : > { %1546 = vmatprep.mubr.bf16.mxu1 %v3479_v44  ;;  %2005 = vmatpush1.bf16.msra.mxu0 %v2874_v42  ;;  %v2880_v44 = vld [vmem:[%s3393_s30 + $0x50] ss:$8 sps:$4 sm:$0xff]  }
 0x181   : > { %2006 = vmatprep.subr.bf16.mxu0 %v2879_v43  ;;  %2058 = vmatpush1.bf16.msra.mxu1 %v2898_v57 }
 0x182   : > { %2059 = vmatprep.subr.bf16.mxu1 %v2906_v60 }
 0x184   : > { %2007 = vmatpush1.bf16.msra.mxu0 %v2877_v45 }
 0x185   : > { %2008 = vmatprep.subr.bf16.mxu0 %v2882_v38  ;;  %2060 = vmatpush1.bf16.msra.mxu1 %v2904_v61 }
 0x186   : > { %1598 = vmatmul.mubr.bf16.gmra.mxu0 %v3487_v49  ;;  %2061 = vmatprep.subr.bf16.mxu1 %v2912_v0 }
 0x187   : > { %1547 = vmatmul.mubr.bf16.gmra.mxu1 %v3487_v49  ;;  %v2886_v49 = vld [vmem:[%s3393_s30 + $0x30] ss:$8 sps:$4 sm:$0xff]  }
 0x188   : > { %2009 = vmatpush1.bf16.msra.mxu0 %v2880_v44  ;;  %2089 = vmatprep.mubr.bf16.mxu1 %v3035_v24 }
 0x189   : > { %2010 = vmatprep.subr.bf16.mxu0 %v2885_v46  ;;  %2062 = vmatpush1.bf16.msra.mxu1 %v2910_v1 }
 0x18a   : > { %2063 = vmatprep.subr.bf16.mxu1 %v2918_v4 }
 0x18c   : > { %2011 = vmatpush1.bf16.msra.mxu0 %v2883_v47 }
 0x18d   : > { %2012 = vmatprep.subr.bf16.mxu0 %v2888_v48  ;;  %2064 = vmatpush1.bf16.msra.mxu1 %v2916_v5 }
 0x18e   : > { %2065 = vmatprep.subr.bf16.mxu1 %v2924_v8 }
 0x190   : > { %2013 = vmatpush1.bf16.msra.mxu0 %v2886_v49 }
 0x191   : > { %2014 = vmatprep.subr.bf16.mxu0 %v2891_v50  ;;  %2066 = vmatpush1.bf16.msra.mxu1 %v2922_v9 }
 0x192   : > { %2067 = vmatprep.subr.bf16.mxu1 %v2930_v12 }
 0x194   : > { %2015 = vmatpush1.bf16.msra.mxu0 %v2889_v51 }
 0x195   : > { %2016 = vmatprep.subr.bf16.mxu0 %v2894_v52  ;;  %2068 = vmatpush1.bf16.msra.mxu1 %v2928_v13 }
 0x196   : > { %2069 = vmatprep.subr.bf16.mxu1 %v2936_v16 }
 0x198   : > { %2017 = vmatpush1.bf16.msra.mxu0 %v2892_v53 }
 0x199   : > { %2018 = vmatprep.subr.bf16.mxu0 %v2897_v54  ;;  %2070 = vmatpush1.bf16.msra.mxu1 %v2934_v17 }
 0x19a   : > { %2071 = vmatprep.subr.bf16.mxu1 %v2942_v20 }
 0x19c   : > { %2019 = vmatpush1.bf16.msra.mxu0 %v2895_v55 }
 0x19d   : > { %2020 = vmatprep.subr.bf16.mxu0 %v2903_v58  ;;  %2072 = vmatpush1.bf16.msra.mxu1 %v2940_v21 }
 0x1a0   : > { %2021 = vmatpush2.bf16.msra.mxu0 %v2901_v59 }
 0x1a1   : > { %2022 = vmatprep.subr.bf16.mxu0 %v2909_v62 }
 0x1a4   : > { %2023 = vmatpush2.bf16.msra.mxu0 %v2907_v63 }
 0x1a5   : > { %2024 = vmatprep.subr.bf16.mxu0 %v2915_v2 }
 0x1a8   : > { %2025 = vmatpush2.bf16.msra.mxu0 %v2913_v3 }
 0x1a9   : > { %2026 = vmatprep.subr.bf16.mxu0 %v2921_v6 }
 0x1ac   : > { %2027 = vmatpush2.bf16.msra.mxu0 %v2919_v7 }
 0x1ad   : > { %2028 = vmatprep.subr.bf16.mxu0 %v2927_v10 }
 0x1b0   : > { %2029 = vmatpush2.bf16.msra.mxu0 %v2925_v11 }
 0x1b1   : > { %2030 = vmatprep.subr.bf16.mxu0 %v2933_v14 }
 0x1b4   : > { %2031 = vmatpush2.bf16.msra.mxu0 %v2931_v15 }
 0x1b5   : > { %2032 = vmatprep.subr.bf16.mxu0 %v2939_v18 }
 0x1b8   : > { %2033 = vmatpush2.bf16.msra.mxu0 %v2937_v19 }
 0x1b9   : > { %2034 = vmatprep.subr.bf16.mxu0 %v2945_v22 }
 0x1bc   : > { %2035 = vmatpush2.bf16.msra.mxu0 %v2943_v23 }
 0x1fe   : > { %v2647_v25 = vpop.f32.mrf.mxu1 }
 0x200   : > { %v2648_v26 = vpop.f32.mrf.mxu1 }
 0x201   : > { %v3604_v31 = vadd.f32 %v2648_v26, %v2647_v25 }
 0x202   : > { %v2650_v27 = vpop.f32.mrf.mxu1 }
 0x203   : > { %v2553_v34 = vmul.f32 -1.442695, %v3604_v31 }
 0x204   : > { %v2651_v28 = vpop.f32.mrf.mxu1 }
 0x205   : > { %v3606_v32 = vadd.f32 %v2651_v28, %v2650_v27  ;;  %2946 = vpow2.f32 %v2553_v34 }
 0x206   : > { %v2653_v29 = vpop.f32.mrf.mxu1 }
 0x207   : > { %v2556_v35 = vmul.f32 -1.442695, %v3606_v32 }
 0x208   : > { %v2654_v30 = vpop.f32.mrf.mxu1 }
 0x209   : > { %v3610_v37 = vadd.f32 %v2654_v30, %v2653_v29  ;;  %2948 = vpow2.f32 %v2556_v35 }
 0x20a   : > { %v2656_v33 = vpop.f32.mrf.mxu1 }
 0x20b   : > { %v2559_v42 = vmul.f32 -1.442695, %v3610_v37 }
 0x20c   : > { %v2657_v36 = vpop.f32.mrf.mxu1 }
 0x20d   : > { %v3612_v39 = vadd.f32 %v2657_v36, %v2656_v33 }
 0x20f   : > { %v2562_v38 = vmul.f32 -1.442695, %v3612_v39 }
 0x212   : > { %v2947_v53 = vpop.eup %2946 }
 0x213   : > { %v1644_v58 = vadd.f32 1.0, %v2947_v53 }
 0x216   : > { %v2949_v55 = vpop.eup %2948 }
 0x217   : > { %v1647_v61 = vadd.f32 1.0, %v2949_v55 }
 0x21e   : > { %v3614_v40 = vpop.f32.mrf.mxu0 }
 0x21f   : > { %v2551_v41 = vmul.f32 -1.442695, %v3614_v40 }
 0x220   : > { %v3618_v43 = vpop.f32.mrf.mxu0 }
 0x221   : > { %2950 = vpow2.f32 %v2551_v41  ;;  %v2552_v45 = vmul.f32 -1.442695, %v3618_v43 }
 0x222   : > { %v3622_v44 = vpop.f32.mrf.mxu0 }
 0x223   : > { %2952 = vpow2.f32 %v2552_v45  ;;  %v2554_v46 = vmul.f32 -1.442695, %v3622_v44 }
 0x224   : > { %2954 = vpow2.f32 %v2559_v42  ;;  %v3625_v47 = vpop.f32.mrf.mxu0 }
 0x225   : > { %2956 = vpow2.f32 %v2554_v46  ;;  %v2555_v48 = vmul.f32 -1.442695, %v3625_v47 }
 0x226   : > { %2958 = vpow2.f32 %v2562_v38  ;;  %v3628_v49 = vpop.f32.mrf.mxu0 }
 0x227   : > { %2960 = vpow2.f32 %v2555_v48  ;;  %v2557_v50 = vmul.f32 -1.442695, %v3628_v49 }
 0x228   : > { %v3631_v51 = vpop.f32.mrf.mxu0 }
 0x229   : > { %2962 = vpow2.f32 %v2557_v50  ;;  %v2558_v52 = vmul.f32 -1.442695, %v3631_v51 }
 0x22a   : > { %v3634_v54 = vpop.f32.mrf.mxu0 }
 0x22b   : > { %2964 = vpow2.f32 %v2558_v52  ;;  %v2560_v56 = vmul.f32 -1.442695, %v3634_v54 }
 0x22c   : > { %v3637_v57 = vpop.f32.mrf.mxu0 }
 0x22d   : > { %2966 = vpow2.f32 %v2560_v56  ;;  %v2561_v59 = vmul.f32 -1.442695, %v3637_v57 }
 0x22e   : > { %v2951_v60 = vpop.eup %2950 }
 0x22f   : > { %2968 = vpow2.f32 %v2561_v59  ;;  %v1642_v63 = vadd.f32 1.0, %v2951_v60 }
 0x230   : > { %v2953_v62 = vpop.eup %2952  ;;  %2970 = vrcp.f32 %v1644_v58 }
 0x231   : > { %v2955_v0 = vpop.eup %2954  ;;  %v1643_v1 = vadd.f32 1.0, %v2953_v62  ;;  %2972 = vrcp.f32 %v1647_v61 }
 0x232   : > { %v2957_v2 = vpop.eup %2956  ;;  %v1650_v6 = vadd.f32 1.0, %v2955_v0 }
 0x233   : > { %v2959_v3 = vpop.eup %2958  ;;  %2974 = vrcp.f32 %v1643_v1  ;;  %v1645_v4 = vadd.f32 1.0, %v2957_v2 }
 0x234   : > { %v2961_v5 = vpop.eup %2960  ;;  %2976 = vrcp.f32 %v1642_v63  ;;  %v1653_v9 = vadd.f32 1.0, %v2959_v3 }
 0x235   : > { %2978 = vrcp.f32 %v1645_v4  ;;  %v1646_v7 = vadd.f32 1.0, %v2961_v5 }
 0x236   : > { %v2963_v8 = vpop.eup %2962 }
 0x237   : > { %2980 = vrcp.f32 %v1646_v7  ;;  %v1648_v11 = vadd.f32 1.0, %v2963_v8 }
 0x238   : > { %v2965_v10 = vpop.eup %2964  ;;  %2982 = vrcp.f32 %v1650_v6 }
 0x239   : > { %v1649_v12 = vadd.f32 1.0, %v2965_v10  ;;  %2984 = vrcp.f32 %v1653_v9 }
 0x23a   : > { %v2967_v13 = vpop.eup %2966 }
 0x23b   : > { %2986 = vrcp.f32 %v1649_v12  ;;  %v1651_v14 = vadd.f32 1.0, %v2967_v13 }
 0x23c   : > { %v2969_v15 = vpop.eup %2968  ;;  %2988 = vrcp.f32 %v1648_v11 }
 0x23d   : > { %2990 = vrcp.f32 %v1651_v14  ;;  %v1652_v16 = vadd.f32 1.0, %v2969_v15  ;;  %v2971_v17 = vpop.eup %2970 }
 0x23e   : > { %v2675_v18 = vpop.f32.mrf.mxu0  ;;  %v2973_v19 = vpop.eup %2972  ;;  %v1680_v41 = vmul.f32 %v2971_v17, %v3604_v31 }
 0x23f   : > { %2992 = vrcp.f32 %v1652_v16  ;;  %v1538_v20 = vpop.f32.mrf.mxu1  ;;  %v1683_v42 = vmul.f32 %v2973_v19, %v3606_v32 }
 0x240   : > { %v2975_v21 = vpop.eup %2974  ;;  %v2676_v22 = vpop.f32.mrf.mxu0 }
 0x241   : > { %v2977_v23 = vpop.eup %2976  ;;  %v1540_v25 = vpop.f32.mrf.mxu1  ;;  %v1679_v28 = vmul.f32 %v2975_v21, %v3618_v43  ;;  %v2677_v30 = vadd.f32 %v2676_v22, %v2675_v18 }
 0x242   : > { %v2979_v26 = vpop.eup %2978  ;;  %v2678_v27 = vpop.f32.mrf.mxu0  ;;  %v1678_v35 = vmul.f32 %v2977_v23, %v3614_v40 }
 0x243   : > { %v1681_v29 = vmul.f32 %v2979_v26, %v3622_v44  ;;  %v1542_v33 = vpop.f32.mrf.mxu1  ;;  %v1691_v53 = vmul.f32 %v1679_v28, %v1540_v25  ;;  %v1692_v44 = vmul.f32 %v2677_v30, %v1680_v41  ;;  %v1704_v26 = vld [vmem:[#allocation3 + $0x8] sm:$0xff] }
 0x244   : > { %v2981_v34 = vpop.eup %2980  ;;  %v2679_v36 = vpop.f32.mrf.mxu0  ;;  %v1690_v40 = vmul.f32 %v1678_v35, %v1538_v20 }
 0x245   : > { %v1682_v45 = vmul.f32 %v2981_v34, %v3625_v47  ;;  %v1544_v38 = vpop.f32.mrf.mxu1  ;;  %v2680_v46 = vadd.f32 %v2679_v36, %v2678_v27  ;;  %v2983_v48 = vpop.eup %2982  ;;  %v1693_v50 = vmul.f32 %v1681_v29, %v1542_v33  ;;  %v1705_v33 = vld [vmem:[#allocation3 + $0x18] sm:$0xff] }
 0x246   : > { %v2681_v52 = vpop.f32.mrf.mxu0  ;;  %v2985_v43 = vpop.eup %2984  ;;  %v1686_v8 = vmul.f32 %v2983_v48, %v3610_v37  ;;  %v1702_v37 = vld [vmem:[#allocation3] sm:$0xff] }
 0x247   : > { %v1694_v55 = vmul.f32 %v1682_v45, %v1544_v38  ;;  %v1695_v56 = vmul.f32 %v2680_v46, %v1683_v42  ;;  %v1548_v58 = vpop.f32.mrf.mxu1  ;;  %v1710_v47 = vpack.c.bf16 %v1693_v50, %v1690_v40  ;;  %v1689_v9 = vmul.f32 %v2985_v43, %v3612_v39  ;;  %v1706_v42 = vld [vmem:[#allocation3 + $0x20] sm:$0xff]  ;;  %v1707_v50 = vld [vmem:[#allocation3 + $0x10] sm:$0xff] }
 0x248   : > { %v2987_v59 = vpop.eup %2986  ;;  %v2682_v60 = vpop.f32.mrf.mxu0 }
 0x249   : > { %v2989_v61 = vpop.eup %2988  ;;  %v1711_v31 = vpack.c.bf16 %v1694_v55, %v1691_v53  ;;  %v1712_v62 = vpack.c.bf16 %v1695_v56, %v1692_v44  ;;  %v1550_v32 = vpop.f32.mrf.mxu1  ;;  %v1685_v1 = vmul.f32 %v2987_v59, %v3631_v51  ;;  %v2683_v3 = vadd.f32 %v2682_v60, %v2681_v52  ;;  %v1708_v55 = vld [vmem:[#allocation3 + $0x30] sm:$0xff]  ;;  %v1709_v60 = vld [vmem:[#allocation3 + $0x28] sm:$0xff] }
 0x24a   : > { %v2991_v63 = vpop.eup %2990  ;;  %v2684_v0 = vpop.f32.mrf.mxu0  ;;  %v1684_v6 = vmul.f32 %v2989_v61, %v3628_v49 }
 0x24b   : > { %v1687_v2 = vmul.f32 %v2991_v63, %v3634_v54  ;;  %v1552_v4 = vpop.f32.mrf.mxu1  ;;  %2036 = vmatprep.mubr.bf16.mxu0 %v1711_v31  ;;  %2090 = vmatmul.mubr.bf16.vlgmr.msra.gmra.mxu1 %v1712_v62  ;;  %v1697_v12 = vmul.f32 %v1685_v1, %v1550_v32  ;;  %v1698_v13 = vmul.f32 %v2683_v3, %v1686_v8 }
 0x24c   : > { %v2993_v5 = vpop.eup %2992  ;;  %v2685_v7 = vpop.f32.mrf.mxu0  ;;  %2037 = vmatmul.mubr.bf16.vlgmr.msra.gmra.mxu0 %v1710_v47  ;;  %2099 = vmatprep.mubr.bf16.mxu1 %v3035_v24  ;;  %v1696_v16 = vmul.f32 %v1684_v6, %v1548_v58 }
 0x24d   : > { %v1688_v10 = vmul.f32 %v2993_v5, %v3637_v57  ;;  %v2686_v51 = vadd.f32 %v2685_v7, %v2684_v0  ;;  %v1699_v11 = vmul.f32 %v1687_v2, %v1552_v4  ;;  %v1554_v54 = vpop.f32.mrf.mxu1  ;;  %v1703_v57 = vld [vmem:[#allocation3 + $0x38] sm:$0xff] }
 0x24f   : > { %v1700_v14 = vmul.f32 %v1688_v10, %v1554_v54  ;;  %v1701_v15 = vmul.f32 %v2686_v51, %v1689_v9  ;;  %v1713_v18 = vpack.c.bf16 %v1699_v11, %v1696_v16 }
 0x251   : > { %v1714_v17 = vpack.c.bf16 %v1700_v14, %v1697_v12  ;;  %v1715_v49 = vpack.c.bf16 %v1701_v15, %v1698_v13 }
 0x253   : > { %2046 = vmatprep.mubr.bf16.mxu0 %v1714_v17  ;;  %2100 = vmatmul.mubr.bf16.gmra.mxu1 %v1715_v49 }
 0x254   : > { %2047 = vmatmul.mubr.bf16.gmra.mxu0 %v1713_v18 }
 0x30b   : > { %v2091_v24 = vpop.f32.mrf.mxu1 }
 0x30c   : > { %v2038_v19 = vpop.f32.mrf.mxu0 }
 0x30d   : > { %v2092_v39 = vadd.f32 %v2091_v24, %v2038_v19  ;;  %v2093_v20 = vpop.f32.mrf.mxu1 }
 0x30e   : > { %v2040_v21 = vpop.f32.mrf.mxu0 }
 0x30f   : > { %v2110_v22 = vadd.f32 %v2092_v39, %v1702_v37  ;;  %v2094_v23 = vadd.f32 %v2093_v20, %v2040_v21  ;;  %v2095_v25 = vpop.f32.mrf.mxu1 }
 0x310   : > { %v2042_v27 = vpop.f32.mrf.mxu0 }
 0x311   : > { %2118 = vst [vmem:[#allocation3] sm:$0xff] %v2110_v22  ;;  %v2111_v28 = vadd.f32 %v2094_v23, %v1703_v57  ;;  %v2096_v29 = vadd.f32 %v2095_v25, %v2042_v27  ;;  %v2097_v30 = vpop.f32.mrf.mxu1 }
 0x312   : > { %v2044_v34 = vpop.f32.mrf.mxu0 }
 0x313   : > { %2119 = vst [vmem:[#allocation3 + $0x38] sm:$0xff] %v2111_v28  ;;  %v2112_v35 = vadd.f32 %v2096_v29, %v1704_v26  ;;  %v2098_v36 = vadd.f32 %v2097_v30, %v2044_v34  ;;  %v2101_v41 = vpop.f32.mrf.mxu1 }
 0x314   : > { %v2048_v45 = vpop.f32.mrf.mxu0 }
 0x315   : > { %2120 = vst [vmem:[#allocation3 + $0x8] sm:$0xff] %v2112_v35  ;;  %v2113_v38 = vadd.f32 %v2098_v36, %v1705_v33  ;;  %v2102_v46 = vadd.f32 %v2101_v41, %v2048_v45  ;;  %v2103_v48 = vpop.f32.mrf.mxu1 }
 0x316   : > { %v2050_v52 = vpop.f32.mrf.mxu0 }
 0x317   : > { %2121 = vst [vmem:[#allocation3 + $0x18] sm:$0xff] %v2113_v38  ;;  %v2114_v43 = vadd.f32 %v2102_v46, %v1706_v42  ;;  %v2104_v53 = vadd.f32 %v2103_v48, %v2050_v52  ;;  %v2105_v44 = vpop.f32.mrf.mxu1 }
 0x318   : > { %v2052_v56 = vpop.f32.mrf.mxu0 }
 0x319   : > { %2122 = vst [vmem:[#allocation3 + $0x20] sm:$0xff] %v2114_v43  ;;  %v2115_v58 = vadd.f32 %v2104_v53, %v1707_v50  ;;  %v2106_v59 = vadd.f32 %v2105_v44, %v2052_v56  ;;  %v2107_v40 = vpop.f32.mrf.mxu1 }
 0x31a   : > { %v2054_v61 = vpop.f32.mrf.mxu0 }
 0x31b   : > { %2123 = vst [vmem:[#allocation3 + $0x10] sm:$0xff] %v2115_v58  ;;  %v2116_v31 = vadd.f32 %v2106_v59, %v1708_v55  ;;  %v2108_v62 = vadd.f32 %v2107_v40, %v2054_v61  ;;  %2129 = sbr.rel (%p2611_p11) target bundleno = 812 (0x32c), region = 100 }
 0x31d   : > { %2124 = vst [vmem:[#allocation3 + $0x30] sm:$0xff] %v2116_v31  ;;  %v2117_v32 = vadd.f32 %v2108_v62, %v1709_v60 }
 0x31f   : > { %2125 = vst [vmem:[#allocation3 + $0x28] sm:$0xff] %v2117_v32 }
 0x320   : > { %v2130_v63 = vld [vmem:[#allocation3] sm:$0xff]  ;;  %v2131_v47 = vld [vmem:[#allocation3 + $0x38] sm:$0xff]  ;;  %v2132_v3 = vld [vmem:[#allocation3 + $0x8] sm:$0xff] }
 0x321   : > { %v2138_v0 = vld [vmem:[%s3693_s0] sm:$0xff]  ;;  %v2133_v4 = vld [vmem:[#allocation3 + $0x18] sm:$0xff]  ;;  %v2139_v5 = vld [vmem:[%s3693_s0 + $0x8] sm:$0xff] }
 0x322   : > { %v2142_v1 = vunpack.c.l.bf16 %v2138_v0  ;;  %v2143_v2 = vunpack.c.h.bf16 %v2138_v0  ;;  %v2144_v6 = vunpack.c.l.bf16 %v2139_v5  ;;  %v2145_v7 = vunpack.c.h.bf16 %v2139_v5  ;;  %v2134_v8 = vld [vmem:[#allocation3 + $0x20] sm:$0xff]  ;;  %v2135_v9 = vld [vmem:[#allocation3 + $0x10] sm:$0xff]  ;;  %v2141_v15 = vld [vmem:[%s3693_s0 + $0x18] sm:$0xff] }
 0x323   : > { %v2140_v10 = vld [vmem:[%s3693_s0 + $0x10] sm:$0xff]  ;;  %v2148_v49 = vunpack.c.l.bf16 %v2141_v15  ;;  %v2149_v18 = vunpack.c.h.bf16 %v2141_v15 }
 0x324   : > { %v2150_v51 = vadd.f32 %v2142_v1, %v2130_v63  ;;  %v2151_v11 = vadd.f32 %v2143_v2, %v2131_v47  ;;  %v2146_v54 = vunpack.c.l.bf16 %v2140_v10  ;;  %v2147_v12 = vunpack.c.h.bf16 %v2140_v10  ;;  %v2136_v13 = vld [vmem:[#allocation3 + $0x30] sm:$0xff] }
 0x325   : > { %v2152_v16 = vadd.f32 %v2144_v6, %v2132_v3  ;;  %v2153_v17 = vadd.f32 %v2145_v7, %v2133_v4  ;;  %v2156_v20 = vadd.f32 %v2148_v49, %v2136_v13 }
 0x326   : > { %v2137_v14 = vld [vmem:[#allocation3 + $0x28] sm:$0xff]  ;;  %v2627_v24 = vpack.c.bf16 %v2151_v11, %v2150_v51  ;;  %v2154_v37 = vadd.f32 %v2146_v54, %v2134_v8  ;;  %v2155_v19 = vadd.f32 %v2147_v12, %v2135_v9 }
 0x327   : > { %v2628_v39 = vpack.c.bf16 %v2153_v17, %v2152_v16  ;;  %v2157_v57 = vadd.f32 %v2149_v18, %v2137_v14 }
 0x328   : > { %2182 = vst [vmem:[%s3698_s5] sm:$0xff] %v2627_v24  ;;  %v2629_v21 = vpack.c.bf16 %v2155_v19, %v2154_v37 }
 0x329   : > { %2183 = vst [vmem:[%s3698_s5 + $0x8] sm:$0xff] %v2628_v39  ;;  %v2630_v22 = vpack.c.bf16 %v2157_v57, %v2156_v20 }
 0x32a   : > { %2184 = vst [vmem:[%s3698_s5 + $0x10] sm:$0xff] %v2629_v21 }
 0x32b   : > { %2185 = vst [vmem:[%s3698_s5 + $0x18] sm:$0xff] %v2630_v22 }
 0x32c PF: > { %s15_s22 = sadd.s32 1, %s3032_s22   ;;  %s3700_s18 = smov %s3020_s19 }
 0x32d   : > { %p12_p12 = scmp.ge.s32.totalorder %s15_s22, 4   ;;  %s3701_s19 = smov %s3105_s27 }
 0x32e   : > { %s3702_s20 = smov %s3028_s21  ;;  %s3703_s21 = smov %s3705_s23 }
 0x32f   :  { %14 = sbr.rel (!%p12_p12) target bundleno = 3 (0x3), region = 161 }

</bundles_post_ra>
